<compile_context>
chip_gen: v7x
topology: tpu7x:2x2x1
jax: 0.10.0
libtpu: 0.0.40
codegen_flags: <defaults>
</compile_context>

<pallas_src>
import jax
import jax.numpy as jnp
from jax import lax
from jax.experimental import pallas as pl
from jax.experimental.pallas import tpu as pltpu


# --------------------------------------------------------------------------- #
# Kernel
# --------------------------------------------------------------------------- #
def _sablock_accum_kernel(sel_ref, xp_ref, w_ref, res_ref, out_ref):
    """One grid step = one SABlock adapter applied to one row tile, accumulated.

    sel_ref : SMEM (A,) int32          scalar-prefetch adapter -> aux index (index_maps only)
    xp_ref  : (TILE_H+2, W+2, C) bf16  haloed, zero-padded source-task row tile
    w_ref   : (A*9, C, 2*C) bf16       ALL fused [w_conv | w_att] tap weights
                                       (constant block index -> DMA'd once, VMEM resident)
    res_ref : (M, C) f32               target-task features (residual), M = TILE_H*W
    out_ref : (M, C) f32               resident accumulator / final output
    """
    del sel_ref  # only used inside index_maps
    a = pl.program_id(1)               # adapter index (inner, "arbitrary") axis

    @pl.when(a == 0)
    def _():
        out_ref[...] = res_ref[...]

    thp2, wp2, c = xp_ref.shape
    th, w = thp2 - 2, wp2 - 2
    m = th * w

    xp = xp_ref[...]                   # (TILE_H+2, W+2, C) bf16, loaded once
    # 9 accumulating (M, C) x (C, 2C) MXU matmuls on the shifted 3x3 tap slices.
    # No im2col scratch: K = C already fills the MXU; the f32 tap partials stay in
    # vregs / the MXU result buffer (MRB in-place accumulation on v7x).
    acc = None
    for ky in range(3):
        for kx in range(3):
            patch = xp[ky:ky + th, kx:kx + w, :].reshape(m, c)
            part = jnp.dot(patch, w_ref[a * 9 + (ky * 3 + kx)],
                           preferred_element_type=jnp.float32)
            acc = part if acc is None else acc + part

    feat = acc[:, :c]
    att = jax.nn.sigmoid(acc[:, c:])   # f32 epilogue (v5e has no bf16 VPU/EUP)
    out_ref[...] += feat * att


# --------------------------------------------------------------------------- #
# Tile-size / VMEM-budget selection
# --------------------------------------------------------------------------- #
def _pick_tile_h_and_vmem(h, w, c, a_dim, tile_h=None):
    """Largest divisor of H whose working set fits a v7x-safe VMEM budget, plus a
    vmem limit derived from that working set (re-derived whenever TILE_H changes)."""
    budget = 20 * 1024 * 1024  # headroom for v7x (64 MiB/TC, 32 MiB default scoped)

    def est(th):
        m = th * w
        xp_b = 2 * (th + 2) * (w + 2) * c * 2        # double-buffered bf16 input tile
        res_b = 2 * m * c * 4                        # residual (fetched once per tile)
        out_b = 2 * m * c * 4                        # resident output accumulator
        wgt_b = 2 * a_dim * 9 * c * (2 * c) * 2      # resident weight stack (worst case 2 bufs)
        acc_b = m * (2 * c) * 4                      # f32 matmul accumulator / epilogue temps
        return xp_b + res_b + out_b + wgt_b + acc_b

    if tile_h is None:
        cands = [d for d in range(h, 0, -1) if h % d == 0 and (d * w) % 8 == 0]
        # TODO(synk): pad H*W to a multiple of 8 (or keep a 3-D tile path) for ragged
        # production shapes like 65x65 where no divisor of H satisfies (TILE_H*W) % 8 == 0.
        assert cands, "need a row tile with (TILE_H*W) %% 8 == 0 (H=%d, W=%d)" % (h, w)
        tile_h = next((d for d in cands if est(d) <= budget), cands[-1])
    vmem_limit = int(min(max(2 * est(tile_h) + (8 << 20), 32 << 20), 96 << 20))
    return tile_h, vmem_limit


# --------------------------------------------------------------------------- #
# Per-target pallas_call
# --------------------------------------------------------------------------- #
def _distill_one_task(sel, xp_all, w_stack, res_flat, m, vmem_limit):
    """sel: (A,) int32; xp_all: (n_aux, N*T, TH+2, W+2, C) bf16;
    w_stack: (A*9, C, 2C) bf16; res_flat: (N*H*W, C) f32."""
    n_aux, nt, thp2, wp2, c = xp_all.shape
    a_dim = w_stack.shape[0] // 9

    return pl.pallas_call(
        _sablock_accum_kernel,
        out_shape=jax.ShapeDtypeStruct(res_flat.shape, jnp.float32),
        grid_spec=pltpu.PrefetchScalarGridSpec(
            num_scalar_prefetch=1,
            # (batch*row-tiles, adapters): adapters innermost so the output block is
            # resident (accumulator); merged leading axis shards evenly on v7x megacore.
            grid=(nt, a_dim),
            in_specs=[
                # haloed row tile of the selected auxiliary task's padded features
                pl.BlockSpec((None, None, thp2, wp2, c),
                             lambda bi, ai, sel_ref: (sel_ref[ai], bi, 0, 0, 0)),
                # whole fused weight stack, constant block index -> fetched once, resident
                pl.BlockSpec((a_dim * 9, c, 2 * c),
                             lambda bi, ai, sel_ref: (0, 0, 0)),
                # residual (block index independent of the adapter axis -> once per tile)
                pl.BlockSpec((m, c), lambda bi, ai, sel_ref: (bi, 0)),
            ],
            out_specs=pl.BlockSpec((m, c), lambda bi, ai, sel_ref: (bi, 0)),
        ),
        compiler_params=pltpu.CompilerParams(
            dimension_semantics=("parallel", "arbitrary"),
            vmem_limit_bytes=vmem_limit,
        ),
    )(sel, xp_all, w_stack, res_flat)


# --------------------------------------------------------------------------- #
# Module wrapper (PyTorch NCHW / OIHW convention in & out)
# --------------------------------------------------------------------------- #
def multi_task_distillation(x_nchw, params, tasks, aux_tasks, tile_h=None):
    """x_nchw: dict 'features_<task>' -> (N, C, H, W) f32.
    params[t][a]: {'w_att': (C, C, 3, 3), 'w_conv': (C, C, 3, 3)} (PyTorch OIHW)."""
    aux_list = list(aux_tasks)
    x0 = x_nchw['features_%s' % aux_list[0]]
    n, c, h, w = x0.shape

    max_adapters = max(len([a for a in aux_list if a != t]) for t in tasks)
    th, vmem_limit = _pick_tile_h_and_vmem(h, w, c, max(max_adapters, 1), tile_h)
    assert h % th == 0 and (th * w) % 8 == 0
    n_tiles = h // th
    m = th * w
    row_idx = (jnp.arange(n_tiles) * th)[:, None] + jnp.arange(th + 2)[None, :]

    def prep(x):
        # NCHW f32 -> padded, haloed, row-tiled NHWC bf16: (N*T, TH+2, W+2, C).
        # TODO(synk): fetch overlapping H windows directly from the padded array
        # (pl.Element-style index arithmetic) to avoid this extra HBM copy of aux features.
        xh = jnp.transpose(x, (0, 2, 3, 1)).astype(jnp.bfloat16)
        xp = jnp.pad(xh, ((0, 0), (1, 1), (1, 1), (0, 0)))
        return xp[:, row_idx].reshape(n * n_tiles, th + 2, w + 2, c)

    # Done ONCE and shared by every target task.
    xp_all = jnp.stack([prep(x_nchw['features_%s' % a]) for a in aux_list])

    out = {}
    for t in tasks:
        others = [a for a in aux_list if a != t]
        res = x_nchw['features_%s' % t]
        if not others:  # no adapters for this target -> pure residual
            out[t] = res
            continue
        sel = jnp.array([aux_list.index(a) for a in others], jnp.int32)
        ws = []
        for a in others:
            # OIHW -> HWIO, fuse [feat | att] along Cout, flatten to per-tap (9, C, 2C).
            w_att = jnp.transpose(params[t][a]['w_att'], (2, 3, 1, 0))
            w_conv = jnp.transpose(params[t][a]['w_conv'], (2, 3, 1, 0))
            wcat = jnp.concatenate([w_conv, w_att], axis=-1)          # (3, 3, C, 2C)
            ws.append(wcat.reshape(9, c, 2 * c).astype(jnp.bfloat16))
        w_stack = jnp.concatenate(ws, axis=0)                          # (A*9, C, 2C)
        res_flat = jnp.transpose(res, (0, 2, 3, 1)).reshape(n * h * w, c)  # f32 (N*H*W, C)
        o = _distill_one_task(sel, xp_all, w_stack, res_flat, m, vmem_limit)
        out[t] = jnp.transpose(o.reshape(n, h, w, c), (0, 3, 1, 2))    # back to NCHW
    return out


# --------------------------------------------------------------------------- #
# Pure-JAX reference (bf16-rounded operands, matching the kernel's MXU path)
# --------------------------------------------------------------------------- #
def _ref_forward(x_nchw, params, tasks, aux_tasks):
    dn = ('NCHW', 'OIHW', 'NCHW')

    def rt(v):  # bf16 round-trip: same operand rounding the kernel applies
        return v.astype(jnp.bfloat16).astype(jnp.float32)

    out = {}
    for t in tasks:
        others = [a for a in aux_tasks if a != t]
        acc = x_nchw['features_%s' % t]
        for a in others:
            xb = rt(x_nchw['features_%s' % a])
            wa = rt(params[t][a]['w_att'])
            wc = rt(params[t][a]['w_conv'])
            att = jax.nn.sigmoid(lax.conv_general_dilated(
                xb, wa, (1, 1), 'SAME', dimension_numbers=dn))
            feat = lax.conv_general_dilated(
                xb, wc, (1, 1), 'SAME', dimension_numbers=dn)
            acc = acc + feat * att
        out[t] = acc
    return out


# --------------------------------------------------------------------------- #
if __name__ == "__main__":
    tasks = ['semseg', 'depth']
    aux_tasks = ['semseg', 'depth', 'normals']
    # C = 128 keeps every load/store lane-dense (production DeepLab uses C = 256).
    N, C, H, W = 2, 128, 16, 16

    key = jax.random.PRNGKey(0)

    x = {}
    for a in aux_tasks:
        key, sub = jax.random.split(key)
        x['features_%s' % a] = jax.random.normal(sub, (N, C, H, W), jnp.float32)

    params = {}
    for t in tasks:
        params[t] = {}
        for a in [a for a in aux_tasks if a != t]:
            key, k1, k2 = jax.random.split(key, 3)
            params[t][a] = {
                'w_att': 0.1 * jax.random.normal(k1, (C, C, 3, 3), jnp.float32),
                'w_conv': 0.1 * jax.random.normal(k2, (C, C, 3, 3), jnp.float32),
            }

    out = multi_task_distillation(x, params, tasks, aux_tasks)
    out = {t: jax.block_until_ready(v) for t, v in out.items()}

    ref = _ref_forward(x, params, tasks, aux_tasks)
    for t in tasks:
        assert out[t].shape == (N, C, H, W)
        if not jnp.allclose(out[t], ref[t], atol=2e-3, rtol=2e-3):
            err = float(jnp.max(jnp.abs(out[t] - ref[t])))
            raise AssertionError("mismatch vs reference for task %s (max err %g)"
                                 % (t, err))

    print("KERNEL_OK")
</pallas_src>

<mosaic_0001>
module attributes {stable_mosaic.version = 11 : i64} {
  func.func @_sablock_accum_kernel(%arg0: i32, %arg1: i32, %arg2: memref<2xi32, #tpu.memory_space<smem>>, %arg3: memref<1x1x18x18x128xbf16, #tpu.memory_space<vmem>>, %arg4: memref<18x128x256xbf16, #tpu.memory_space<vmem>>, %arg5: memref<256x128xf32, #tpu.memory_space<vmem>>, %arg6: memref<256x128xf32, #tpu.memory_space<vmem>>) attributes {dimension_semantics = [#tpu.dimension_semantics<parallel>, #tpu.dimension_semantics<arbitrary>], iteration_bounds = array<i64: 2, 2>, scalar_prefetch = 1 : i64, scratch_operands = 0 : i64, tpu.core_type = #tpu.core_type<tc>, window_params = [{transform_indices = @transform_0, window_bounds = array<i64: 1, 1, 18, 18, 128>}, {pipeline_mode = #tpu.pipeline_mode<synchronous>, transform_indices = @transform_1, window_bounds = array<i64: 18, 128, 256>}, {transform_indices = @transform_2, window_bounds = array<i64: 256, 128>}, {transform_indices = @transform_3, window_bounds = array<i64: 256, 128>}]} {
    %c0_i32 = arith.constant 0 : i32
    %0 = arith.cmpi eq, %arg1, %c0_i32 : i32
    %1 = arith.extui %0 : i1 to i32
    %c0_i32_0 = arith.constant 0 : i32
    %2 = arith.cmpi ne, %1, %c0_i32_0 : i32
    scf.if %2 {
      %c0_45 = arith.constant 0 : index
      %c0_46 = arith.constant 0 : index
      %96 = vector.load %arg5[%c0_45, %c0_46] : memref<256x128xf32, #tpu.memory_space<vmem>>, vector<256x128xf32>
      %c0_47 = arith.constant 0 : index
      %c0_48 = arith.constant 0 : index
      %97 = vector.load %arg6[%c0_47, %c0_48] : memref<256x128xf32, #tpu.memory_space<vmem>>, vector<256x128xf32>
      tpu.vector_store %arg6[%c0_47, %c0_48], %96 {strides = array<i32>} : memref<256x128xf32, #tpu.memory_space<vmem>>, vector<256x128xf32>,
    } else {
    }
    %c0 = arith.constant 0 : index
    %c0_1 = arith.constant 0 : index
    %c0_2 = arith.constant 0 : index
    %c0_3 = arith.constant 0 : index
    %c0_4 = arith.constant 0 : index
    %3 = vector.load %arg3[%c0, %c0_1, %c0_2, %c0_3, %c0_4] : memref<1x1x18x18x128xbf16, #tpu.memory_space<vmem>>, vector<1x1x18x18x128xbf16>
    %4 = vector.shape_cast %3 : vector<1x1x18x18x128xbf16> to vector<18x18x128xbf16>
    %5 = vector.extract_strided_slice %4 {offsets = [0, 0, 0], sizes = [16, 16, 128], strides = [1, 1, 1]} : vector<18x18x128xbf16> to vector<16x16x128xbf16>
    %6 = vector.shape_cast %5 : vector<16x16x128xbf16> to vector<256x128xbf16>
    %c9_i32 = arith.constant 9 : i32
    %7 = arith.muli %arg1, %c9_i32 : i32
    %c0_i32_5 = arith.constant 0 : i32
    %8 = arith.addi %7, %c0_i32_5 : i32
    %9 = arith.index_cast %8 : i32 to index
    %c0_6 = arith.constant 0 : index
    %c0_7 = arith.constant 0 : index
    %10 = vector.load %arg4[%9, %c0_6, %c0_7] : memref<18x128x256xbf16, #tpu.memory_space<vmem>>, vector<1x128x256xbf16>
    %11 = vector.shape_cast %10 : vector<1x128x256xbf16> to vector<128x256xbf16>
    %cst = arith.constant dense<0.000000e+00> : vector<256x256xf32>
    %12 = tpu.matmul %6, %11, %cst {dimension_numbers = #tpu.dot_dimension_numbers<[1], [0], [0], [1], [0, 0, 1, 1], [], []>} : vector<256x128xbf16>, vector<128x256xbf16>, vector<256x256xf32> -> vector<256x256xf32>
    %13 = vector.extract_strided_slice %4 {offsets = [0, 1, 0], sizes = [16, 16, 128], strides = [1, 1, 1]} : vector<18x18x128xbf16> to vector<16x16x128xbf16>
    %14 = vector.shape_cast %13 : vector<16x16x128xbf16> to vector<256x128xbf16>
    %c9_i32_8 = arith.constant 9 : i32
    %15 = arith.muli %arg1, %c9_i32_8 : i32
    %c1_i32 = arith.constant 1 : i32
    %16 = arith.addi %15, %c1_i32 : i32
    %17 = arith.index_cast %16 : i32 to index
    %c0_9 = arith.constant 0 : index
    %c0_10 = arith.constant 0 : index
    %18 = vector.load %arg4[%17, %c0_9, %c0_10] : memref<18x128x256xbf16, #tpu.memory_space<vmem>>, vector<1x128x256xbf16>
    %19 = vector.shape_cast %18 : vector<1x128x256xbf16> to vector<128x256xbf16>
    %cst_11 = arith.constant dense<0.000000e+00> : vector<256x256xf32>
    %20 = tpu.matmul %14, %19, %cst_11 {dimension_numbers = #tpu.dot_dimension_numbers<[1], [0], [0], [1], [0, 0, 1, 1], [], []>} : vector<256x128xbf16>, vector<128x256xbf16>, vector<256x256xf32> -> vector<256x256xf32>
    %21 = arith.addf %12, %20 : vector<256x256xf32>
    %22 = vector.extract_strided_slice %4 {offsets = [0, 2, 0], sizes = [16, 16, 128], strides = [1, 1, 1]} : vector<18x18x128xbf16> to vector<16x16x128xbf16>
    %23 = vector.shape_cast %22 : vector<16x16x128xbf16> to vector<256x128xbf16>
    %c9_i32_12 = arith.constant 9 : i32
    %24 = arith.muli %arg1, %c9_i32_12 : i32
    %c2_i32 = arith.constant 2 : i32
    %25 = arith.addi %24, %c2_i32 : i32
    %26 = arith.index_cast %25 : i32 to index
    %c0_13 = arith.constant 0 : index
    %c0_14 = arith.constant 0 : index
    %27 = vector.load %arg4[%26, %c0_13, %c0_14] : memref<18x128x256xbf16, #tpu.memory_space<vmem>>, vector<1x128x256xbf16>
    %28 = vector.shape_cast %27 : vector<1x128x256xbf16> to vector<128x256xbf16>
    %cst_15 = arith.constant dense<0.000000e+00> : vector<256x256xf32>
    %29 = tpu.matmul %23, %28, %cst_15 {dimension_numbers = #tpu.dot_dimension_numbers<[1], [0], [0], [1], [0, 0, 1, 1], [], []>} : vector<256x128xbf16>, vector<128x256xbf16>, vector<256x256xf32> -> vector<256x256xf32>
    %30 = arith.addf %21, %29 : vector<256x256xf32>
    %31 = vector.extract_strided_slice %4 {offsets = [1, 0, 0], sizes = [16, 16, 128], strides = [1, 1, 1]} : vector<18x18x128xbf16> to vector<16x16x128xbf16>
    %32 = vector.shape_cast %31 : vector<16x16x128xbf16> to vector<256x128xbf16>
    %c9_i32_16 = arith.constant 9 : i32
    %33 = arith.muli %arg1, %c9_i32_16 : i32
    %c3_i32 = arith.constant 3 : i32
    %34 = arith.addi %33, %c3_i32 : i32
    %35 = arith.index_cast %34 : i32 to index
    %c0_17 = arith.constant 0 : index
    %c0_18 = arith.constant 0 : index
    %36 = vector.load %arg4[%35, %c0_17, %c0_18] : memref<18x128x256xbf16, #tpu.memory_space<vmem>>, vector<1x128x256xbf16>
    %37 = vector.shape_cast %36 : vector<1x128x256xbf16> to vector<128x256xbf16>
    %cst_19 = arith.constant dense<0.000000e+00> : vector<256x256xf32>
    %38 = tpu.matmul %32, %37, %cst_19 {dimension_numbers = #tpu.dot_dimension_numbers<[1], [0], [0], [1], [0, 0, 1, 1], [], []>} : vector<256x128xbf16>, vector<128x256xbf16>, vector<256x256xf32> -> vector<256x256xf32>
    %39 = arith.addf %30, %38 : vector<256x256xf32>
    %40 = vector.extract_strided_slice %4 {offsets = [1, 1, 0], sizes = [16, 16, 128], strides = [1, 1, 1]} : vector<18x18x128xbf16> to vector<16x16x128xbf16>
    %41 = vector.shape_cast %40 : vector<16x16x128xbf16> to vector<256x128xbf16>
    %c9_i32_20 = arith.constant 9 : i32
    %42 = arith.muli %arg1, %c9_i32_20 : i32
    %c4_i32 = arith.constant 4 : i32
    %43 = arith.addi %42, %c4_i32 : i32
    %44 = arith.index_cast %43 : i32 to index
    %c0_21 = arith.constant 0 : index
    %c0_22 = arith.constant 0 : index
    %45 = vector.load %arg4[%44, %c0_21, %c0_22] : memref<18x128x256xbf16, #tpu.memory_space<vmem>>, vector<1x128x256xbf16>
    %46 = vector.shape_cast %45 : vector<1x128x256xbf16> to vector<128x256xbf16>
    %cst_23 = arith.constant dense<0.000000e+00> : vector<256x256xf32>
    %47 = tpu.matmul %41, %46, %cst_23 {dimension_numbers = #tpu.dot_dimension_numbers<[1], [0], [0], [1], [0, 0, 1, 1], [], []>} : vector<256x128xbf16>, vector<128x256xbf16>, vector<256x256xf32> -> vector<256x256xf32>
    %48 = arith.addf %39, %47 : vector<256x256xf32>
    %49 = vector.extract_strided_slice %4 {offsets = [1, 2, 0], sizes = [16, 16, 128], strides = [1, 1, 1]} : vector<18x18x128xbf16> to vector<16x16x128xbf16>
    %50 = vector.shape_cast %49 : vector<16x16x128xbf16> to vector<256x128xbf16>
    %c9_i32_24 = arith.constant 9 : i32
    %51 = arith.muli %arg1, %c9_i32_24 : i32
    %c5_i32 = arith.constant 5 : i32
    %52 = arith.addi %51, %c5_i32 : i32
    %53 = arith.index_cast %52 : i32 to index
    %c0_25 = arith.constant 0 : index
    %c0_26 = arith.constant 0 : index
    %54 = vector.load %arg4[%53, %c0_25, %c0_26] : memref<18x128x256xbf16, #tpu.memory_space<vmem>>, vector<1x128x256xbf16>
    %55 = vector.shape_cast %54 : vector<1x128x256xbf16> to vector<128x256xbf16>
    %cst_27 = arith.constant dense<0.000000e+00> : vector<256x256xf32>
    %56 = tpu.matmul %50, %55, %cst_27 {dimension_numbers = #tpu.dot_dimension_numbers<[1], [0], [0], [1], [0, 0, 1, 1], [], []>} : vector<256x128xbf16>, vector<128x256xbf16>, vector<256x256xf32> -> vector<256x256xf32>
    %57 = arith.addf %48, %56 : vector<256x256xf32>
    %58 = vector.extract_strided_slice %4 {offsets = [2, 0, 0], sizes = [16, 16, 128], strides = [1, 1, 1]} : vector<18x18x128xbf16> to vector<16x16x128xbf16>
    %59 = vector.shape_cast %58 : vector<16x16x128xbf16> to vector<256x128xbf16>
    %c9_i32_28 = arith.constant 9 : i32
    %60 = arith.muli %arg1, %c9_i32_28 : i32
    %c6_i32 = arith.constant 6 : i32
    %61 = arith.addi %60, %c6_i32 : i32
    %62 = arith.index_cast %61 : i32 to index
    %c0_29 = arith.constant 0 : index
    %c0_30 = arith.constant 0 : index
    %63 = vector.load %arg4[%62, %c0_29, %c0_30] : memref<18x128x256xbf16, #tpu.memory_space<vmem>>, vector<1x128x256xbf16>
    %64 = vector.shape_cast %63 : vector<1x128x256xbf16> to vector<128x256xbf16>
    %cst_31 = arith.constant dense<0.000000e+00> : vector<256x256xf32>
    %65 = tpu.matmul %59, %64, %cst_31 {dimension_numbers = #tpu.dot_dimension_numbers<[1], [0], [0], [1], [0, 0, 1, 1], [], []>} : vector<256x128xbf16>, vector<128x256xbf16>, vector<256x256xf32> -> vector<256x256xf32>
    %66 = arith.addf %57, %65 : vector<256x256xf32>
    %67 = vector.extract_strided_slice %4 {offsets = [2, 1, 0], sizes = [16, 16, 128], strides = [1, 1, 1]} : vector<18x18x128xbf16> to vector<16x16x128xbf16>
    %68 = vector.shape_cast %67 : vector<16x16x128xbf16> to vector<256x128xbf16>
    %c9_i32_32 = arith.constant 9 : i32
    %69 = arith.muli %arg1, %c9_i32_32 : i32
    %c7_i32 = arith.constant 7 : i32
    %70 = arith.addi %69, %c7_i32 : i32
    %71 = arith.index_cast %70 : i32 to index
    %c0_33 = arith.constant 0 : index
    %c0_34 = arith.constant 0 : index
    %72 = vector.load %arg4[%71, %c0_33, %c0_34] : memref<18x128x256xbf16, #tpu.memory_space<vmem>>, vector<1x128x256xbf16>
    %73 = vector.shape_cast %72 : vector<1x128x256xbf16> to vector<128x256xbf16>
    %cst_35 = arith.constant dense<0.000000e+00> : vector<256x256xf32>
    %74 = tpu.matmul %68, %73, %cst_35 {dimension_numbers = #tpu.dot_dimension_numbers<[1], [0], [0], [1], [0, 0, 1, 1], [], []>} : vector<256x128xbf16>, vector<128x256xbf16>, vector<256x256xf32> -> vector<256x256xf32>
    %75 = arith.addf %66, %74 : vector<256x256xf32>
    %76 = vector.extract_strided_slice %4 {offsets = [2, 2, 0], sizes = [16, 16, 128], strides = [1, 1, 1]} : vector<18x18x128xbf16> to vector<16x16x128xbf16>
    %77 = vector.shape_cast %76 : vector<16x16x128xbf16> to vector<256x128xbf16>
    %c9_i32_36 = arith.constant 9 : i32
    %78 = arith.muli %arg1, %c9_i32_36 : i32
    %c8_i32 = arith.constant 8 : i32
    %79 = arith.addi %78, %c8_i32 : i32
    %80 = arith.index_cast %79 : i32 to index
    %c0_37 = arith.constant 0 : index
    %c0_38 = arith.constant 0 : index
    %81 = vector.load %arg4[%80, %c0_37, %c0_38] : memref<18x128x256xbf16, #tpu.memory_space<vmem>>, vector<1x128x256xbf16>
    %82 = vector.shape_cast %81 : vector<1x128x256xbf16> to vector<128x256xbf16>
    %cst_39 = arith.constant dense<0.000000e+00> : vector<256x256xf32>
    %83 = tpu.matmul %77, %82, %cst_39 {dimension_numbers = #tpu.dot_dimension_numbers<[1], [0], [0], [1], [0, 0, 1, 1], [], []>} : vector<256x128xbf16>, vector<128x256xbf16>, vector<256x256xf32> -> vector<256x256xf32>
    %84 = arith.addf %75, %83 : vector<256x256xf32>
    %85 = vector.extract_strided_slice %84 {offsets = [0, 0], sizes = [256, 128], strides = [1, 1]} : vector<256x256xf32> to vector<256x128xf32>
    %86 = vector.extract_strided_slice %84 {offsets = [0, 128], sizes = [256, 128], strides = [1, 1]} : vector<256x256xf32> to vector<256x128xf32>
    %87 = arith.negf %86 : vector<256x128xf32>
    %88 = math.exp %87 : vector<256x128xf32>
    %cst_40 = arith.constant 1.000000e+00 : f32
    %89 = vector.broadcast %cst_40 : f32 to vector<256x128xf32>
    %90 = arith.addf %89, %88 : vector<256x128xf32>
    %91 = arith.divf %89, %90 : vector<256x128xf32>
    %c0_41 = arith.constant 0 : index
    %c0_42 = arith.constant 0 : index
    %92 = vector.load %arg6[%c0_41, %c0_42] : memref<256x128xf32, #tpu.memory_space<vmem>>, vector<256x128xf32>
    %93 = arith.mulf %85, %91 : vector<256x128xf32>
    %94 = arith.addf %92, %93 : vector<256x128xf32>
    %c0_43 = arith.constant 0 : index
    %c0_44 = arith.constant 0 : index
    %95 = vector.load %arg6[%c0_43, %c0_44] : memref<256x128xf32, #tpu.memory_space<vmem>>, vector<256x128xf32>
    tpu.vector_store %arg6[%c0_43, %c0_44], %94 {strides = array<i32>} : memref<256x128xf32, #tpu.memory_space<vmem>>, vector<256x128xf32>,
    return
  }
  func.func @transform_0(%arg0: i32, %arg1: i32, %arg2: memref<2xi32, #tpu.memory_space<smem>>) -> (i32, i32, i32, i32, i32) {
    %0 = arith.index_cast %arg1 : i32 to index
    %1 = memref.load %arg2[%0] : memref<2xi32, #tpu.memory_space<smem>>
    %c0_i32 = arith.constant 0 : i32
    %c0_i32_0 = arith.constant 0 : i32
    %c0_i32_1 = arith.constant 0 : i32
    %c0_i32_2 = arith.constant 0 : i32
    return %1, %arg0, %c0_i32, %c0_i32_0, %c0_i32_1 : i32, i32, i32, i32, i32
  }
  func.func @transform_1(%arg0: i32, %arg1: i32, %arg2: memref<2xi32, #tpu.memory_space<smem>>) -> (i32, i32, i32) {
    %c0_i32 = arith.constant 0 : i32
    %c0_i32_0 = arith.constant 0 : i32
    %c0_i32_1 = arith.constant 0 : i32
    %c0_i32_2 = arith.constant 0 : i32
    return %c0_i32, %c0_i32_0, %c0_i32_1 : i32, i32, i32
  }
  func.func @transform_2(%arg0: i32, %arg1: i32, %arg2: memref<2xi32, #tpu.memory_space<smem>>) -> (i32, i32) {
    %c0_i32 = arith.constant 0 : i32
    %c0_i32_0 = arith.constant 0 : i32
    return %arg0, %c0_i32 : i32, i32
  }
  func.func @transform_3(%arg0: i32, %arg1: i32, %arg2: memref<2xi32, #tpu.memory_space<smem>>) -> (i32, i32) {
    %c0_i32 = arith.constant 0 : i32
    %c0_i32_0 = arith.constant 0 : i32
    return %arg0, %c0_i32 : i32, i32
  }
}

</mosaic_0001>

<bundles_post_ra>
// kernel: tpu_custom_call.1
= control target key start
LH: loop header
LB: loop body
LE: loop exit
PB: predicated region body
PF: predicated region fallthrough
CT: control target
= control target key end

     0   :  { %s7890_s0 = inlined_call_operand.hbm [shape: s32[2], index: 0, kind: input, shape index: {}]   ;;  %s7891_s1 = inlined_call_operand.vmem [shape: bf16[3,2,18,18,128], index: 1, kind: input, shape index: {}]   ;;  %s7892_s2 = inlined_call_operand.hbm [shape: bf16[18,128,256], index: 2, kind: input, shape index: {}]   ;;  %s7893_s3 = inlined_call_operand.vmem [shape: f32[512,128], index: 3, kind: input, shape index: {}]   ;;  %s7894_s4 = inlined_call_operand.hbm [shape: f32[512,128], index: 4, kind: output, shape index: {}]  }
   0x1   :  { %7920 = sst [smem:[#allocation24_spill]] %s7892_s2  ;;  %s6175_s17 = scalar_lea.hbm %s7890_s0, 16 }
   0x2   :  { %p6176_p0 = scmp.ne.s32.totalorder %s7890_s0, %s6175_s17  ;;  %p6179_p1 = scmp.lt.u32.totalorder %s6175_s17, %s7890_s0 }
   0x4   :  { %p6181_p2 = pnand %p6179_p1, %p6176_p0 }
   0x6   :  { %6184 = shalt.err (!%p6181_p2)  }
   0x7   :  { %s6315_s22 = smov [#allocation3]  }
   0x8   :  { %10 = dma.hbm_to_smem %s7890_s0, 16, %s6315_s22, [#allocation2] }
   0x9   :  { %6273 = dma.done.wait [#allocation2], 16 }
   0xa   :  { %6274 = vsyncadd [#allocation2], 4294967280 }
   0xb   :  { %12 = sfence }
   0xc   :  { %13 = vsyncpa [#allocation5], 0 }
   0xd   :  { %14 = vsyncpa [#allocation6], 0 }
   0xe   :  { %16 = vsyncpa [#allocation6 + $0x1], 0  ;;  %s6360_s25 = smov 0   ;;  %s6362_s26 = smov 0  }
   0xf   :  { %s6364_s27 = smov 0   ;;  %s6366_s28 = smov 0  }
  0x10   :  { %s6368_s29 = smov 0   ;;  %s6370_s30 = smov 0  }
  0x11   :  { %s6372_s5 = smov 0   ;;  %s6374_s0 = smov 0  }
  0x12 LB: > { %s4761_s6 = sadd.s32 4294967295, %s6313_s0   ;;  %s4762_s7 = sadd.s32 4294967294, %s6313_s0   ;;  %s6313_s0 = sphi %s6374_s0, %s22_s0   ;;  %s6309_s5 = sphi %s6372_s5, %s7969_s5   ;;  %s6305_s30 = sphi %s6370_s30, %s7968_s30   ;;  %s6301_s29 = sphi %s6368_s29, %s7967_s29   ;;  %s6297_s28 = sphi %s6366_s28, %s7966_s28   ;;  %s6293_s27 = sphi %s6364_s27, %s7965_s27   ;;  %s6289_s26 = sphi %s6362_s26, %s7964_s26   ;;  %s6285_s25 = sphi %s6360_s25, %s7963_s25  }
  0x13   : > { %s31_s8 = sadd.s32 1, %s6305_s30  ;;  %s34_s9 = sadd.s32 1, %s6309_s5 }
  0x14   : > { %p32_p3 = scmp.ge.s32.totalorder %s31_s8, 2  ;;  %s118_s10 = sadd.s32 1, %s6293_s27 }
  0x15   : > { %p128_p4 = scmp.ne.s32.totalorder %s6293_s27, %s6289_s26  ;;  %p129_p5 = scmp.eq.s32.totalorder %s4761_s6, 3 }
  0x16   : > { %s7971_s8 = smov (%p32_p3, %s31_s8), 0  ;;  %s7973_s9 = smov (!%p32_p3, %s34_s9), %s6309_s5 }
  0x17   : > { %p6410_p6 = por %p129_p5, %p128_p4  ;;  %p134_p7 = scmp.ne.s32.totalorder %s6289_s26, %s6285_s25 }
  0x18   : > { %p36_p8 = scmp.ge.s32.totalorder %s7973_s9, 2  ;;  %p135_p9 = scmp.eq.s32.totalorder %s4762_s7, 3 }
  0x19   : > { %s7921_s11 = scalar_select %p6410_p6, 1, 0 }
  0x1a   : > { %p4763_p10 = scmp.ge.s32.totalorder %s6313_s0, 1  ;;  %p142_p11 = scmp.lt.s32.totalorder %s6313_s0, 5 }
  0x1b   : > { %s7975_s9 = smov (%p36_p8, %s7973_s9), 0  ;;  %p6420_p12 = por %p135_p9, %p134_p7 }
  0x1c   : > { %7922 = sst [smem:[#allocation11_spill]] %s7975_s9  ;;  %p6424_p13 = pnand %p4763_p10, %p142_p11 }
  0x1d   : > { %s7923_s12 = scalar_select %p6420_p12, 1, 0 }
  0x1e   : > { %s7924_s13 = scalar_select %p6424_p13, 1, 0 }
  0x1f   : > { %s115_s14 = ssub.s32 %s6309_s5, %s7975_s9  ;;  %p5702_p1 = pneg %p6424_p13 }
  0x20   : > { %p116_p0 = scmp.eq.s32.totalorder %s115_s14, 0  ;;  %p6432_p2 = scmp.eq.s32.totalorder %s4761_s6, 0 }
  0x21   : > { %s6316_s17 = smov [#allocation4]   ;;  %s7927_s2 = sld [smem:[#allocation24_spill]] }
  0x22   : > { %s7925_s15 = scalar_select %p6432_p2, 1, 0 }
  0x23   : > { %s6437_s16 = scalar_select %p116_p0, %s6293_s27, %s118_s10  }
  0x24   : > { %s154_s18 = sshll.u32 %s6316_s17, 4  ;;  %p6441_p3 = pnand %p6432_p2, %p5702_p1  ;;  %s155_s18 = int_to_ptr.vmem [resolvable:$true] %s154_s18 }
  0x26   : > { %p6187_p5 = pneg %p6441_p3 }
  0x27   : > { %s6185_s22 = scalar_lea.hbm %s7927_s2, 36864 }
  0x28   : > { %p6186_p4 = scmp.ne.s32.totalorder %s7927_s2, %s6185_s22  ;;  %p6192_p9 = scmp.lt.u32.totalorder %s6185_s22, %s7927_s2 }
  0x2a   : > { %p6188_p7 = pnand %p6187_p5, %p6186_p4 }
  0x2c   : > { %p6189_p8 = pneg %p6188_p7 }
  0x2e   : > { %p6194_p10 = pnand %p6192_p9, %p6189_p8 }
  0x30   : > { %6197 = shalt.err (!%p6194_p10)
}
  0x31   : > { %s6198_s10 = scalar_lea.vmem %s155_s18, 36864  ;;  %p6206_p12 = scmp.lt.s32.totalorder %s155_s18, %s155_s18 }
  0x32   : > { %p6199_p11 = scmp.ne.s32.totalorder %s155_s18, %s6198_s10  ;;  %p6207_p6 = scmp.lt.s32.totalorder %s6198_s10, %s6198_s10 }
  0x34   : > { %p6201_p0 = pnand %p6199_p11, %p6187_p5  ;;  %p6208_p2 = por %p6207_p6, %p6206_p12 }
  0x36   : > { %p6202_p1 = pneg %p6201_p0 }
  0x38   : > { %p6209_p13 = pnand %p6208_p2, %p6202_p1 }
  0x3a   : > { %6212 = shalt.err (!%p6209_p13)
}
  0x3b   : > { %s6317_s14 = smov 128   ;;  %s6318_s17 = smov 8  }
  0x3c   : > { %5705 = dma.hbm_to_vmem [thread:$0]  (!%p6441_p3), %s7927_s2, 36864, %s155_s18, [#allocation5], %s6317_s14, %s6317_s14, %s6318_s17  }
  0x3d   : > { %p7928_p4 = scmp.ne.s32.totalorder %s7924_s13, 0 }
  0x3f   : > { %193 = sbr.rel (%p7928_p4) target bundleno = 967 (0x3c7), region = 32 }
  0x46   : > { %p7929_p7 = scmp.ne.s32.totalorder %s7925_s15, 0 }
  0x48   : > { %6276 = dma.done.wait (%p7929_p7), [#allocation5], 36864  }
  0x49   : > { %6278 = vsyncadd (%p7929_p7), [#allocation5], 4294930432  ;;  %p230_p6 = scmp.lt.s32.totalorder %s6301_s29, 1  ;;  %s7899_s19 = sand.u32 1, %s6289_s26  }
  0x4a   : > { %s227_s22 = sld [smem:[#allocation3 + %s6297_s28]]  ;;  %s4768_s18 = sshll.u32 %s7899_s19, 8 }
  0x4b   : > { %s231_s23 = scalar_select %p230_p6, %s6301_s29, 1 }
  0x4c   : > { %s4770_s13 = sshll.u32 %s6301_s29, 5  ;;  %s6484_s9 = scalar_lea.vmem [#allocation7], %s4768_s18 }
  0x4d   : > { %p239_p12 = scmp.lt.s32.totalorder %s4770_s13, 63  ;;  %s5694_s24 = smul.u32 54, %s231_s23 }
  0x4e   : > { %p4772_p2 = scmp.ne.s32.totalorder %s6297_s28, 0 }
  0x4f   : > { %s7977_s13 = smov (!%p239_p12, %s4770_s13), 63 }
  0x50   : > { %p228_p13 = scmp.lt.s32.totalorder %s227_s22, 2  ;;  %s4771_s6 = sshll.u32 %s7977_s13, 3 }
  0x51   : > { %s6477_s10 = scalar_lea.vmem %s7893_s3, %s4771_s6  ;;  %249 = sbr.rel (%p4772_p2) target bundleno = 99 (0x63), region = 40 }
  0x52   : > { %s7979_s22 = smov (!%p228_p13, %s227_s22), 2  ;;  %v250_v0 = vld [vmem:[%s6477_s10] sm:$0xff] (!%p4772_p2)  ;;  %v251_v1 = vld [vmem:[%s6477_s10 + $0x8] sm:$0xff] (!%p4772_p2)  ;;  %v252_v2 = vld [vmem:[%s6477_s10 + $0x10] sm:$0xff] (!%p4772_p2) }
  0x53   : > { %s5695_s14 = smul.u32 108, %s7979_s22  ;;  %282 = vst [vmem:[%s6484_s9] sm:$0xff] (!%p4772_p2), %v250_v0  ;;  %283 = vst [vmem:[%s6484_s9 + $0x8] sm:$0xff] (!%p4772_p2), %v251_v1  ;;  %v253_v3 = vld [vmem:[%s6477_s10 + $0x18] sm:$0xff] (!%p4772_p2)  ;;  %v254_v4 = vld [vmem:[%s6477_s10 + $0x20] sm:$0xff] (!%p4772_p2) }
  0x54   : > { %284 = vst [vmem:[%s6484_s9 + $0x10] sm:$0xff] (!%p4772_p2), %v252_v2  ;;  %v255_v5 = vld [vmem:[%s6477_s10 + $0x28] sm:$0xff] (!%p4772_p2)  ;;  %285 = vst [vmem:[%s6484_s9 + $0x18] sm:$0xff] (!%p4772_p2), %v253_v3  ;;  %v256_v6 = vld [vmem:[%s6477_s10 + $0x30] sm:$0xff] (!%p4772_p2) }
  0x55   : > { %s234_s17 = sadd.s32 %s5695_s14, %s5694_s24  ;;  %286 = vst [vmem:[%s6484_s9 + $0x20] sm:$0xff] (!%p4772_p2), %v254_v4  ;;  %287 = vst [vmem:[%s6484_s9 + $0x28] sm:$0xff] (!%p4772_p2), %v255_v5  ;;  %v257_v7 = vld [vmem:[%s6477_s10 + $0x38] sm:$0xff] (!%p4772_p2)  ;;  %v258_v8 = vld [vmem:[%s6477_s10 + $0x40] sm:$0xff] (!%p4772_p2) }
  0x56   : > { %s4769_s20 = sshll.u32 %s234_s17, 2  ;;  %288 = vst [vmem:[%s6484_s9 + $0x30] sm:$0xff] (!%p4772_p2), %v256_v6  ;;  %289 = vst [vmem:[%s6484_s9 + $0x38] sm:$0xff] (!%p4772_p2), %v257_v7  ;;  %v259_v9 = vld [vmem:[%s6477_s10 + $0x48] sm:$0xff] (!%p4772_p2)  ;;  %v260_v10 = vld [vmem:[%s6477_s10 + $0x50] sm:$0xff] (!%p4772_p2) }
  0x57   : > { %s6482_s19 = scalar_lea.vmem %s7891_s1, %s4769_s20  ;;  %290 = vst [vmem:[%s6484_s9 + $0x40] sm:$0xff] (!%p4772_p2), %v258_v8  ;;  %v261_v11 = vld [vmem:[%s6477_s10 + $0x58] sm:$0xff] (!%p4772_p2)  ;;  %291 = vst [vmem:[%s6484_s9 + $0x48] sm:$0xff] (!%p4772_p2), %v259_v9  ;;  %v262_v12 = vld [vmem:[%s6477_s10 + $0x60] sm:$0xff] (!%p4772_p2) }
  0x58   : > { %292 = vst [vmem:[%s6484_s9 + $0x50] sm:$0xff] %v260_v10  ;;  %293 = vst [vmem:[%s6484_s9 + $0x58] sm:$0xff] %v261_v11  ;;  %v263_v13 = vld [vmem:[%s6477_s10 + $0x68] sm:$0xff]  ;;  %v264_v14 = vld [vmem:[%s6477_s10 + $0x70] sm:$0xff] }
  0x59   : > { %294 = vst [vmem:[%s6484_s9 + $0x60] sm:$0xff] %v262_v12  ;;  %295 = vst [vmem:[%s6484_s9 + $0x68] sm:$0xff] %v263_v13  ;;  %v265_v15 = vld [vmem:[%s6477_s10 + $0x78] sm:$0xff]  ;;  %v266_v16 = vld [vmem:[%s6477_s10 + $0x80] sm:$0xff] }
  0x5a   : > { %296 = vst [vmem:[%s6484_s9 + $0x70] sm:$0xff] %v264_v14  ;;  %v267_v17 = vld [vmem:[%s6477_s10 + $0x88] sm:$0xff]  ;;  %297 = vst [vmem:[%s6484_s9 + $0x78] sm:$0xff] %v265_v15  ;;  %v268_v18 = vld [vmem:[%s6477_s10 + $0x90] sm:$0xff] }
  0x5b   : > { %298 = vst [vmem:[%s6484_s9 + $0x80] sm:$0xff] %v266_v16  ;;  %299 = vst [vmem:[%s6484_s9 + $0x88] sm:$0xff] %v267_v17  ;;  %v269_v19 = vld [vmem:[%s6477_s10 + $0x98] sm:$0xff]  ;;  %v270_v20 = vld [vmem:[%s6477_s10 + $0xa0] sm:$0xff] }
  0x5c   : > { %300 = vst [vmem:[%s6484_s9 + $0x90] sm:$0xff] %v268_v18  ;;  %301 = vst [vmem:[%s6484_s9 + $0x98] sm:$0xff] %v269_v19  ;;  %v271_v21 = vld [vmem:[%s6477_s10 + $0xa8] sm:$0xff]  ;;  %v272_v22 = vld [vmem:[%s6477_s10 + $0xb0] sm:$0xff] }
  0x5d   : > { %302 = vst [vmem:[%s6484_s9 + $0xa0] sm:$0xff] %v270_v20  ;;  %v273_v23 = vld [vmem:[%s6477_s10 + $0xb8] sm:$0xff]  ;;  %303 = vst [vmem:[%s6484_s9 + $0xa8] sm:$0xff] %v271_v21  ;;  %v274_v24 = vld [vmem:[%s6477_s10 + $0xc0] sm:$0xff] }
  0x5e   : > { %304 = vst [vmem:[%s6484_s9 + $0xb0] sm:$0xff] %v272_v22  ;;  %305 = vst [vmem:[%s6484_s9 + $0xb8] sm:$0xff] %v273_v23  ;;  %v275_v25 = vld [vmem:[%s6477_s10 + $0xc8] sm:$0xff]  ;;  %v276_v26 = vld [vmem:[%s6477_s10 + $0xd0] sm:$0xff] }
  0x5f   : > { %306 = vst [vmem:[%s6484_s9 + $0xc0] sm:$0xff] %v274_v24  ;;  %307 = vst [vmem:[%s6484_s9 + $0xc8] sm:$0xff] %v275_v25  ;;  %v277_v27 = vld [vmem:[%s6477_s10 + $0xd8] sm:$0xff]  ;;  %v278_v28 = vld [vmem:[%s6477_s10 + $0xe0] sm:$0xff] }
  0x60   : > { %308 = vst [vmem:[%s6484_s9 + $0xd0] sm:$0xff] %v276_v26  ;;  %v279_v29 = vld [vmem:[%s6477_s10 + $0xe8] sm:$0xff]  ;;  %309 = vst [vmem:[%s6484_s9 + $0xd8] sm:$0xff] %v277_v27  ;;  %v280_v30 = vld [vmem:[%s6477_s10 + $0xf0] sm:$0xff] }
  0x61   : > { %310 = vst [vmem:[%s6484_s9 + $0xe0] sm:$0xff] %v278_v28  ;;  %311 = vst [vmem:[%s6484_s9 + $0xe8] sm:$0xff] %v279_v29  ;;  %v281_v31 = vld [vmem:[%s6477_s10 + $0xf8] sm:$0xff] }
  0x62   : > { %312 = vst [vmem:[%s6484_s9 + $0xf0] sm:$0xff] %v280_v30  ;;  %313 = vst [vmem:[%s6484_s9 + $0xf8] sm:$0xff] %v281_v31 }
  0x63 PF: > { %s5164_s2 = smul.u32 1152, %s6297_s28  ;;  %v7901_v32 = vmov 0   ;;  %v314_v35 = vld [vmem:[%s6482_s19] sm:$0xf]  ;;  %v315_v41 = vld [vmem:[%s6482_s19 + $0x4] sm:$0xf] }
  0x64   : > { %971 = vmatprep.mubr.bf16.mxu1 %v7901_v32  ;;  %2576 = vmatprep.mubr.bf16.mxu0 %v7901_v32  ;;  %v392_v44 = vshrl.u32 %v314_v35, 16  ;;  %v395_v49 = vshll.u32 %v314_v35, 16  ;;  %v401_v51 = vshll.u32 %v315_v41, 16  ;;  %v405_v52 = vshrl.u32 %v315_v41, 16  ;;  %v316_v54 = vld [vmem:[%s6482_s19 + $0x8] sm:$0x1] }
  0x65   : > { %s6554_s22 = scalar_lea.vmem [#allocation4], %s5164_s2  ;;  %v411_v1 = vshll.u32 %v316_v54, 16  ;;  %vm388_vm0 = vsmask.f32 3328  ;;  %vm389_vm1 = vsmask.f32 7440 }
  0x66   : > { %v5784_v33 = vld [vmem:[%s6554_s22 + $0x84] ss:$8 sps:$4 sm:$0xff]   ;;  %v5788_v36 = vld [vmem:[%s6554_s22 + $0x80] ss:$8 sps:$4 sm:$0xff]   ;;  %v5790_v38 = vld [vmem:[%s6554_s22 + $0x94] ss:$8 sps:$4 sm:$0xff]  }
  0x67   : > { %v5786_v34 = vld [vmem:[%s6554_s22 + $0x204] ss:$8 sps:$4 sm:$0xff]   ;;  %939 = vmatprep.subr.bf16.mxu1 %v5784_v33  ;;  %v5789_v37 = vld [vmem:[%s6554_s22 + $0x200] ss:$8 sps:$4 sm:$0xff]   ;;  %v5792_v39 = vld [vmem:[%s6554_s22 + $0x214] ss:$8 sps:$4 sm:$0xff]  }
  0x68   : > { %2544 = vmatprep.subr.bf16.mxu0 %v5786_v34  ;;  %940 = vmatpush1.bf16.msra.mxu1 %v5788_v36  ;;  %v5794_v40 = vld [vmem:[%s6554_s22 + $0x90] ss:$8 sps:$4 sm:$0xff]   ;;  %v5796_v43 = vld [vmem:[%s6554_s22 + $0xa4] ss:$8 sps:$4 sm:$0xff]   ;;  %v5800_v46 = vld [vmem:[%s6554_s22 + $0xa0] ss:$8 sps:$4 sm:$0xff]  }
  0x69   : > { %2545 = vmatpush1.bf16.msra.mxu0 %v5789_v37  ;;  %941 = vmatprep.subr.bf16.mxu1 %v5790_v38  ;;  %v5795_v42 = vld [vmem:[%s6554_s22 + $0x210] ss:$8 sps:$4 sm:$0xff]   ;;  %v5798_v45 = vld [vmem:[%s6554_s22 + $0x224] ss:$8 sps:$4 sm:$0xff]   ;;  %v5801_v47 = vld [vmem:[%s6554_s22 + $0x220] ss:$8 sps:$4 sm:$0xff]  }
  0x6a   : > { %2546 = vmatprep.subr.bf16.mxu0 %v5792_v39  ;;  %v5802_v48 = vld [vmem:[%s6554_s22 + $0xb4] ss:$8 sps:$4 sm:$0xff]   ;;  %v5806_v53 = vld [vmem:[%s6554_s22 + $0xb0] ss:$8 sps:$4 sm:$0xff]   ;;  %v394_v55 = vrot.slane %v392_v44, 4  ;;  %v397_v58 = vrot.slane %v395_v49, 5  ;;  %vm6594_vm2 = vmor %vm388_vm0, %vm389_vm1 }
  0x6b   : > { %v5804_v50 = vld [vmem:[%s6554_s22 + $0x234] ss:$8 sps:$4 sm:$0xff]   ;;  %v5807_v56 = vld [vmem:[%s6554_s22 + $0x230] ss:$8 sps:$4 sm:$0xff]   ;;  %v5808_v57 = vld [vmem:[%s6554_s22 + $0xc4] ss:$8 sps:$4 sm:$0xff]  }
  0x6c   : > { %942 = vmatpush1.bf16.msra.mxu1 %v5794_v40  ;;  %v5810_v59 = vld [vmem:[%s6554_s22 + $0x244] ss:$8 sps:$4 sm:$0xff]   ;;  %v6577_v60 = vrot.slane %v401_v51, 5  ;;  %v407_v61 = vrot.slane %v405_v52, 4  ;;  %v5812_v62 = vld [vmem:[%s6554_s22 + $0xc0] ss:$8 sps:$4 sm:$0xff]   ;;  %v398_v3 = vor.u32 %v397_v58, %v394_v55 }
  0x6d   : > { %2547 = vmatpush1.bf16.msra.mxu0 %v5795_v42  ;;  %943 = vmatprep.subr.bf16.mxu1 %v5796_v43  ;;  %v5813_v63 = vld [vmem:[%s6554_s22 + $0x240] ss:$8 sps:$4 sm:$0xff]   ;;  %v5814_v0 = vld [vmem:[%s6554_s22 + $0xd4] ss:$8 sps:$4 sm:$0xff]   ;;  %v5818_v5 = vld [vmem:[%s6554_s22 + $0xd0] ss:$8 sps:$4 sm:$0xff]  }
  0x6e   : > { %2548 = vmatprep.subr.bf16.mxu0 %v5798_v45  ;;  %v5816_v2 = vld [vmem:[%s6554_s22 + $0x254] ss:$8 sps:$4 sm:$0xff]   ;;  %v408_v4 = vor.u32 %v407_v61, %v6577_v60  ;;  %v5819_v6 = vld [vmem:[%s6554_s22 + $0x250] ss:$8 sps:$4 sm:$0xff]   ;;  %v5820_v7 = vld [vmem:[%s6554_s22 + $0xe4] ss:$8 sps:$4 sm:$0xff]  }
  0x6f   : > { %v413_v8 = vrot.slane %v411_v1, 5  ;;  %v5822_v9 = vld [vmem:[%s6554_s22 + $0x264] ss:$8 sps:$4 sm:$0xff]   ;;  %v399_v10 = vrot.slane %v398_v3, 4  ;;  %v5824_v12 = vld [vmem:[%s6554_s22 + $0xe0] ss:$8 sps:$4 sm:$0xff]  }
  0x70   : > { %944 = vmatpush1.bf16.msra.mxu1 %v5800_v46  ;;  %v409_v11 = vrot.slane %v408_v4, 4  ;;  %v5825_v13 = vld [vmem:[%s6554_s22 + $0x260] ss:$8 sps:$4 sm:$0xff]   ;;  %v6591_v14 = vld [vmem:[%s6482_s19 + $0xc] sm:$0xf]  ;;  %vm1517_vm3 = vcmask 1042432  }
  0x71   : > { %2549 = vmatpush1.bf16.msra.mxu0 %v5801_v47  ;;  %945 = vmatprep.subr.bf16.mxu1 %v5802_v48  ;;  %v6599_v16 = vld [vmem:[%s6482_s19 + $0x10] sm:$0xf]  ;;  %v6602_v17 = vld [vmem:[%s6482_s19 + $0x14] sm:$0x1]  ;;  %v416_v18 = vshrl.u32 %v6591_v14, 16  ;;  %v419_v19 = vshll.u32 %v6591_v14, 16  ;;  %v404_v29 = vsel %vm6594_vm2, %v399_v10, %v6577_v60 }
  0x72   : > { %2550 = vmatprep.subr.bf16.mxu0 %v5804_v50  ;;  %v425_v20 = vshll.u32 %v6599_v16, 16  ;;  %v429_v21 = vshrl.u32 %v6599_v16, 16  ;;  %v435_v22 = vshll.u32 %v6602_v17, 16  ;;  %v5826_v23 = vld [vmem:[%s6554_s22 + $0xf4] ss:$8 sps:$4 sm:$0xff]   ;;  %v414_v35 = vsel %vm6594_vm2, %v409_v11, %v413_v8  ;;  %s5165_s28 = sshll.u32 %s6301_s29, 12 }
  0x73   : > { %v5828_v24 = vld [vmem:[%s6554_s22 + $0x274] ss:$8 sps:$4 sm:$0xff]   ;;  %v418_v25 = vrot.slane %v416_v18, 4  ;;  %v421_v26 = vrot.slane %v419_v19, 5  ;;  %v5830_v27 = vld [vmem:[%s6554_s22 + $0xf0] ss:$8 sps:$4 sm:$0xff]   ;;  %v4792_v54 = vcombine.low %v404_v29, %v414_v35  ;;  %s7830_s13 = scalar_lea.hbm %s7894_s4, %s5165_s28 }
  0x74   : > { %946 = vmatpush1.bf16.msra.mxu1 %v5806_v53  ;;  %v5831_v28 = vld [vmem:[%s6554_s22 + $0x270] ss:$8 sps:$4 sm:$0xff]   ;;  %v427_v30 = vrot.slane %v425_v20, 5  ;;  %v431_v31 = vrot.slane %v429_v21, 4  ;;  %v437_v33 = vrot.slane %v435_v22, 5  ;;  %vm1518_vm4 = vcmask 1046532  }
  0x75   : > { %2551 = vmatpush1.bf16.msra.mxu0 %v5807_v56  ;;  %947 = vmatprep.subr.bf16.mxu1 %v5808_v57  ;;  %v6617_v34 = vld [vmem:[%s6482_s19 + $0x18] sm:$0xf]  ;;  %v422_v36 = vor.u32 %v421_v26, %v418_v25  ;;  %v6622_v37 = vld [vmem:[%s6482_s19 + $0x1c] sm:$0xf]  ;;  %v6625_v38 = vld [vmem:[%s6482_s19 + $0x20] sm:$0x1] }
  0x76   : > { %2552 = vmatprep.subr.bf16.mxu0 %v5810_v59  ;;  %v440_v39 = vshrl.u32 %v6617_v34, 16  ;;  %v443_v40 = vshll.u32 %v6617_v34, 16  ;;  %v5834_v41 = vld [vmem:[%s6554_s22 + $0x4] ss:$8 sps:$4 sm:$0xff]   ;;  %v432_v42 = vor.u32 %v431_v31, %v427_v30  ;;  %v449_v43 = vshll.u32 %v6622_v37, 16  ;;  %vm6772_vm5 = vmor %vm1517_vm3, %vm1518_vm4  ;;  %s7959_s24 = sand.u32 1, %s6289_s26  }
  0x77   : > { %v453_v44 = vshrl.u32 %v6622_v37, 16  ;;  %v459_v45 = vshll.u32 %v6625_v38, 16  ;;  %v423_v46 = vrot.slane %v422_v36, 4  ;;  %v5837_v47 = vld [vmem:[%s6554_s22 + $0x284] ss:$8 sps:$4 sm:$0xff]   ;;  %s7838_s29 = scalar_lea.sflag [#allocation6], %s7959_s24 }
  0x78   : > { %948 = vmatpush1.bf16.msra.mxu1 %v5812_v62  ;;  %v442_v48 = vrot.slane %v440_v39, 4  ;;  %v445_v49 = vrot.slane %v443_v40, 5  ;;  %v5832_v50 = vld [vmem:[%s6554_s22] ss:$8 sps:$4 sm:$0xff]   ;;  %v433_v51 = vrot.slane %v432_v42, 4  ;;  %v451_v52 = vrot.slane %v449_v43, 5 }
  0x79   : > { %2553 = vmatpush1.bf16.msra.mxu0 %v5813_v63  ;;  %949 = vmatprep.subr.bf16.mxu1 %v5814_v0  ;;  %v455_v53 = vrot.slane %v453_v44, 4  ;;  %v428_v55 = vsel %vm6594_vm2, %v423_v46, %v427_v30  ;;  %v5835_v56 = vld [vmem:[%s6554_s22 + $0x280] ss:$8 sps:$4 sm:$0xff]   ;;  %v461_v58 = vrot.slane %v459_v45, 5  ;;  %v6639_v59 = vld [vmem:[%s6482_s19 + $0x24] sm:$0xf]  ;;  %v6686_v43 = vcombine.low %v6591_v14, %v6599_v16 }
  0x7a   : > { %2554 = vmatprep.subr.bf16.mxu0 %v5816_v2  ;;  %v446_v57 = vor.u32 %v445_v49, %v442_v48  ;;  %v438_v60 = vsel %vm6594_vm2, %v433_v51, %v437_v33  ;;  %v6644_v62 = vld [vmem:[%s6482_s19 + $0x28] sm:$0xf]  ;;  %v6647_v63 = vld [vmem:[%s6482_s19 + $0x2c] sm:$0x1]  ;;  %v464_v0 = vshrl.u32 %v6639_v59, 16  ;;  %v467_v1 = vshll.u32 %v6639_v59, 16 }
  0x7b   : > { %v456_v61 = vor.u32 %v455_v53, %v451_v52  ;;  %v4793_v2 = vcombine.low %v428_v55, %v438_v60  ;;  %v5840_v4 = vld [vmem:[%s6554_s22 + $0x294] ss:$8 sps:$4 sm:$0xff]   ;;  %v5838_v8 = vld [vmem:[%s6554_s22 + $0x290] ss:$8 sps:$4 sm:$0xff]   ;;  %v5844_v39 = vld [vmem:[%s6554_s22 + $0x2a0] ss:$8 sps:$4 sm:$0xff]  }
  0x7c   : > { %950 = vmatpush1.bf16.msra.mxu1 %v5818_v5  ;;  %v447_v3 = vrot.slane %v446_v57, 4  ;;  %v473_v5 = vshll.u32 %v6644_v62, 16  ;;  %v466_v10 = vrot.slane %v464_v0, 4  ;;  %v469_v11 = vrot.slane %v467_v1, 5  ;;  %v6662_v20 = vld [vmem:[%s6482_s19 + $0x30] sm:$0xf] }
  0x7d   : > { %2555 = vmatpush1.bf16.msra.mxu0 %v5819_v6  ;;  %951 = vmatprep.subr.bf16.mxu1 %v5820_v7  ;;  %v477_v6 = vshrl.u32 %v6644_v62, 16  ;;  %v457_v7 = vrot.slane %v456_v61, 4  ;;  %v6665_v21 = vld [vmem:[%s6482_s19 + $0x34] sm:$0xf]  ;;  %v488_v25 = vshrl.u32 %v6662_v20, 16  ;;  %v6715_v61 = vcombine.low %v6617_v34, %v6622_v37  ;;  %p7960_p5 = scmp.ne.s32.totalorder %s7921_s11, 0 }
  0x7e   : > { %2556 = vmatprep.subr.bf16.mxu0 %v5822_v9  ;;  %v5843_v9 = vld [vmem:[%s6554_s22 + $0x14] ss:$8 sps:$4 sm:$0xff]   ;;  %v6659_v18 = vrot.slane %v473_v5, 5  ;;  %v497_v29 = vshll.u32 %v6665_v21, 16  ;;  %v501_v35 = vshrl.u32 %v6665_v21, 16  ;;  %s6320_s15 = smov [#allocation7]  }
  0x7f   : > { %v479_v19 = vrot.slane %v477_v6, 4  ;;  %v462_v22 = vsel %vm6594_vm2, %v457_v7, %v461_v58  ;;  %v6682_v40 = vld [vmem:[%s6482_s19 + $0x38] sm:$0x1]  ;;  %v5852_v46 = vld [vmem:[%s6554_s22 + $0x24] ss:$8 sps:$4 sm:$0xff]   ;;  %s6217_s7 = sshll.u32 %s6320_s15, 4  ;;  %s6218_s7 = int_to_ptr.vmem [resolvable:$false] %s6217_s7 }
  0x80   : > { %952 = vmatpush1.bf16.msra.mxu1 %v5824_v12  ;;  %v483_v12 = vshll.u32 %v6647_v63, 16  ;;  %v6688_v44 = vrot.slane %v497_v29, 5  ;;  %v503_v45 = vrot.slane %v501_v35, 4  ;;  %v5850_v48 = vld [vmem:[%s6554_s22 + $0x20] ss:$8 sps:$4 sm:$0xff]   ;;  %s6219_s10 = scalar_lea.vmem %s6218_s7, 8192 }
  0x81   : > { %2557 = vmatpush1.bf16.msra.mxu0 %v5825_v13  ;;  %953 = vmatprep.subr.bf16.mxu1 %v5826_v23  ;;  %v452_v13 = vsel %vm6594_vm2, %v447_v3, %v451_v52  ;;  %v5841_v23 = vld [vmem:[%s6554_s22 + $0x10] ss:$8 sps:$4 sm:$0xff]   ;;  %v480_v26 = vor.u32 %v479_v19, %v6659_v18  ;;  %v6696_v49 = vld [vmem:[%s6482_s19 + $0x40] sm:$0xf]  ;;  %v507_v52 = vshll.u32 %v6682_v40, 16 }
  0x82   : > { %2558 = vmatprep.subr.bf16.mxu0 %v5828_v24  ;;  %v470_v24 = vor.u32 %v469_v11, %v466_v10  ;;  %v6677_v30 = vcombine.low %v452_v13, %v462_v22  ;;  %v485_v33 = vrot.slane %v483_v12, 5  ;;  %v5849_v53 = vld [vmem:[%s6554_s22 + $0x2b4] ss:$8 sps:$4 sm:$0xff]   ;;  %v525_v57 = vshrl.u32 %v6696_v49, 16  ;;  %v5847_v0 = vld [vmem:[%s6554_s22 + $0x2b0] ss:$8 sps:$4 sm:$0xff]  }
  0x83   : > { %v481_v36 = vrot.slane %v480_v26, 4  ;;  %v504_v60 = vor.u32 %v503_v45, %v6688_v44  ;;  %v5855_v3 = vld [vmem:[%s6554_s22 + $0x2c4] ss:$8 sps:$4 sm:$0xff]   ;;  %v509_v7 = vrot.slane %v507_v52, 5  ;;  %v5853_v13 = vld [vmem:[%s6554_s22 + $0x2c0] ss:$8 sps:$4 sm:$0xff]  }
  0x84   : > { %954 = vmatpush1.bf16.msra.mxu1 %v5830_v27  ;;  %v5846_v27 = vld [vmem:[%s6554_s22 + $0x2a4] ss:$8 sps:$4 sm:$0xff]   ;;  %7932 = vst [vmem:[#allocation12_spill] sm:$0xff] %v6677_v30  ;;  %v471_v31 = vrot.slane %v470_v24, 4  ;;  %v5861_v22 = vld [vmem:[%s6554_s22 + $0x34] ss:$8 sps:$4 sm:$0xff]  }
  0x85   : > { %2559 = vmatpush1.bf16.msra.mxu0 %v5831_v28  ;;  %1308 = vmatprep.subr.bf16.mxu1 %v5834_v41  ;;  %v491_v28 = vshll.u32 %v6662_v20, 16  ;;  %v490_v41 = vrot.slane %v488_v25, 4  ;;  %v486_v55 = vsel %vm6594_vm2, %v481_v36, %v485_v33  ;;  %v6723_v5 = vld [vmem:[%s6482_s19 + $0x4c] sm:$0xf]  ;;  %v505_v11 = vrot.slane %v504_v60, 4 }
  0x86   : > { %2913 = vmatprep.subr.bf16.mxu0 %v5837_v47  ;;  %v6692_v47 = vld [vmem:[%s6482_s19 + $0x3c] sm:$0xf]  ;;  %v6730_v12 = vld [vmem:[%s6482_s19 + $0x44] sm:$0x1]  ;;  %v545_v24 = vshll.u32 %v6723_v5, 16  ;;  %v549_v25 = vshrl.u32 %v6723_v5, 16 }
  0x87   : > { %972 = vmatmul.mubr.bf16.vlgmr.msra.gmra.mrb[0].mxu1 %v4792_v54  ;;  %v493_v42 = vrot.slane %v491_v28, 5  ;;  %v515_v51 = vshll.u32 %v6692_v47, 16  ;;  %v476_v54 = vsel %vm6594_vm2, %v471_v31, %v6659_v18  ;;  %v5858_v26 = vld [vmem:[%s6554_s22 + $0x2d4] ss:$8 sps:$4 sm:$0xff]   ;;  %v531_v29 = vshll.u32 %v6730_v12, 16 }
  0x88   : > { %2577 = vmatmul.mubr.bf16.vlgmr.msra.gmra.mrb[0].mxu0 %v4793_v2  ;;  %1309 = vmatpush1.bf16.msra.mxu1 %v5832_v50  ;;  %v512_v50 = vshrl.u32 %v6692_v47, 16  ;;  %v6725_v6 = vcombine.low %v476_v54, %v486_v55  ;;  %v510_v33 = vsel %vm6594_vm2, %v505_v11, %v509_v7  ;;  %v6752_v35 = vld [vmem:[%s6482_s19 + $0x50] sm:$0x1]  ;;  %v6755_v45 = vrot.slane %v545_v24, 5  ;;  %v6761_v52 = vld [vmem:[%s6482_s19 + $0x54] sm:$0xf] }
  0x89   : > { %2914 = vmatpush1.bf16.msra.mxu0 %v5835_v56  ;;  %981 = vmatprep.mubr.bf16.mxu1 %v7901_v32  ;;  %v521_v56 = vshll.u32 %v6696_v49, 16  ;;  %v494_v58 = vor.u32 %v493_v42, %v490_v41  ;;  %v5856_v41 = vld [vmem:[%s6554_s22 + $0x2d0] ss:$8 sps:$4 sm:$0xff]   ;;  %v1529_v7 = vrot.slane %v6599_v16, 5  ;;  %v6797_v16 = vld [vmem:[%s6482_s19 + $0x5c] sm:$0x1] }
  0x8a   : > { %2586 = vmatprep.mubr.bf16.mxu0 %v7901_v32  ;;  %2915 = vmatprep.subr.bf16.mxu0 %v5840_v4  ;;  %v514_v1 = vrot.slane %v512_v50, 4  ;;  %v6720_v4 = vld [vmem:[%s6482_s19 + $0x48] sm:$0xf]  ;;  %7933 = vst [vmem:[#allocation13_spill] sm:$0xff] %v6725_v6  ;;  %v6765_v54 = vld [vmem:[%s6482_s19 + $0x58] sm:$0xf] }
  0x8b   : > { %1310 = vmatprep.subr.bf16.mxu1 %v5843_v9  ;;  %v527_v9 = vrot.slane %v525_v57, 4  ;;  %v495_v10 = vrot.slane %v494_v58, 4  ;;  %v536_v18 = vshrl.u32 %v6720_v4, 16  ;;  %v539_v19 = vshll.u32 %v6720_v4, 16  ;;  %v5862_v57 = vld [vmem:[%s6554_s22 + $0x2e0] ss:$8 sps:$4 sm:$0xff]  }
  0x8c   : > { %1311 = vmatpush1.bf16.msra.mxu1 %v5841_v23  ;;  %v5867_v58 = vld [vmem:[%s6554_s22 + $0x2f4] ss:$8 sps:$4 sm:$0xff]   ;;  %v569_v11 = vshll.u32 %v6765_v54, 16  ;;  %v1531_v24 = vrot.slane %v1529_v7, 4 }
  0x8d   : > { %2916 = vmatpush1.bf16.msra.mxu0 %v5838_v8  ;;  %1312 = vmatprep.subr.bf16.mxu1 %v5852_v46  ;;  %v6727_v8 = vrot.slane %v521_v56, 5  ;;  %v500_v31 = vsel %vm6594_vm2, %v495_v10, %v6688_v44  ;;  %v538_v36 = vrot.slane %v536_v18, 4  ;;  %v551_v44 = vrot.slane %v549_v25, 4  ;;  %v5864_v46 = vld [vmem:[%s6554_s22 + $0x2e4] ss:$8 sps:$4 sm:$0xff]  }
  0x8e   : > { %2917 = vmatprep.subr.bf16.mxu0 %v5846_v27  ;;  %v5859_v27 = vld [vmem:[%s6554_s22 + $0x30] ss:$8 sps:$4 sm:$0xff]   ;;  %v555_v56 = vshll.u32 %v6752_v35, 16  ;;  %v563_v10 = vshll.u32 %v6761_v52, 16 }
  0x8f   : > { %982 = vmatmul.mubr.bf16.gmra.mrb[4].mxu1 %v4793_v2  ;;  %v517_v2 = vrot.slane %v515_v51, 5  ;;  %v528_v28 = vor.u32 %v527_v9, %v6727_v8  ;;  %v533_v51 = vrot.slane %v531_v29, 5 }
  0x90   : > { %2587 = vmatmul.mubr.bf16.gmra.mrb[4].mxu0 %v6677_v30  ;;  %991 = vmatprep.mubr.bf16.mxu1 %v7901_v32 }
  0x91   : > { %2596 = vmatprep.mubr.bf16.mxu0 %v7901_v32  ;;  %2918 = vmatpush1.bf16.msra.mxu0 %v5844_v39  ;;  %v518_v23 = vor.u32 %v517_v2, %v514_v1  ;;  %v541_v39 = vrot.slane %v539_v19, 5  ;;  %v529_v50 = vrot.slane %v528_v28, 4  ;;  %v552_v1 = vor.u32 %v551_v44, %v6755_v45  ;;  %v5868_v2 = vld [vmem:[%s6554_s22 + $0x40] ss:$8 sps:$4 sm:$0xff]   ;;  %v5873_v28 = vld [vmem:[%s6554_s22 + $0x304] ss:$8 sps:$4 sm:$0xff]  }
  0x92   : > { %1313 = vmatpush1.bf16.msra.mxu1 %v5850_v48  ;;  %2919 = vmatprep.subr.bf16.mxu0 %v5849_v53  ;;  %v6758_v48 = vcombine.low %v500_v31, %v510_v33  ;;  %v1532_v53 = vrot.slane %v6602_v17, 5  ;;  %v565_v31 = vrot.slane %v563_v10, 5 }
  0x93   : > { %1314 = vmatprep.subr.bf16.mxu1 %v5861_v22  ;;  %v519_v42 = vrot.slane %v518_v23, 4  ;;  %v542_v55 = vor.u32 %v541_v39, %v538_v36  ;;  %v534_v9 = vsel %vm6594_vm2, %v529_v50, %v533_v51  ;;  %v557_v22 = vrot.slane %v555_v56, 5  ;;  %v5865_v23 = vld [vmem:[%s6554_s22 + $0x2f0] ss:$8 sps:$4 sm:$0xff]  }
  0x94   : > { %7934 = vst [vmem:[#allocation14_spill] sm:$0xff] %v6758_v48  ;;  %v1533_v33 = vsel %vm6772_vm5, %v1531_v24, %v1532_v53  ;;  %v4858_v36 = vrot.slane %v6617_v34, 9  ;;  %v571_v39 = vrot.slane %v569_v11, 5  ;;  %v1536_v51 = vrot.slane %v6622_v37, 5 }
  0x95   : > { %2920 = vmatpush1.bf16.msra.mxu0 %v5847_v0  ;;  %v4857_v0 = vrot.slane %v6591_v14, 9  ;;  %v524_v17 = vsel %vm6594_vm2, %v519_v42, %v6727_v8  ;;  %v560_v14 = vshrl.u32 %v6761_v52, 16  ;;  %v6792_v8 = vcombine.low %v6639_v59, %v6644_v62  ;;  %v6814_v42 = vld [vmem:[%s6482_s19 + $0x64] sm:$0xf] }
  0x96   : > { %2921 = vmatprep.subr.bf16.mxu0 %v5855_v3  ;;  %1315 = vmatpush1.bf16.msra.mxu1 %v5859_v27  ;;  %v5870_v3 = vld [vmem:[%s6554_s22 + $0x44] ss:$8 sps:$4 sm:$0xff]   ;;  %v543_v19 = vrot.slane %v542_v55, 4  ;;  %v6804_v25 = vcombine.low %v524_v17, %v534_v9  ;;  %v6807_v27 = vld [vmem:[%s6482_s19 + $0x60] sm:$0xf]  ;;  %v593_v37 = vshll.u32 %v6814_v42, 16  ;;  %v1537_v17 = vsel %vm6772_vm5, %v4858_v36, %v1536_v51 }
  0x97   : > { %992 = vmatmul.mubr.bf16.gmra.mrb[8].mxu1 %v6677_v30  ;;  %v1530_v18 = vsel %vm6772_vm5, %v4857_v0, %v1529_v7  ;;  %1316 = vmatprep.subr.bf16.mxu1 %v5870_v3  ;;  %v562_v29 = vrot.slane %v560_v14, 4  ;;  %v584_v50 = vshrl.u32 %v6807_v27, 16  ;;  %v5876_v55 = vld [vmem:[%s6554_s22 + $0x54] ss:$8 sps:$4 sm:$0xff]   ;;  %v587_v56 = vshll.u32 %v6807_v27, 16 }
  0x98   : > { %2597 = vmatmul.mubr.bf16.gmra.mrb[8].mxu0 %v6725_v6  ;;  %1001 = vmatprep.mubr.bf16.mxu1 %v7901_v32  ;;  %7937 = vst [vmem:[#allocation15_spill] sm:$0xff] %v6804_v25  ;;  %v6816_v44 = vcombine.low %v1530_v18, %v1533_v33  ;;  %v548_v53 = vsel %vm6594_vm2, %v543_v19, %v6755_v45  ;;  %v1538_v45 = vrot.slane %v1536_v51, 4  ;;  %v4859_v18 = vrot.slane %v6639_v59, 9  ;;  %v5880_v33 = vld [vmem:[%s6554_s22 + $0x60] ss:$8 sps:$4 sm:$0xff]  }
  0x99   : > { %2606 = vmatprep.mubr.bf16.mxu0 %v7901_v32  ;;  %2922 = vmatpush1.bf16.msra.mxu0 %v5853_v13  ;;  %v573_v13 = vshrl.u32 %v6765_v54, 16  ;;  %v566_v0 = vor.u32 %v565_v31, %v562_v29  ;;  %v586_v9 = vrot.slane %v584_v50, 4  ;;  %v589_v14 = vrot.slane %v587_v56, 5  ;;  %v7087_v30 = vld [vmem:[%s6482_s19 + $0xb4] sm:$0xf] }
  0x9a   : > { %2923 = vmatprep.subr.bf16.mxu0 %v5858_v26  ;;  %v553_v26 = vrot.slane %v552_v1, 4  ;;  %1317 = vmatpush1.bf16.msra.mxu1 %v5868_v2  ;;  %v597_v2 = vshrl.u32 %v6814_v42, 16  ;;  %v1543_v19 = vrot.slane %v6644_v62, 5  ;;  %v1546_v24 = vrot.slane %v6647_v63, 5 }
  0x9b   : > { %1318 = vmatprep.subr.bf16.mxu1 %v5876_v55  ;;  %v567_v11 = vrot.slane %v566_v0, 4  ;;  %v590_v62 = vor.u32 %v589_v14, %v586_v9  ;;  %v6873_v55 = vld [vmem:[%s6482_s19 + $0x70] sm:$0xf]  ;;  %v5895_v14 = vld [vmem:[%s6554_s22 + $0x104] ss:$8 sps:$4 sm:$0xff]  }
  0x9c   : > { %v558_v34 = vsel %vm6594_vm2, %v553_v26, %v557_v22  ;;  %v5882_v26 = vld [vmem:[%s6554_s22 + $0x64] ss:$8 sps:$4 sm:$0xff]   ;;  %v1544_v29 = vsel %vm6772_vm5, %v4859_v18, %v1543_v19  ;;  %v1545_v31 = vrot.slane %v1543_v19, 4  ;;  %v6894_v19 = vld [vmem:[%s6482_s19 + $0x7c] sm:$0xf] }
  0x9d   : > { %2924 = vmatpush1.bf16.msra.mxu0 %v5856_v41  ;;  %v575_v41 = vrot.slane %v573_v13, 4  ;;  %v6840_v7 = vcombine.low %v548_v53, %v558_v34  ;;  %v595_v13 = vrot.slane %v593_v37, 5  ;;  %v572_v59 = vsel %vm6594_vm2, %v567_v11, %v571_v39  ;;  %v5886_v37 = vld [vmem:[%s6554_s22 + $0x70] ss:$8 sps:$4 sm:$0xff]  }
  0x9e   : > { %2925 = vmatprep.subr.bf16.mxu0 %v5864_v46  ;;  %v579_v46 = vshll.u32 %v6797_v16, 16  ;;  %v1547_v63 = vsel %vm6772_vm5, %v1545_v31, %v1546_v24  ;;  %v591_v53 = vrot.slane %v590_v62, 4  ;;  %v645_v31 = vshrl.u32 %v6894_v19, 16 }
  0x9f   : > { %1002 = vmatmul.mubr.bf16.gmra.mrb[12].mxu1 %v6725_v6  ;;  %v576_v1 = vor.u32 %v575_v41, %v571_v39  ;;  %7938 = vst [vmem:[#allocation16_spill] sm:$0xff] %v6840_v7  ;;  %v6865_v50 = vcombine.low %v1544_v29, %v1547_v63  ;;  %v6868_v39 = vld [vmem:[%s6482_s19 + $0x6c] sm:$0xf]  ;;  %v641_v29 = vshll.u32 %v6894_v19, 16  ;;  %v7084_v6 = vld [vmem:[%s6482_s19 + $0xb0] sm:$0x1] }
  0xa0   : > { %2607 = vmatmul.mubr.bf16.gmra.mrb[12].mxu0 %v6758_v48  ;;  %1011 = vmatprep.mubr.bf16.mxu1 %v7901_v32  ;;  %v611_v0 = vshll.u32 %v6868_v39, 16 }
  0xa1   : > { %2616 = vmatprep.mubr.bf16.mxu0 %v7901_v32  ;;  %2926 = vmatpush1.bf16.msra.mxu0 %v5862_v57  ;;  %v1539_v57 = vrot.slane %v6625_v38, 5  ;;  %v581_v38 = vrot.slane %v579_v46, 5  ;;  %v577_v22 = vrot.slane %v576_v1, 4  ;;  %v596_v1 = vsel %vm6594_vm2, %v591_v53, %v595_v13 }
  0xa2   : > { %2927 = vmatprep.subr.bf16.mxu0 %v5867_v58  ;;  %v5874_v58 = vld [vmem:[%s6554_s22 + $0x50] ss:$8 sps:$4 sm:$0xff]   ;;  %v613_v9 = vrot.slane %v611_v0, 5  ;;  %v647_v53 = vrot.slane %v645_v31, 4  ;;  %v5871_v0 = vld [vmem:[%s6554_s22 + $0x300] ss:$8 sps:$4 sm:$0xff]  }
  0xa3   : > { %v1540_v3 = vsel %vm6772_vm5, %v1538_v45, %v1539_v57  ;;  %1319 = vmatpush1.bf16.msra.mxu1 %v5874_v58  ;;  %v582_v36 = vsel %vm6594_vm2, %v577_v22, %v581_v38  ;;  %v5888_v57 = vld [vmem:[%s6554_s22 + $0x74] ss:$8 sps:$4 sm:$0xff]   ;;  %v608_v58 = vshrl.u32 %v6868_v39, 16  ;;  %v621_v45 = vshrl.u32 %v6873_v55, 16  ;;  %v6890_v38 = vld [vmem:[%s6482_s19 + $0x78] sm:$0xf] }
  0xa4   : > { %v6842_v10 = vcombine.low %v1537_v17, %v1540_v3  ;;  %1320 = vmatprep.subr.bf16.mxu1 %v5882_v26  ;;  %v6870_v51 = vcombine.low %v572_v59, %v582_v36  ;;  %v617_v17 = vshll.u32 %v6873_v55, 16  ;;  %v635_v24 = vshll.u32 %v6890_v38, 16  ;;  %v6941_v31 = vld [vmem:[%s6482_s19 + $0x94] sm:$0xf] }
  0xa5   : > { %2928 = vmatpush1.bf16.msra.mxu0 %v5865_v23  ;;  %v599_v23 = vrot.slane %v597_v2, 4  ;;  %v610_v3 = vrot.slane %v608_v58, 4  ;;  %v623_v18 = vrot.slane %v621_v45, 4  ;;  %v6919_v58 = vld [vmem:[%s6482_s19 + $0x88] sm:$0xf] }
  0xa6   : > { %3276 = vmatprep.subr.bf16.mxu0 %v5873_v28  ;;  %v6849_v28 = vld [vmem:[%s6482_s19 + $0x68] sm:$0x1]  ;;  %7939 = vst [vmem:[#allocation17_spill] sm:$0xff] %v6870_v51  ;;  %v619_v11 = vrot.slane %v617_v17, 5  ;;  %v637_v63 = vrot.slane %v635_v24, 5 }
  0xa7   : > { %1012 = vmatmul.mubr.bf16.gmra.mrb[16].mxu1 %v6758_v48  ;;  %v600_v41 = vor.u32 %v599_v23, %v595_v13  ;;  %v603_v46 = vshll.u32 %v6849_v28, 16  ;;  %v6899_v23 = vld [vmem:[%s6482_s19 + $0x74] sm:$0x1]  ;;  %v632_v13 = vshrl.u32 %v6890_v38, 16  ;;  %v614_v26 = vor.u32 %v613_v9, %v610_v3 }
  0xa8   : > { %2617 = vmatmul.mubr.bf16.gmra.mrb[16].mxu0 %v6804_v25  ;;  %1021 = vmatprep.mubr.bf16.mxu1 %v7901_v32  ;;  %v627_v59 = vshll.u32 %v6899_v23, 16  ;;  %v5906_v48 = vld [vmem:[%s6554_s22 + $0x354] ss:$8 sps:$4 sm:$0xff]  }
  0xa9   : > { %2626 = vmatprep.mubr.bf16.mxu0 %v7901_v32  ;;  %1321 = vmatpush1.bf16.msra.mxu1 %v5880_v33  ;;  %v601_v34 = vrot.slane %v600_v41, 4  ;;  %v605_v56 = vrot.slane %v603_v46, 5  ;;  %v624_v33 = vor.u32 %v623_v18, %v619_v11  ;;  %v634_v62 = vrot.slane %v632_v13, 4  ;;  %v6911_v41 = vld [vmem:[%s6482_s19 + $0x80] sm:$0x1] }
  0xaa   : > { %1322 = vmatprep.subr.bf16.mxu1 %v5888_v57  ;;  %v615_v36 = vrot.slane %v614_v26, 4  ;;  %v6913_v46 = vrot.slane %v641_v29, 5  ;;  %v6916_v57 = vld [vmem:[%s6482_s19 + $0x84] sm:$0xf]  ;;  %v651_v17 = vshll.u32 %v6911_v41, 16  ;;  %v665_v18 = vshll.u32 %v6919_v58, 16 }
  0xab   : > { %v606_v2 = vsel %vm6594_vm2, %v601_v34, %v605_v56  ;;  %v625_v34 = vrot.slane %v624_v33, 4  ;;  %v629_v56 = vrot.slane %v627_v59, 5  ;;  %v656_v9 = vshrl.u32 %v6916_v57, 16  ;;  %v6936_v13 = vld [vmem:[%s6482_s19 + $0x90] sm:$0xf] }
  0xac   : > { %v6896_v22 = vcombine.low %v596_v1, %v606_v2  ;;  %v620_v45 = vsel %vm6594_vm2, %v615_v36, %v619_v11  ;;  %v648_v1 = vor.u32 %v647_v53, %v6913_v46  ;;  %v5879_v2 = vld [vmem:[%s6554_s22 + $0x314] ss:$8 sps:$4 sm:$0xff]   ;;  %v5877_v11 = vld [vmem:[%s6554_s22 + $0x310] ss:$8 sps:$4 sm:$0xff]   ;;  %v653_v26 = vrot.slane %v651_v17, 5 }
  0xad   : > { %1323 = vmatpush1.bf16.msra.mxu1 %v5886_v37  ;;  %v638_v37 = vor.u32 %v637_v63, %v634_v62  ;;  %v630_v3 = vsel %vm6594_vm2, %v625_v34, %v629_v56  ;;  %v669_v29 = vshrl.u32 %v6919_v58, 16  ;;  %v4864_v33 = vrot.slane %v6807_v27, 9  ;;  %v6948_v63 = vld [vmem:[%s6482_s19 + $0x8c] sm:$0x1] }
  0xae   : > { %7940 = vst [vmem:[#allocation18_spill] sm:$0xff] %v6896_v22  ;;  %1796 = vmatprep.subr.bf16.mxu1 %v5895_v14  ;;  %v659_v14 = vshll.u32 %v6916_v57, 16  ;;  %v6945_v59 = vcombine.low %v620_v45, %v630_v3  ;;  %v649_v62 = vrot.slane %v648_v1, 4  ;;  %v5885_v36 = vld [vmem:[%s6554_s22 + $0x324] ss:$8 sps:$4 sm:$0xff]   ;;  %v1578_v53 = vrot.slane %v6814_v42, 5 }
  0xaf   : > { %1022 = vmatmul.mubr.bf16.gmra.mrb[20].mxu1 %v6804_v25  ;;  %v639_v24 = vrot.slane %v638_v37, 4  ;;  %v658_v34 = vrot.slane %v656_v9, 4  ;;  %v1581_v37 = vrot.slane %v6849_v28, 5  ;;  %v680_v27 = vshrl.u32 %v6936_v13, 16  ;;  %v5883_v45 = vld [vmem:[%s6554_s22 + $0x320] ss:$8 sps:$4 sm:$0xff]  }
  0xb0   : > { %2627 = vmatmul.mubr.bf16.gmra.mrb[20].mxu0 %v6840_v7  ;;  %1031 = vmatprep.mubr.bf16.mxu1 %v7901_v32  ;;  %7941 = vst [vmem:[#allocation19_spill] sm:$0xff] %v6945_v59  ;;  %v661_v56 = vrot.slane %v659_v14, 5  ;;  %v683_v17 = vshll.u32 %v6936_v13, 16  ;;  %v1579_v1 = vsel %vm6772_vm5, %v4864_v33, %v1578_v53  ;;  %v671_v3 = vrot.slane %v669_v29, 4  ;;  %v5891_v14 = vld [vmem:[%s6554_s22 + $0x334] ss:$8 sps:$4 sm:$0xff]  }
  0xb1   : > { %2636 = vmatprep.mubr.bf16.mxu0 %v7901_v32  ;;  %v689_v42 = vshll.u32 %v6941_v31, 16  ;;  %v693_v9 = vshrl.u32 %v6941_v31, 16  ;;  %v675_v33 = vshll.u32 %v6948_v63, 16 }
  0xb7   : > { %1032 = vmatmul.mubr.bf16.gmra.mrb[24].mxu1 %v6840_v7  ;;  %v677_v7 = vrot.slane %v675_v33, 5 }
  0xb8   : > { %2637 = vmatmul.mubr.bf16.gmra.mrb[24].mxu0 %v6870_v51  ;;  %1041 = vmatprep.mubr.bf16.mxu1 %v7901_v32 }
  0xb9   : > { %2646 = vmatprep.mubr.bf16.mxu0 %v7901_v32 }
  0xbf   : > { %1042 = vmatmul.mubr.bf16.gmra.mrb[28].mxu1 %v6870_v51 }
  0xc0   : > { %2647 = vmatmul.mubr.bf16.gmra.mrb[28].mxu0 %v6896_v22  ;;  %1051 = vmatprep.mubr.bf16.mxu1 %v7901_v32 }
  0xc1   : > { %2945 = vmatprep.mubr.bf16.mxu0 %v7901_v32 }
  0xc7   : > { %1052 = vmatmul.mubr.bf16.gmra.mrb[32].mxu1 %v6896_v22  ;;  %v1553_v22 = vrot.slane %v6682_v40, 5 }
  0xc8   : > { %2946 = vmatmul.mubr.bf16.vlgmr.msra.gmra.mrb[0].mxu0 %v6816_v44  ;;  %1061 = vmatprep.mubr.bf16.mxu1 %v7901_v32 }
  0xc9   : > { %3277 = vmatpush1.bf16.msra.mxu0 %v5871_v0  ;;  %2955 = vmatprep.mubr.bf16.mxu0 %v7901_v32  ;;  %v6952_v0 = vrot.slane %v665_v18, 5  ;;  %v644_v18 = vsel %vm6594_vm2, %v639_v24, %v6913_v46  ;;  %v662_v32 = vor.u32 %v661_v56, %v658_v34  ;;  %v682_v46 = vrot.slane %v680_v27, 4  ;;  %v5889_v34 = vld [vmem:[%s6554_s22 + $0x330] ss:$8 sps:$4 sm:$0xff]  }
  0xca   : > { %3278 = vmatprep.subr.bf16.mxu0 %v5879_v2  ;;  %v1580_v2 = vrot.slane %v1578_v53, 4  ;;  %v1550_v53 = vrot.slane %v6665_v21, 5  ;;  %v685_v24 = vrot.slane %v683_v17, 5  ;;  %v7942_v56 = vmov 0  }
  0xcb   : > { %v4860_v27 = vrot.slane %v6662_v20, 9 }
  0xcc   : > { %v1582_v28 = vsel %vm6772_vm5, %v1580_v2, %v1581_v37  ;;  %v672_v37 = vor.u32 %v671_v3, %v6952_v0  ;;  %v695_v2 = vrot.slane %v693_v9, 4  ;;  %v1552_v17 = vrot.slane %v1550_v53, 4  ;;  %v5896_v9 = vld [vmem:[%s6554_s22 + $0x340] ss:$8 sps:$4 sm:$0xff]  }
  0xcd   : > { %3279 = vmatpush1.bf16.msra.mxu0 %v5877_v11  ;;  %v6970_v11 = vld [vmem:[%s6482_s19 + $0x98] sm:$0x1]  ;;  %v6972_v29 = vcombine.low %v1579_v1, %v1582_v28  ;;  %v6983_v1 = vrot.slane %v689_v42, 5  ;;  %v6986_v28 = vld [vmem:[%s6482_s19 + $0x9c] sm:$0xf]  ;;  %v686_v3 = vor.u32 %v685_v24, %v682_v46  ;;  %v1551_v40 = vsel %vm6772_vm5, %v4860_v27, %v1550_v53 }
  0xce   : > { %3280 = vmatprep.subr.bf16.mxu0 %v5885_v36  ;;  %v654_v36 = vsel %vm6594_vm2, %v649_v62, %v653_v26  ;;  %v6990_v26 = vld [vmem:[%s6482_s19 + $0xa0] sm:$0xf]  ;;  %v663_v62 = vrot.slane %v662_v32, 4  ;;  %v699_v42 = vshll.u32 %v6970_v11, 16  ;;  %v673_v51 = vrot.slane %v672_v37, 4 }
  0xcf   : > { %1062 = vmatmul.mubr.bf16.gmra.mrb[36].mxu1 %v6945_v59  ;;  %v5898_v59 = vld [vmem:[%s6554_s22 + $0x344] ss:$8 sps:$4 sm:$0xff]   ;;  %v6992_v21 = vcombine.low %v644_v18, %v654_v36  ;;  %v696_v25 = vor.u32 %v695_v2, %v6983_v1  ;;  %v704_v18 = vshrl.u32 %v6986_v28, 16  ;;  %v707_v32 = vshll.u32 %v6986_v28, 16 }
  0xd0   : > { %2956 = vmatmul.mubr.bf16.gmra.mrb[4].mxu0 %v6842_v10  ;;  %1071 = vmatprep.mubr.bf16.mxu1 %v7942_v56  ;;  %v668_v20 = vsel %vm6594_vm2, %v663_v62, %v6952_v0  ;;  %v717_v33 = vshrl.u32 %v6990_v26, 16  ;;  %v687_v36 = vrot.slane %v686_v3, 4  ;;  %v701_v0 = vrot.slane %v699_v42, 5  ;;  %v7021_v37 = vld [vmem:[%s6482_s19 + $0xa4] sm:$0x1] }
  0xd1   : > { %2965 = vmatprep.mubr.bf16.mxu0 %v7942_v56  ;;  %3281 = vmatpush1.bf16.msra.mxu0 %v5883_v45  ;;  %7943 = vst [vmem:[#allocation20_spill] sm:$0xff] %v6992_v21  ;;  %v1557_v45 = vrot.slane %v6696_v49, 5  ;;  %v1554_v49 = vsel %vm6772_vm5, %v1552_v17, %v1553_v22  ;;  %v4861_v53 = vrot.slane %v6692_v47, 9  ;;  %v697_v46 = vrot.slane %v696_v25, 4  ;;  %v5904_v22 = vld [vmem:[%s6554_s22 + $0x350] ss:$8 sps:$4 sm:$0xff]  }
  0xd2   : > { %3282 = vmatprep.subr.bf16.mxu0 %v5891_v14  ;;  %v713_v14 = vshll.u32 %v6990_v26, 16  ;;  %v706_v2 = vrot.slane %v704_v18, 4  ;;  %v709_v62 = vrot.slane %v707_v32, 5  ;;  %v5914_v47 = vld [vmem:[%s6554_s22 + $0x364] ss:$8 sps:$4 sm:$0xff]   ;;  %v719_v17 = vrot.slane %v717_v33, 4 }
  0xd3   : > { %v1559_v24 = vrot.slane %v1557_v45, 4  ;;  %v7028_v3 = vld [vmem:[%s6482_s19 + $0xa8] sm:$0xf]  ;;  %v7031_v42 = vld [vmem:[%s6482_s19 + $0xac] sm:$0xf]  ;;  %v7035_v25 = vcombine.low %v6868_v39, %v6873_v55  ;;  %v7048_v18 = vcombine.low %v6916_v57, %v6919_v58  ;;  %v1558_v32 = vsel %vm6772_vm5, %v4861_v53, %v1557_v45 }
  0xd4   : > { %v7025_v27 = vrot.slane %v713_v14, 5  ;;  %v710_v33 = vor.u32 %v709_v62, %v706_v2  ;;  %v728_v45 = vshrl.u32 %v7028_v3, 16  ;;  %v737_v53 = vshll.u32 %v7031_v42, 16  ;;  %v5920_v2 = vld [vmem:[%s6554_s22 + $0x370] ss:$8 sps:$4 sm:$0xff]  }
  0xd5   : > { %3283 = vmatpush1.bf16.msra.mxu0 %v5889_v34  ;;  %v1560_v34 = vrot.slane %v6730_v12, 5  ;;  %v7039_v12 = vcombine.low %v6890_v38, %v6894_v19 }
  0xd6   : > { %3284 = vmatprep.subr.bf16.mxu0 %v5898_v59  ;;  %v678_v59 = vsel %vm6594_vm2, %v673_v51, %v677_v7  ;;  %v7043_v51 = vcombine.low %v1551_v40, %v1554_v49  ;;  %v702_v40 = vsel %vm6594_vm2, %v697_v46, %v701_v0  ;;  %v720_v49 = vor.u32 %v719_v17, %v7025_v27 }
  0xd7   : > { %1072 = vmatmul.mubr.bf16.gmra.mrb[40].mxu1 %v6992_v21  ;;  %v7041_v7 = vcombine.low %v668_v20, %v678_v59  ;;  %v1561_v14 = vsel %vm6772_vm5, %v1559_v24, %v1560_v34  ;;  %v723_v20 = vshll.u32 %v7021_v37, 16  ;;  %v1564_v59 = vrot.slane %v6723_v5, 5  ;;  %v5930_v21 = vld [vmem:[%s6554_s22 + $0x384] ss:$8 sps:$4 sm:$0xff]  }
  0xd8   : > { %2966 = vmatmul.mubr.bf16.gmra.mrb[8].mxu0 %v6865_v50  ;;  %1081 = vmatprep.mubr.bf16.mxu1 %v7942_v56  ;;  %v741_v0 = vshrl.u32 %v7031_v42, 16  ;;  %v7073_v5 = vcombine.low %v6936_v13, %v6941_v31  ;;  %v7077_v24 = vcombine.low %v1558_v32, %v1561_v14  ;;  %v711_v62 = vrot.slane %v710_v33, 4 }
  0xd9   : > { %2975 = vmatprep.mubr.bf16.mxu0 %v7942_v56  ;;  %3285 = vmatpush1.bf16.msra.mxu0 %v5896_v9  ;;  %7944 = vst [vmem:[#allocation21_spill] sm:$0xff] %v7041_v7  ;;  %v5912_v9 = vld [vmem:[%s6554_s22 + $0x360] ss:$8 sps:$4 sm:$0xff]   ;;  %v725_v34 = vrot.slane %v723_v20, 5  ;;  %v1566_v17 = vrot.slane %v1564_v59, 4  ;;  %v739_v32 = vrot.slane %v737_v53, 5  ;;  %v7113_v53 = vcombine.low %v6986_v28, %v6990_v26 }
  0xda   : > { %3286 = vmatprep.subr.bf16.mxu0 %v5906_v48  ;;  %v692_v48 = vsel %vm6594_vm2, %v687_v36, %v6983_v1  ;;  %v5922_v1 = vld [vmem:[%s6554_s22 + $0x374] ss:$8 sps:$4 sm:$0xff]   ;;  %v731_v36 = vshll.u32 %v7028_v3, 16  ;;  %7946 = vst [vmem:[#allocation23_spill] sm:$0xff] %v7077_v24  ;;  %v743_v14 = vrot.slane %v741_v0, 4 }
  0xdb   : > { %v7075_v46 = vcombine.low %v692_v48, %v702_v40  ;;  %v730_v48 = vrot.slane %v728_v45, 4  ;;  %v1571_v45 = vrot.slane %v6765_v54, 5 }
  0xdc   : > { %v733_v40 = vrot.slane %v731_v36, 5  ;;  %v752_v36 = vshrl.u32 %v7087_v30, 16 }
  0xdd   : > { %3287 = vmatpush1.bf16.msra.mxu0 %v5904_v22  ;;  %7945 = vst [vmem:[#allocation22_spill] sm:$0xff] %v7075_v46  ;;  %v4862_v22 = vrot.slane %v6720_v4, 9 }
  0xde   : > { %3288 = vmatprep.subr.bf16.mxu0 %v5914_v47  ;;  %v721_v47 = vrot.slane %v720_v49, 4  ;;  %v747_v49 = vshll.u32 %v7084_v6, 16 }
  0xdf   : > { %1082 = vmatmul.mubr.bf16.gmra.mrb[44].mxu1 %v7041_v7  ;;  %v1567_v7 = vrot.slane %v6752_v35, 5  ;;  %v1565_v4 = vsel %vm6772_vm5, %v4862_v22, %v1564_v59  ;;  %v716_v35 = vsel %vm6594_vm2, %v711_v62, %v7025_v27  ;;  %v734_v59 = vor.u32 %v733_v40, %v730_v48 }
  0xe0   : > { %2976 = vmatmul.mubr.bf16.gmra.mrb[12].mxu0 %v7043_v51  ;;  %1091 = vmatprep.mubr.bf16.mxu1 %v7942_v56  ;;  %v726_v20 = vsel %vm6594_vm2, %v721_v47, %v725_v34  ;;  %v755_v27 = vshll.u32 %v7087_v30, 16  ;;  %v749_v34 = vrot.slane %v747_v49, 5  ;;  %v4863_v22 = vrot.slane %v6761_v52, 9 }
  0xe1   : > { %2985 = vmatprep.mubr.bf16.mxu0 %v7942_v56  ;;  %3289 = vmatpush1.bf16.msra.mxu0 %v5912_v9  ;;  %v7092_v9 = vld [vmem:[%s6482_s19 + $0xb8] sm:$0xf]  ;;  %v1568_v33 = vsel %vm6772_vm5, %v1566_v17, %v1567_v7  ;;  %v7115_v0 = vcombine.low %v716_v35, %v726_v20  ;;  %v1573_v47 = vrot.slane %v1571_v45, 4  ;;  %v1574_v17 = vrot.slane %v6797_v16, 5 }
  0xe2   : > { %3290 = vmatprep.subr.bf16.mxu0 %v5922_v1  ;;  %v744_v1 = vor.u32 %v743_v14, %v739_v32  ;;  %v761_v7 = vshll.u32 %v7092_v9, 16  ;;  %v7117_v54 = vcombine.low %v1565_v4, %v1568_v33  ;;  %v754_v48 = vrot.slane %v752_v36, 4 }
  0xe3   : > { %v757_v40 = vrot.slane %v755_v27, 5  ;;  %v1572_v35 = vsel %vm6772_vm5, %v4863_v22, %v1571_v45  ;;  %v1575_v16 = vsel %vm6772_vm5, %v1573_v47, %v1574_v17  ;;  %v1588_v47 = vrot.slane %v6899_v23, 5  ;;  %v7175_v23 = vld [vmem:[%s6482_s19 + $0x4] sm:$0xf] }
  0xe4   : > { %v745_v62 = vrot.slane %v744_v1, 4  ;;  %v763_v14 = vrot.slane %v761_v7, 5 }
  0xe5   : > { %3291 = vmatpush1.bf16.msra.mxu0 %v5920_v2  ;;  %v735_v2 = vrot.slane %v734_v59, 4  ;;  %v758_v20 = vor.u32 %v757_v40, %v754_v48  ;;  %v7139_v59 = vcombine.low %v7028_v3, %v7031_v42  ;;  %v7172_v48 = vld [vmem:[%s6482_s19] sm:$0xf] }
  0xe6   : > { %3661 = vmatprep.subr.bf16.mxu0 %v5930_v21  ;;  %v765_v21 = vshrl.u32 %v7092_v9, 16  ;;  %v750_v4 = vsel %vm6594_vm2, %v745_v62, %v749_v34  ;;  %v7156_v34 = vcombine.low %v7087_v30, %v7092_v9  ;;  %v4824_v40 = vcombine.low %v7172_v48, %v7175_v23 }
  0xe7   : > { %1092 = vmatmul.mubr.bf16.gmra.mrb[48].mxu1 %v7075_v46  ;;  %v740_v52 = vsel %vm6594_vm2, %v735_v2, %v739_v32  ;;  %v7143_v32 = vcombine.low %v1572_v35, %v1575_v16  ;;  %v759_v45 = vrot.slane %v758_v20, 4  ;;  %v4865_v2 = vrot.slane %v6868_v39, 9  ;;  %v5893_v35 = vld [vmem:[%s6554_s22 + $0x100] ss:$8 sps:$4 sm:$0xff]   ;;  %v5903_v20 = vld [vmem:[%s6554_s22 + $0x114] ss:$8 sps:$4 sm:$0xff]  }
  0xe8   : > { %2986 = vmatmul.mubr.bf16.gmra.mrb[16].mxu0 %v7077_v24  ;;  %1101 = vmatprep.mubr.bf16.mxu1 %v7942_v56  ;;  %v767_v46 = vrot.slane %v765_v21, 4  ;;  %v7122_v24 = vld [vmem:[%s6482_s19 + $0xbc] sm:$0x1]  ;;  %v7141_v1 = vcombine.low %v740_v52, %v750_v4  ;;  %v1585_v21 = vrot.slane %v6873_v55, 5  ;;  %v1592_v39 = vrot.slane %v6894_v19, 5 }
  0xe9   : > { %2995 = vmatprep.mubr.bf16.mxu0 %v7942_v56  ;;  %v771_v49 = vshll.u32 %v7122_v24, 16  ;;  %v4866_v52 = vrot.slane %v6890_v38, 9  ;;  %v1595_v16 = vrot.slane %v6911_v41, 5  ;;  %v1599_v38 = vrot.slane %v6919_v58, 5  ;;  %v5911_v41 = vld [vmem:[%s6554_s22 + $0x124] ss:$8 sps:$4 sm:$0xff]  }
  0xea   : > { %v768_v33 = vor.u32 %v767_v46, %v763_v14  ;;  %v764_v46 = vsel %vm6594_vm2, %v759_v45, %v763_v14  ;;  %v1587_v62 = vrot.slane %v1585_v21, 4  ;;  %v1586_v55 = vsel %vm6772_vm5, %v4865_v2, %v1585_v21  ;;  %v5919_v21 = vld [vmem:[%s6554_s22 + $0x134] ss:$8 sps:$4 sm:$0xff]   ;;  %v5917_v2 = vld [vmem:[%s6554_s22 + $0x130] ss:$8 sps:$4 sm:$0xff]  }
  0xeb   : > { %v773_v27 = vrot.slane %v771_v49, 5  ;;  %v1594_v4 = vrot.slane %v1592_v39, 4  ;;  %v1593_v19 = vsel %vm6772_vm5, %v4866_v52, %v1592_v39  ;;  %v5901_v49 = vld [vmem:[%s6554_s22 + $0x110] ss:$8 sps:$4 sm:$0xff]   ;;  %v1609_v39 = vrot.slane %v6970_v11, 5 }
  0xec   : > { %v769_v36 = vrot.slane %v768_v33, 4  ;;  %v1589_v17 = vsel %vm6772_vm5, %v1587_v62, %v1588_v47  ;;  %v5927_v62 = vld [vmem:[%s6554_s22 + $0x144] ss:$8 sps:$4 sm:$0xff]   ;;  %v1613_v11 = vrot.slane %v6990_v26, 5  ;;  %v5933_v52 = vld [vmem:[%s6554_s22 + $0x150] ss:$8 sps:$4 sm:$0xff]  }
  0xed   : > { %v7179_v14 = vcombine.low %v1586_v55, %v1589_v17  ;;  %v1596_v33 = vsel %vm6772_vm5, %v1594_v4, %v1595_v16  ;;  %v4868_v55 = vrot.slane %v6936_v13, 9  ;;  %v5943_v4 = vld [vmem:[%s6554_s22 + $0x164] ss:$8 sps:$4 sm:$0xff]  }
  0xee   : > { %v774_v7 = vsel %vm6594_vm2, %v769_v36, %v773_v27  ;;  %v7195_v45 = vcombine.low %v1593_v19, %v1596_v33  ;;  %v4867_v36 = vrot.slane %v6916_v57, 9  ;;  %v1601_v27 = vrot.slane %v1599_v38, 4 }
  0xef   : > { %1102 = vmatmul.mubr.bf16.gmra.mrb[52].mxu1 %v7115_v0  ;;  %v7158_v22 = vcombine.low %v764_v46, %v774_v7  ;;  %v1602_v46 = vrot.slane %v6948_v63, 5  ;;  %v5909_v7 = vld [vmem:[%s6554_s22 + $0x120] ss:$8 sps:$4 sm:$0xff]   ;;  %v1606_v63 = vrot.slane %v6941_v31, 5  ;;  %v1615_v19 = vrot.slane %v1613_v11, 4 }
  0xf0   : > { %2996 = vmatmul.mubr.bf16.gmra.mrb[20].mxu0 %v7117_v54  ;;  %1111 = vmatprep.mubr.bf16.mxu1 %v7942_v56  ;;  %v1600_v57 = vsel %vm6772_vm5, %v4867_v36, %v1599_v38  ;;  %v1616_v33 = vrot.slane %v7021_v37, 5  ;;  %v5951_v38 = vld [vmem:[%s6554_s22 + $0x174] ss:$8 sps:$4 sm:$0xff]   ;;  %v1620_v37 = vrot.slane %v7031_v42, 5  ;;  %v5958_v36 = vld [vmem:[%s6554_s22 + $0x184] ss:$8 sps:$4 sm:$0xff]  }
  0xf1   : > { %3005 = vmatprep.mubr.bf16.mxu0 %v7942_v56  ;;  %v1603_v58 = vsel %vm6772_vm5, %v1601_v27, %v1602_v46  ;;  %v1608_v17 = vrot.slane %v1606_v63, 4  ;;  %v1607_v13 = vsel %vm6772_vm5, %v4868_v55, %v1606_v63  ;;  %v6148_v27 = vld [vmem:[%s6482_s19 + $0x30] sm:$0xf]  ;;  %v6149_v46 = vld [vmem:[%s6482_s19 + $0x34] sm:$0xf]  ;;  %v1623_v63 = vrot.slane %v7084_v6, 5 }
  0xf2   : > { %v7212_v47 = vcombine.low %v1600_v57, %v1603_v58  ;;  %v1617_v26 = vsel %vm6772_vm5, %v1615_v19, %v1616_v33  ;;  %v4870_v57 = vrot.slane %v7028_v3, 9  ;;  %v1622_v58 = vrot.slane %v1620_v37, 4  ;;  %v6150_v6 = vld [vmem:[%s6482_s19 + $0x3c] sm:$0xf] }
  0xf3   : > { %v1610_v31 = vsel %vm6772_vm5, %v1608_v17, %v1609_v39  ;;  %v4871_v39 = vrot.slane %v7087_v30, 9 }
  0xf4   : > { %v7229_v16 = vcombine.low %v1607_v13, %v1610_v31  ;;  %v1621_v42 = vsel %vm6772_vm5, %v4870_v57, %v1620_v37  ;;  %v1624_v3 = vsel %vm6772_vm5, %v1622_v58, %v1623_v63  ;;  %v7272_v13 = vld [vmem:[%s6482_s19 + $0xc4] sm:$0xf]  ;;  %v6154_v37 = vld [vmem:[%s6482_s19 + $0x54] sm:$0xf]  ;;  %v5928_v63 = vld [vmem:[%s6554_s22 + $0x380] ss:$8 sps:$4 sm:$0xff]  }
  0xf5   : > { %v7267_v17 = vcombine.low %v1621_v42, %v1624_v3  ;;  %v2804_v30 = vrot.slane %v7272_v13, 5  ;;  %v6157_v57 = vld [vmem:[%s6482_s19 + $0x64] sm:$0xf]  ;;  %v5938_v42 = vld [vmem:[%s6554_s22 + $0x394] ss:$8 sps:$4 sm:$0xff]  }
  0xf6   : > { %v5936_v3 = vld [vmem:[%s6554_s22 + $0x390] ss:$8 sps:$4 sm:$0xff]  }
  0xf7   : > { %1112 = vmatmul.mubr.bf16.gmra.mrb[56].mxu1 %v7141_v1 }
  0xf8   : > { %3006 = vmatmul.mubr.bf16.gmra.mrb[24].mxu0 %v7143_v32  ;;  %1121 = vmatprep.mubr.bf16.mxu1 %v7942_v56 }
  0xf9   : > { %3015 = vmatprep.mubr.bf16.mxu0 %v7942_v56 }
  0xff   : > { %1122 = vmatmul.mubr.bf16.gmra.mrb[60].mxu1 %v7158_v22 }
 0x100   : > { %3016 = vmatmul.mubr.bf16.gmra.mrb[28].mxu0 %v6972_v29  ;;  %1340 = vmatprep.mubr.bf16.mxu1 %v7942_v56 }
 0x101   : > { %3025 = vmatprep.mubr.bf16.mxu0 %v7942_v56 }
 0x107   : > { %1341 = vmatmul.mubr.bf16.vlgmr.msra.gmra.mrb[0].mxu1 %v4824_v40  ;;  %v5925_v40 = vld [vmem:[%s6554_s22 + $0x140] ss:$8 sps:$4 sm:$0xff]  }
 0x108   : > { %3026 = vmatmul.mubr.bf16.gmra.mrb[32].mxu0 %v7179_v14  ;;  %1797 = vmatpush1.bf16.msra.mxu1 %v5893_v35  ;;  %v5935_v35 = vld [vmem:[%s6554_s22 + $0x154] ss:$8 sps:$4 sm:$0xff]  }
 0x109   : > { %1350 = vmatprep.mubr.bf16.mxu1 %v7942_v56  ;;  %3035 = vmatprep.mubr.bf16.mxu0 %v7942_v56 }
 0x10a   : > { %1798 = vmatprep.subr.bf16.mxu1 %v5903_v20  ;;  %v4869_v20 = vrot.slane %v6986_v28, 9 }
 0x10c   : > { %1799 = vmatpush1.bf16.msra.mxu1 %v5901_v49  ;;  %v5941_v49 = vld [vmem:[%s6554_s22 + $0x160] ss:$8 sps:$4 sm:$0xff]   ;;  %v1614_v28 = vsel %vm6772_vm5, %v4869_v20, %v1613_v11 }
 0x10d   : > { %1800 = vmatprep.subr.bf16.mxu1 %v5911_v41  ;;  %v5949_v41 = vld [vmem:[%s6554_s22 + $0x170] ss:$8 sps:$4 sm:$0xff]   ;;  %v7287_v11 = vld [vmem:[%s6482_s19 + $0xc8] sm:$0x1] }
 0x10f   : > { %1351 = vmatmul.mubr.bf16.gmra.mrb[4].mxu1 %v6686_v43 }
 0x110   : > { %3036 = vmatmul.mubr.bf16.gmra.mrb[36].mxu0 %v7195_v45  ;;  %1360 = vmatprep.mubr.bf16.mxu1 %v7942_v56 }
 0x111   : > { %3045 = vmatprep.mubr.bf16.mxu0 %v7942_v56  ;;  %1801 = vmatpush1.bf16.msra.mxu1 %v5909_v7  ;;  %v7248_v7 = vcombine.low %v6148_v27, %v6149_v46  ;;  %v6156_v46 = vld [vmem:[%s6482_s19 + $0x60] sm:$0xf] }
 0x112   : > { %1802 = vmatprep.subr.bf16.mxu1 %v5919_v21  ;;  %v7250_v21 = vcombine.low %v1614_v28, %v1617_v26  ;;  %v7317_v58 = vcombine.low %v6156_v46, %v6157_v57 }
 0x115   : > { %1803 = vmatpush1.bf16.msra.mxu1 %v5917_v2  ;;  %v1627_v2 = vrot.slane %v7092_v9, 5 }
 0x116   : > { %1804 = vmatprep.subr.bf16.mxu1 %v5927_v62  ;;  %v6151_v62 = vld [vmem:[%s6482_s19 + $0x40] sm:$0xf] }
 0x117   : > { %1361 = vmatmul.mubr.bf16.gmra.mrb[8].mxu1 %v6715_v61  ;;  %v7265_v55 = vcombine.low %v6150_v6, %v6151_v62  ;;  %v1628_v9 = vsel %vm6772_vm5, %v4871_v39, %v1627_v2  ;;  %v5944_v6 = vld [vmem:[%s6554_s22 + $0x3a0] ss:$8 sps:$4 sm:$0xff]   ;;  %v5954_v62 = vld [vmem:[%s6554_s22 + $0x3b4] ss:$8 sps:$4 sm:$0xff]   ;;  %v5952_v39 = vld [vmem:[%s6554_s22 + $0x3b0] ss:$8 sps:$4 sm:$0xff]  }
 0x118   : > { %3046 = vmatmul.mubr.bf16.gmra.mrb[40].mxu0 %v7212_v47  ;;  %1370 = vmatprep.mubr.bf16.mxu1 %v7942_v56 }
 0x119   : > { %3055 = vmatprep.mubr.bf16.mxu0 %v7942_v56  ;;  %1805 = vmatpush1.bf16.msra.mxu1 %v5925_v40  ;;  %v1629_v40 = vrot.slane %v1627_v2, 4  ;;  %v5946_v2 = vld [vmem:[%s6554_s22 + $0x3a4] ss:$8 sps:$4 sm:$0xff]  }
 0x11a   : > { %1806 = vmatprep.subr.bf16.mxu1 %v5935_v35  ;;  %v1630_v35 = vrot.slane %v7122_v24, 5  ;;  %v7284_v24 = vld [vmem:[%s6482_s19 + $0xc0] sm:$0xf] }
 0x11b   : > { %v4989_v33 = vrot.slane %v7284_v24, 9 }
 0x11c   : > { %v1631_v31 = vsel %vm6772_vm5, %v1629_v40, %v1630_v35  ;;  %v5961_v40 = vld [vmem:[%s6554_s22 + $0x3c4] ss:$8 sps:$4 sm:$0xff]   ;;  %v5959_v35 = vld [vmem:[%s6554_s22 + $0x3c0] ss:$8 sps:$4 sm:$0xff]  }
 0x11d   : > { %1807 = vmatpush1.bf16.msra.mxu1 %v5933_v52  ;;  %v6152_v52 = vld [vmem:[%s6482_s19 + $0x48] sm:$0xf]  ;;  %v7293_v19 = vcombine.low %v1628_v9, %v1631_v31  ;;  %v2805_v28 = vsel %vm6772_vm5, %v4989_v33, %v2804_v30  ;;  %v5967_v9 = vld [vmem:[%s6554_s22 + $0x3d4] ss:$8 sps:$4 sm:$0xff]   ;;  %v5965_v31 = vld [vmem:[%s6554_s22 + $0x3d0] ss:$8 sps:$4 sm:$0xff]  }
 0x11e   : > { %1808 = vmatprep.subr.bf16.mxu1 %v5943_v4  ;;  %v6153_v4 = vld [vmem:[%s6482_s19 + $0x4c] sm:$0xf]  ;;  %v5978_v33 = vld [vmem:[%s6554_s22 + $0x3f0] ss:$8 sps:$4 sm:$0xff]  }
 0x11f   : > { %1371 = vmatmul.mubr.bf16.gmra.mrb[12].mxu1 %v6792_v8  ;;  %v7291_v20 = vcombine.low %v6152_v52, %v6153_v4  ;;  %v5971_v52 = vld [vmem:[%s6554_s22 + $0x3e0] ss:$8 sps:$4 sm:$0xff]   ;;  %v5980_v4 = vld [vmem:[%s6554_s22 + $0x3f4] ss:$8 sps:$4 sm:$0xff]  }
 0x120   : > { %3056 = vmatmul.mubr.bf16.gmra.mrb[44].mxu0 %v7229_v16  ;;  %1380 = vmatprep.mubr.bf16.mxu1 %v7942_v56 }
 0x121   : > { %3065 = vmatprep.mubr.bf16.mxu0 %v7942_v56  ;;  %1809 = vmatpush1.bf16.msra.mxu1 %v5941_v49  ;;  %v2806_v49 = vrot.slane %v2804_v30, 4  ;;  %v5973_v30 = vld [vmem:[%s6554_s22 + $0x3e4] ss:$8 sps:$4 sm:$0xff]  }
 0x122   : > { %1810 = vmatprep.subr.bf16.mxu1 %v5951_v38  ;;  %v2807_v38 = vrot.slane %v7287_v11, 5 }
 0x124   : > { %v2808_v26 = vsel %vm6772_vm5, %v2806_v49, %v2807_v38  ;;  %v5987_v49 = vld [vmem:[%s6554_s22 + $0x404] ss:$8 sps:$4 sm:$0xff]   ;;  %v1522_v38 = vrot.slane %v7175_v23, 5 }
 0x125   : > { %1811 = vmatpush1.bf16.msra.mxu1 %v5949_v41  ;;  %v6155_v41 = vld [vmem:[%s6482_s19 + $0x58] sm:$0xf]  ;;  %v7309_v27 = vcombine.low %v2805_v28, %v2808_v26  ;;  %v6158_v28 = vld [vmem:[%s6482_s19 + $0x8] sm:$0x1] }
 0x126   : > { %2159 = vmatprep.subr.bf16.mxu1 %v5958_v36  ;;  %v7307_v36 = vcombine.low %v6154_v37, %v6155_v41  ;;  %v1525_v26 = vrot.slane %v6158_v28, 5  ;;  %v4856_v37 = vrot.slane %v7172_v48, 9  ;;  %v1524_v41 = vrot.slane %v1522_v38, 4  ;;  %v5956_v48 = vld [vmem:[%s6554_s22 + $0x180] ss:$8 sps:$4 sm:$0xff]  }
 0x127   : > { %1381 = vmatmul.mubr.bf16.gmra.mrb[16].mxu1 %v7248_v7  ;;  %v7425_v28 = vld [vmem:[%s6482_s19 + $0xd0] sm:$0xf] }
 0x128   : > { %3066 = vmatmul.mubr.bf16.gmra.mrb[48].mxu0 %v7250_v21  ;;  %1390 = vmatprep.mubr.bf16.mxu1 %v7942_v56  ;;  %v1523_v46 = vsel %vm6772_vm5, %v4856_v37, %v1522_v38  ;;  %v1526_v23 = vsel %vm6772_vm5, %v1524_v41, %v1525_v26  ;;  %v7422_v38 = vld [vmem:[%s6482_s19 + $0xcc] sm:$0xf]  ;;  %v5985_v37 = vld [vmem:[%s6554_s22 + $0x400] ss:$8 sps:$4 sm:$0xff]   ;;  %v5993_v41 = vld [vmem:[%s6554_s22 + $0x414] ss:$8 sps:$4 sm:$0xff]  }
 0x129   : > { %3075 = vmatprep.mubr.bf16.mxu0 %v7942_v56  ;;  %v4889_v57 = vcombine.low %v1523_v46, %v1526_v23  ;;  %v5041_v26 = vcombine.low %v7422_v38, %v7425_v28  ;;  %v7948_v46 = vld [vmem:[#allocation12_spill] sm:$0xff]  ;;  %v5991_v23 = vld [vmem:[%s6554_s22 + $0x410] ss:$8 sps:$4 sm:$0xff]   ;;  %v3921_v15 = vrot.slane %v7425_v28, 5 }
 0x12f   : > { %1391 = vmatmul.mubr.bf16.gmra.mrb[20].mxu1 %v7265_v55 }
 0x130   : > { %3076 = vmatmul.mubr.bf16.gmra.mrb[52].mxu0 %v7267_v17  ;;  %1400 = vmatprep.mubr.bf16.mxu1 %v7942_v56 }
 0x131   : > { %3085 = vmatprep.mubr.bf16.mxu0 %v7942_v56 }
 0x137   : > { %1401 = vmatmul.mubr.bf16.gmra.mrb[24].mxu1 %v7291_v20 }
 0x138   : > { %3086 = vmatmul.mubr.bf16.gmra.mrb[56].mxu0 %v7293_v19  ;;  %1410 = vmatprep.mubr.bf16.mxu1 %v7942_v56 }
 0x139   : > { %3095 = vmatprep.mubr.bf16.mxu0 %v7942_v56 }
 0x13f   : > { %1411 = vmatmul.mubr.bf16.gmra.mrb[28].mxu1 %v7307_v36 }
 0x140   : > { %3096 = vmatmul.mubr.bf16.gmra.mrb[60].mxu0 %v7309_v27  ;;  %1420 = vmatprep.mubr.bf16.mxu1 %v7942_v56 }
 0x141   : > { %3308 = vmatprep.mubr.bf16.mxu0 %v7942_v56 }
 0x147   : > { %1421 = vmatmul.mubr.bf16.gmra.mrb[32].mxu1 %v7317_v58 }
 0x148   : > { %3309 = vmatmul.mubr.bf16.vlgmr.msra.gmra.mrb[0].mxu0 %v6715_v61  ;;  %1430 = vmatprep.mubr.bf16.mxu1 %v7942_v56 }
 0x149   : > { %3662 = vmatpush1.bf16.msra.mxu0 %v5928_v63  ;;  %3318 = vmatprep.mubr.bf16.mxu0 %v7942_v56  ;;  %v5964_v63 = vld [vmem:[%s6554_s22 + $0x194] ss:$8 sps:$4 sm:$0xff]  }
 0x14a   : > { %3663 = vmatprep.subr.bf16.mxu0 %v5938_v42  ;;  %v5962_v42 = vld [vmem:[%s6554_s22 + $0x190] ss:$8 sps:$4 sm:$0xff]  }
 0x14d   : > { %3664 = vmatpush1.bf16.msra.mxu0 %v5936_v3  ;;  %v5970_v3 = vld [vmem:[%s6554_s22 + $0x1a4] ss:$8 sps:$4 sm:$0xff]  }
 0x14e   : > { %3665 = vmatprep.subr.bf16.mxu0 %v5946_v2  ;;  %v5968_v2 = vld [vmem:[%s6554_s22 + $0x1a0] ss:$8 sps:$4 sm:$0xff]  }
 0x14f   : > { %1431 = vmatmul.mubr.bf16.gmra.mrb[36].mxu1 %v7035_v25 }
 0x150   : > { %3319 = vmatmul.mubr.bf16.gmra.mrb[4].mxu0 %v6792_v8  ;;  %1440 = vmatprep.mubr.bf16.mxu1 %v7942_v56 }
 0x151   : > { %3328 = vmatprep.mubr.bf16.mxu0 %v7942_v56  ;;  %3666 = vmatpush1.bf16.msra.mxu0 %v5944_v6  ;;  %v5976_v6 = vld [vmem:[%s6554_s22 + $0x1b4] ss:$8 sps:$4 sm:$0xff]  }
 0x152   : > { %3667 = vmatprep.subr.bf16.mxu0 %v5954_v62  ;;  %v5974_v62 = vld [vmem:[%s6554_s22 + $0x1b0] ss:$8 sps:$4 sm:$0xff]  }
 0x155   : > { %3668 = vmatpush1.bf16.msra.mxu0 %v5952_v39  ;;  %v5984_v39 = vld [vmem:[%s6554_s22 + $0x1c4] ss:$8 sps:$4 sm:$0xff]  }
 0x156   : > { %3669 = vmatprep.subr.bf16.mxu0 %v5961_v40  ;;  %v5982_v40 = vld [vmem:[%s6554_s22 + $0x1c0] ss:$8 sps:$4 sm:$0xff]  }
 0x157   : > { %1441 = vmatmul.mubr.bf16.gmra.mrb[40].mxu1 %v7039_v12 }
 0x158   : > { %3329 = vmatmul.mubr.bf16.gmra.mrb[8].mxu0 %v7248_v7  ;;  %1450 = vmatprep.mubr.bf16.mxu1 %v7942_v56 }
 0x159   : > { %3338 = vmatprep.mubr.bf16.mxu0 %v7942_v56  ;;  %3670 = vmatpush1.bf16.msra.mxu0 %v5959_v35  ;;  %v5990_v35 = vld [vmem:[%s6554_s22 + $0x1d4] ss:$8 sps:$4 sm:$0xff]  }
 0x15a   : > { %3671 = vmatprep.subr.bf16.mxu0 %v5967_v9  ;;  %v5996_v9 = vld [vmem:[%s6554_s22 + $0x1e4] ss:$8 sps:$4 sm:$0xff]  }
 0x15d   : > { %3672 = vmatpush1.bf16.msra.mxu0 %v5965_v31  ;;  %v5994_v31 = vld [vmem:[%s6554_s22 + $0x1e0] ss:$8 sps:$4 sm:$0xff]  }
 0x15e   : > { %3673 = vmatprep.subr.bf16.mxu0 %v5973_v30  ;;  %v6002_v30 = vld [vmem:[%s6554_s22 + $0x1f4] ss:$8 sps:$4 sm:$0xff]  }
 0x15f   : > { %1451 = vmatmul.mubr.bf16.gmra.mrb[44].mxu1 %v7048_v18 }
 0x160   : > { %3339 = vmatmul.mubr.bf16.gmra.mrb[12].mxu0 %v7265_v55  ;;  %1460 = vmatprep.mubr.bf16.mxu1 %v7942_v56 }
 0x161   : > { %3348 = vmatprep.mubr.bf16.mxu0 %v7942_v56  ;;  %3674 = vmatpush1.bf16.msra.mxu0 %v5971_v52  ;;  %v6000_v52 = vld [vmem:[%s6554_s22 + $0x1f0] ss:$8 sps:$4 sm:$0xff]  }
 0x162   : > { %3675 = vmatprep.subr.bf16.mxu0 %v5980_v4  ;;  %v6159_v4 = vld [vmem:[%s6554_s22 + $0x204] ss:$8 sps:$4 sm:$0xff]  }
 0x165   : > { %3676 = vmatpush1.bf16.msra.mxu0 %v5978_v33  ;;  %v7947_v33 = vld [vmem:[#allocation23_spill] sm:$0xff] }
 0x166   : > { %4030 = vmatprep.subr.bf16.mxu0 %v5987_v49  ;;  %v7415_v49 = vcombine.low %v7284_v24, %v7272_v13 }
 0x167   : > { %1461 = vmatmul.mubr.bf16.gmra.mrb[48].mxu1 %v7073_v5 }
 0x168   : > { %3349 = vmatmul.mubr.bf16.gmra.mrb[16].mxu0 %v7291_v20  ;;  %1470 = vmatprep.mubr.bf16.mxu1 %v7942_v56 }
 0x169   : > { %3358 = vmatprep.mubr.bf16.mxu0 %v7942_v56 }
 0x16f   : > { %1471 = vmatmul.mubr.bf16.gmra.mrb[52].mxu1 %v7113_v53 }
 0x170   : > { %3359 = vmatmul.mubr.bf16.gmra.mrb[20].mxu0 %v7307_v36  ;;  %1480 = vmatprep.mubr.bf16.mxu1 %v7942_v56 }
 0x171   : > { %3368 = vmatprep.mubr.bf16.mxu0 %v7942_v56 }
 0x177   : > { %1481 = vmatmul.mubr.bf16.gmra.mrb[56].mxu1 %v7139_v59 }
 0x178   : > { %3369 = vmatmul.mubr.bf16.gmra.mrb[24].mxu0 %v7317_v58  ;;  %1490 = vmatprep.mubr.bf16.mxu1 %v7942_v56 }
 0x179   : > { %3378 = vmatprep.mubr.bf16.mxu0 %v7942_v56 }
 0x17f   : > { %1491 = vmatmul.mubr.bf16.gmra.mrb[60].mxu1 %v7156_v34 }
 0x180   : > { %3379 = vmatmul.mubr.bf16.gmra.mrb[28].mxu0 %v7035_v25  ;;  %1828 = vmatprep.mubr.bf16.mxu1 %v7942_v56 }
 0x181   : > { %3388 = vmatprep.mubr.bf16.mxu0 %v7942_v56 }
 0x187   : > { %1829 = vmatmul.mubr.bf16.vlgmr.msra.gmra.mrb[0].mxu1 %v4889_v57  ;;  %v5999_v57 = vld [vmem:[%s6554_s22 + $0x424] ss:$8 sps:$4 sm:$0xff]  }
 0x188   : > { %3389 = vmatmul.mubr.bf16.gmra.mrb[32].mxu0 %v7039_v12  ;;  %2160 = vmatpush1.bf16.msra.mxu1 %v5956_v48  ;;  %v5997_v48 = vld [vmem:[%s6554_s22 + $0x420] ss:$8 sps:$4 sm:$0xff]  }
 0x189   : > { %1838 = vmatprep.mubr.bf16.mxu1 %v7942_v56  ;;  %3398 = vmatprep.mubr.bf16.mxu0 %v7942_v56 }
 0x18a   : > { %2161 = vmatprep.subr.bf16.mxu1 %v5964_v63  ;;  %v6005_v63 = vld [vmem:[%s6554_s22 + $0x434] ss:$8 sps:$4 sm:$0xff]  }
 0x18c   : > { %2162 = vmatpush1.bf16.msra.mxu1 %v5962_v42  ;;  %v7949_v42 = vld [vmem:[#allocation13_spill] sm:$0xff] }
 0x18d   : > { %2163 = vmatprep.subr.bf16.mxu1 %v5970_v3  ;;  %v6003_v3 = vld [vmem:[%s6554_s22 + $0x430] ss:$8 sps:$4 sm:$0xff]  }
 0x18f   : > { %1839 = vmatmul.mubr.bf16.gmra.mrb[4].mxu1 %v6816_v44  ;;  %v5988_v44 = vld [vmem:[%s6554_s22 + $0x1d0] ss:$8 sps:$4 sm:$0xff]  }
 0x190   : > { %3399 = vmatmul.mubr.bf16.gmra.mrb[36].mxu0 %v7048_v18  ;;  %1848 = vmatprep.mubr.bf16.mxu1 %v7942_v56 }
 0x191   : > { %3408 = vmatprep.mubr.bf16.mxu0 %v7942_v56  ;;  %2164 = vmatpush1.bf16.msra.mxu1 %v5968_v2  ;;  %v6008_v2 = vld [vmem:[%s6554_s22 + $0x444] ss:$8 sps:$4 sm:$0xff]  }
 0x192   : > { %2165 = vmatprep.subr.bf16.mxu1 %v5976_v6  ;;  %v6006_v6 = vld [vmem:[%s6554_s22 + $0x440] ss:$8 sps:$4 sm:$0xff]  }
 0x195   : > { %2166 = vmatpush1.bf16.msra.mxu1 %v5974_v62  ;;  %v6011_v62 = vld [vmem:[%s6554_s22 + $0x454] ss:$8 sps:$4 sm:$0xff]  }
 0x196   : > { %2167 = vmatprep.subr.bf16.mxu1 %v5984_v39  ;;  %v7950_v39 = vld [vmem:[#allocation14_spill] sm:$0xff] }
 0x197   : > { %1849 = vmatmul.mubr.bf16.gmra.mrb[8].mxu1 %v6842_v10 }
 0x198   : > { %3409 = vmatmul.mubr.bf16.gmra.mrb[40].mxu0 %v7073_v5  ;;  %1858 = vmatprep.mubr.bf16.mxu1 %v7942_v56 }
 0x199   : > { %3418 = vmatprep.mubr.bf16.mxu0 %v7942_v56  ;;  %2168 = vmatpush1.bf16.msra.mxu1 %v5982_v40  ;;  %v6009_v40 = vld [vmem:[%s6554_s22 + $0x450] ss:$8 sps:$4 sm:$0xff]  }
 0x19a   : > { %2169 = vmatprep.subr.bf16.mxu1 %v5990_v35  ;;  %v6014_v35 = vld [vmem:[%s6554_s22 + $0x464] ss:$8 sps:$4 sm:$0xff]  }
 0x19d   : > { %2170 = vmatpush1.bf16.msra.mxu1 %v5988_v44  ;;  %v6012_v44 = vld [vmem:[%s6554_s22 + $0x460] ss:$8 sps:$4 sm:$0xff]  }
 0x19e   : > { %2171 = vmatprep.subr.bf16.mxu1 %v5996_v9  ;;  %v6017_v9 = vld [vmem:[%s6554_s22 + $0x474] ss:$8 sps:$4 sm:$0xff]  }
 0x19f   : > { %1859 = vmatmul.mubr.bf16.gmra.mrb[12].mxu1 %v6865_v50 }
 0x1a0   : > { %3419 = vmatmul.mubr.bf16.gmra.mrb[44].mxu0 %v7113_v53  ;;  %1868 = vmatprep.mubr.bf16.mxu1 %v7942_v56 }
 0x1a1   : > { %3428 = vmatprep.mubr.bf16.mxu0 %v7942_v56  ;;  %2172 = vmatpush1.bf16.msra.mxu1 %v5994_v31  ;;  %v7951_v31 = vld [vmem:[#allocation15_spill] sm:$0xff] }
 0x1a2   : > { %2173 = vmatprep.subr.bf16.mxu1 %v6002_v30  ;;  %v6015_v30 = vld [vmem:[%s6554_s22 + $0x470] ss:$8 sps:$4 sm:$0xff]  }
 0x1a5   : > { %2174 = vmatpush1.bf16.msra.mxu1 %v6000_v52  ;;  %v7952_v52 = vld [vmem:[#allocation16_spill] sm:$0xff] }
 0x1a6   : > { %5166 = vmatprep.subr.bf16.mxu1 %v6159_v4  ;;  %v7953_v4 = vld [vmem:[#allocation17_spill] sm:$0xff] }
 0x1a7   : > { %1869 = vmatmul.mubr.bf16.gmra.mrb[16].mxu1 %v7043_v51 }
 0x1a8   : > { %3429 = vmatmul.mubr.bf16.gmra.mrb[48].mxu0 %v7139_v59  ;;  %1878 = vmatprep.mubr.bf16.mxu1 %v7942_v56 }
 0x1a9   : > { %3438 = vmatprep.mubr.bf16.mxu0 %v7942_v56 }
 0x1af   : > { %1879 = vmatmul.mubr.bf16.gmra.mrb[20].mxu1 %v7947_v33 }
 0x1b0   : > { %3439 = vmatmul.mubr.bf16.gmra.mrb[52].mxu0 %v7156_v34  ;;  %1888 = vmatprep.mubr.bf16.mxu1 %v7942_v56 }
 0x1b1   : > { %3448 = vmatprep.mubr.bf16.mxu0 %v7942_v56 }
 0x1b7   : > { %1889 = vmatmul.mubr.bf16.gmra.mrb[24].mxu1 %v7117_v54 }
 0x1b8   : > { %3449 = vmatmul.mubr.bf16.gmra.mrb[56].mxu0 %v7415_v49  ;;  %1898 = vmatprep.mubr.bf16.mxu1 %v7942_v56 }
 0x1b9   : > { %3458 = vmatprep.mubr.bf16.mxu0 %v7942_v56 }
 0x1bf   : > { %1899 = vmatmul.mubr.bf16.gmra.mrb[28].mxu1 %v7143_v32 }
 0x1c0   : > { %3459 = vmatmul.mubr.bf16.gmra.mrb[60].mxu0 %v5041_v26  ;;  %1908 = vmatprep.mubr.bf16.mxu1 %v7942_v56  ;;  %v7954_v26 = vld [vmem:[#allocation18_spill] sm:$0xff] }
 0x1c1   : > { %3693 = vmatprep.mubr.bf16.mxu0 %v7942_v56 }
 0x1c7   : > { %1909 = vmatmul.mubr.bf16.gmra.mrb[32].mxu1 %v6972_v29 }
 0x1c8   : > { %3694 = vmatmul.mubr.bf16.vlgmr.msra.gmra.mrb[0].mxu0 %v7948_v46  ;;  %1918 = vmatprep.mubr.bf16.mxu1 %v7942_v56  ;;  %v6160_v46 = vld [vmem:[%s6554_s22 + $0x200] ss:$8 sps:$4 sm:$0xff]  }
 0x1c9   : > { %4031 = vmatpush1.bf16.msra.mxu0 %v5985_v37  ;;  %3703 = vmatprep.mubr.bf16.mxu0 %v7942_v56  ;;  %v7955_v37 = vld [vmem:[#allocation19_spill] sm:$0xff] }
 0x1ca   : > { %4032 = vmatprep.subr.bf16.mxu0 %v5993_v41  ;;  %v7956_v41 = vld [vmem:[#allocation20_spill] sm:$0xff] }
 0x1cd   : > { %4033 = vmatpush1.bf16.msra.mxu0 %v5991_v23  ;;  %v6161_v23 = vld [vmem:[%s6554_s22 + $0x214] ss:$8 sps:$4 sm:$0xff]  }
 0x1ce   : > { %4034 = vmatprep.subr.bf16.mxu0 %v5999_v57  ;;  %v6162_v57 = vld [vmem:[%s6554_s22 + $0x210] ss:$8 sps:$4 sm:$0xff]  }
 0x1cf   : > { %1919 = vmatmul.mubr.bf16.gmra.mrb[36].mxu1 %v7179_v14 }
 0x1d0   : > { %3704 = vmatmul.mubr.bf16.gmra.mrb[4].mxu0 %v7949_v42  ;;  %1928 = vmatprep.mubr.bf16.mxu1 %v7942_v56  ;;  %v6165_v42 = vld [vmem:[%s6554_s22 + $0x234] ss:$8 sps:$4 sm:$0xff]  }
 0x1d1   : > { %3713 = vmatprep.mubr.bf16.mxu0 %v7942_v56  ;;  %4035 = vmatpush1.bf16.msra.mxu0 %v5997_v48  ;;  %v6163_v48 = vld [vmem:[%s6554_s22 + $0x224] ss:$8 sps:$4 sm:$0xff]  }
 0x1d2   : > { %4036 = vmatprep.subr.bf16.mxu0 %v6005_v63  ;;  %v6164_v63 = vld [vmem:[%s6554_s22 + $0x220] ss:$8 sps:$4 sm:$0xff]  }
 0x1d5   : > { %4037 = vmatpush1.bf16.msra.mxu0 %v6003_v3  ;;  %v6166_v3 = vld [vmem:[%s6554_s22 + $0x230] ss:$8 sps:$4 sm:$0xff]  }
 0x1d6   : > { %4038 = vmatprep.subr.bf16.mxu0 %v6008_v2  ;;  %v6167_v2 = vld [vmem:[%s6554_s22 + $0x244] ss:$8 sps:$4 sm:$0xff]  }
 0x1d7   : > { %1929 = vmatmul.mubr.bf16.gmra.mrb[40].mxu1 %v7195_v45 }
 0x1d8   : > { %3714 = vmatmul.mubr.bf16.gmra.mrb[8].mxu0 %v7950_v39  ;;  %1938 = vmatprep.mubr.bf16.mxu1 %v7942_v56  ;;  %v6170_v39 = vld [vmem:[%s6554_s22 + $0x250] ss:$8 sps:$4 sm:$0xff]  }
 0x1d9   : > { %3723 = vmatprep.mubr.bf16.mxu0 %v7942_v56  ;;  %4039 = vmatpush1.bf16.msra.mxu0 %v6006_v6  ;;  %v6168_v6 = vld [vmem:[%s6554_s22 + $0x240] ss:$8 sps:$4 sm:$0xff]  }
 0x1da   : > { %4040 = vmatprep.subr.bf16.mxu0 %v6011_v62  ;;  %v6169_v62 = vld [vmem:[%s6554_s22 + $0x254] ss:$8 sps:$4 sm:$0xff]  }
 0x1dd   : > { %4041 = vmatpush1.bf16.msra.mxu0 %v6009_v40  ;;  %v6171_v40 = vld [vmem:[%s6554_s22 + $0x264] ss:$8 sps:$4 sm:$0xff]  }
 0x1de   : > { %4042 = vmatprep.subr.bf16.mxu0 %v6014_v35  ;;  %v2420_v35 = vshll.u32 %v7284_v24, 16 }
 0x1df   : > { %1939 = vmatmul.mubr.bf16.gmra.mrb[44].mxu1 %v7212_v47 }
 0x1e0   : > { %3724 = vmatmul.mubr.bf16.gmra.mrb[12].mxu0 %v7951_v31  ;;  %1948 = vmatprep.mubr.bf16.mxu1 %v7942_v56  ;;  %v6172_v31 = vld [vmem:[%s6554_s22 + $0x260] ss:$8 sps:$4 sm:$0xff]  }
 0x1e1   : > { %3733 = vmatprep.mubr.bf16.mxu0 %v7942_v56  ;;  %4043 = vmatpush1.bf16.msra.mxu0 %v6012_v44  ;;  %v2426_v44 = vshll.u32 %v7272_v13, 16 }
 0x1e2   : > { %4044 = vmatprep.subr.bf16.mxu0 %v6017_v9  ;;  %v2430_v9 = vshrl.u32 %v7272_v13, 16 }
 0x1e5   : > { %4045 = vmatpush1.bf16.msra.mxu0 %v6015_v30  ;;  %v6173_v30 = vld [vmem:[%s6554_s22 + $0x274] ss:$8 sps:$4 sm:$0xff]  }
 0x1e7   : > { %1949 = vmatmul.mubr.bf16.gmra.mrb[48].mxu1 %v7229_v16 }
 0x1e8   : > { %3734 = vmatmul.mubr.bf16.gmra.mrb[16].mxu0 %v7952_v52  ;;  %1958 = vmatprep.mubr.bf16.mxu1 %v7942_v56  ;;  %v2422_v52 = vrot.slane %v2420_v35, 5 }
 0x1e9   : > { %3743 = vmatprep.mubr.bf16.mxu0 %v7942_v56 }
 0x1ef   : > { %1959 = vmatmul.mubr.bf16.gmra.mrb[52].mxu1 %v7250_v21 }
 0x1f0   : > { %3744 = vmatmul.mubr.bf16.gmra.mrb[20].mxu0 %v7953_v4  ;;  %1968 = vmatprep.mubr.bf16.mxu1 %v7942_v56  ;;  %v2428_v4 = vrot.slane %v2426_v44, 5 }
 0x1f1   : > { %3753 = vmatprep.mubr.bf16.mxu0 %v7942_v56 }
 0x1f7   : > { %1969 = vmatmul.mubr.bf16.gmra.mrb[56].mxu1 %v7267_v17 }
 0x1f8   : > { %3754 = vmatmul.mubr.bf16.gmra.mrb[24].mxu0 %v7954_v26  ;;  %1978 = vmatprep.mubr.bf16.mxu1 %v7942_v56  ;;  %v2432_v26 = vrot.slane %v2430_v9, 4 }
 0x1f9   : > { %3763 = vmatprep.mubr.bf16.mxu0 %v7942_v56 }
 0x1fa   : > { %v2433_v13 = vor.u32 %v2432_v26, %v2428_v4 }
 0x1ff   : > { %1979 = vmatmul.mubr.bf16.gmra.mrb[60].mxu1 %v7293_v19 }
 0x200   : > { %3764 = vmatmul.mubr.bf16.gmra.mrb[28].mxu0 %v7955_v37  ;;  %2191 = vmatprep.mubr.bf16.mxu1 %v7942_v56 }
 0x201   : > { %3773 = vmatprep.mubr.bf16.mxu0 %v7942_v56 }
 0x207   : > { %2192 = vmatmul.mubr.bf16.vlgmr.msra.gmra.mrb[0].mxu1 %v6686_v43  ;;  %v7957_v43 = vld [vmem:[#allocation21_spill] sm:$0xff] }
 0x208   : > { %3774 = vmatmul.mubr.bf16.gmra.mrb[32].mxu0 %v7956_v41  ;;  %5174 = vmatpush1.bf16.msra.mxu1 %v6160_v46  ;;  %v6174_v46 = vld [vmem:[%s6554_s22 + $0x270] ss:$8 sps:$4 sm:$0xff]  }
 0x209   : > { %2201 = vmatprep.mubr.bf16.mxu1 %v7942_v56  ;;  %3783 = vmatprep.mubr.bf16.mxu0 %v7942_v56 }
 0x20a   : > { %5167 = vmatprep.subr.bf16.mxu1 %v6161_v23  ;;  %v2436_v23 = vshll.u32 %v7287_v11, 16  ;;  %v7524_v11 = vld [vmem:[%s6482_s19 + $0xd4] sm:$0x1]  ;;  %s4621_s19 = sshll.u32 %s6484_s9, 4  ;;  %s7832_s19 = int_to_ptr.vmem [resolvable:$true] %s4621_s19 }
 0x20b   : > { %s6213_s6 = scalar_lea.vmem %s7832_s19, 4096  ;;  %p6220_p10 = scmp.lt.s32.totalorder %s7832_s19, %s6218_s7 }
 0x20c   : > { %5175 = vmatpush1.bf16.msra.mxu1 %v6162_v57  ;;  %v3534_v57 = vshrl.u32 %v7422_v38, 16  ;;  %p6214_p3 = scmp.ne.s32.totalorder %s7832_s19, %s6213_s6  ;;  %p6221_p11 = scmp.lt.s32.totalorder %s6219_s10, %s6213_s6 }
 0x20d   : > { %5168 = vmatprep.subr.bf16.mxu1 %v6163_v48  ;;  %v3537_v48 = vshll.u32 %v7422_v38, 16 }
 0x20e   : > { %p6215_p8 = pnand %p6214_p3, %p7960_p5  ;;  %p6222_p0 = por %p6221_p11, %p6220_p10 }
 0x20f   : > { %2202 = vmatmul.mubr.bf16.gmra.mrb[4].mxu1 %v6715_v61  ;;  %v7958_v61 = vld [vmem:[#allocation22_spill] sm:$0xff] }
 0x210   : > { %3784 = vmatmul.mubr.bf16.gmra.mrb[36].mxu0 %v7957_v43  ;;  %2211 = vmatprep.mubr.bf16.mxu1 %v7942_v56  ;;  %p6216_p9 = pneg %p6215_p8 }
 0x211   : > { %3793 = vmatprep.mubr.bf16.mxu0 %v7942_v56  ;;  %5176 = vmatpush1.bf16.msra.mxu1 %v6164_v63  ;;  %v3547_v63 = vshrl.u32 %v7425_v28, 16 }
 0x212   : > { %5169 = vmatprep.subr.bf16.mxu1 %v6165_v42  ;;  %v3543_v42 = vshll.u32 %v7425_v28, 16  ;;  %p6223_p1 = pnand %p6222_p0, %p6216_p9 }
 0x215   : > { %5177 = vmatpush1.bf16.msra.mxu1 %v6166_v3  ;;  %v2434_v3 = vrot.slane %v2433_v13, 4 }
 0x216   : > { %5170 = vmatprep.subr.bf16.mxu1 %v6167_v2  ;;  %v2438_v2 = vrot.slane %v2436_v23, 5 }
 0x217   : > { %2212 = vmatmul.mubr.bf16.gmra.mrb[8].mxu1 %v6792_v8  ;;  %v2417_v8 = vshrl.u32 %v7284_v24, 16 }
 0x218   : > { %3794 = vmatmul.mubr.bf16.gmra.mrb[40].mxu0 %v7958_v61  ;;  %2221 = vmatprep.mubr.bf16.mxu1 %v7942_v56  ;;  %v2439_v35 = vsel %vm6594_vm2, %v2434_v3, %v2438_v2 }
 0x219   : > { %3803 = vmatprep.mubr.bf16.mxu0 %v7942_v56  ;;  %5178 = vmatpush1.bf16.msra.mxu1 %v6168_v6  ;;  %v3536_v6 = vrot.slane %v3534_v57, 4 }
 0x21a   : > { %5171 = vmatprep.subr.bf16.mxu1 %v6169_v62  ;;  %v3539_v62 = vrot.slane %v3537_v48, 5 }
 0x21c   : > { %v3540_v44 = vor.u32 %v3539_v62, %v3536_v6 }
 0x21d   : > { %5179 = vmatpush1.bf16.msra.mxu1 %v6170_v39  ;;  %v3545_v39 = vrot.slane %v3543_v42, 5 }
 0x21e   : > { %5172 = vmatprep.subr.bf16.mxu1 %v6171_v40  ;;  %v3549_v40 = vrot.slane %v3547_v63, 4 }
 0x21f   : > { %2222 = vmatmul.mubr.bf16.gmra.mrb[12].mxu1 %v7248_v7  ;;  %v2419_v7 = vrot.slane %v2417_v8, 4 }
 0x220   : > { %3804 = vmatmul.mubr.bf16.gmra.mrb[44].mxu0 %v7115_v0  ;;  %2231 = vmatprep.mubr.bf16.mxu1 %v7942_v56  ;;  %v3550_v9 = vor.u32 %v3549_v40, %v3545_v39 }
 0x221   : > { %3813 = vmatprep.mubr.bf16.mxu0 %v7942_v56  ;;  %5180 = vmatpush1.bf16.msra.mxu1 %v6172_v31  ;;  %v2423_v24 = vor.u32 %v2422_v52, %v2419_v7  ;;  %v3553_v31 = vshll.u32 %v7524_v11, 16  ;;  %v3541_v7 = vrot.slane %v3540_v44, 4 }
 0x222   : > { %5173 = vmatprep.subr.bf16.mxu1 %v6173_v30 }
 0x223   : > { %v3555_v52 = vrot.slane %v3553_v31, 5 }
 0x225   : > { %5181 = vmatpush1.bf16.msra.mxu1 %v6174_v46 }
 0x227   : > { %2232 = vmatmul.mubr.bf16.gmra.mrb[16].mxu1 %v7265_v55  ;;  %v2424_v55 = vrot.slane %v2423_v24, 4 }
 0x228   : > { %3814 = vmatmul.mubr.bf16.gmra.mrb[48].mxu0 %v7141_v1  ;;  %2241 = vmatprep.mubr.bf16.mxu1 %v7942_v56 }
 0x229   : > { %3823 = vmatprep.mubr.bf16.mxu0 %v7942_v56  ;;  %v2429_v8 = vsel %vm6594_vm2, %v2424_v55, %v2428_v4  ;;  %v3546_v4 = vsel %vm6594_vm2, %v3541_v7, %v3545_v39 }
 0x22a   : > { %v7535_v30 = vcombine.low %v2429_v8, %v2439_v35 }
 0x22f   : > { %2242 = vmatmul.mubr.bf16.gmra.mrb[20].mxu1 %v7291_v20  ;;  %v3551_v20 = vrot.slane %v3550_v9, 4 }
 0x230   : > { %3824 = vmatmul.mubr.bf16.gmra.mrb[52].mxu0 %v7158_v22  ;;  %2251 = vmatprep.mubr.bf16.mxu1 %v7942_v56 }
 0x231   : > { %3833 = vmatprep.mubr.bf16.mxu0 %v7942_v56  ;;  %v3556_v26 = vsel %vm6594_vm2, %v3551_v20, %v3555_v52 }
 0x232   : > { %v5075_v46 = vcombine.low %v3546_v4, %v3556_v26 }
 0x237   : > { %2252 = vmatmul.mubr.bf16.gmra.mrb[24].mxu1 %v7307_v36 }
 0x238   : > { %3834 = vmatmul.mubr.bf16.gmra.mrb[56].mxu0 %v7535_v30  ;;  %2261 = vmatprep.mubr.bf16.mxu1 %v7942_v56 }
 0x239   : > { %3843 = vmatprep.mubr.bf16.mxu0 %v7942_v56 }
 0x23f   : > { %2262 = vmatmul.mubr.bf16.gmra.mrb[28].mxu1 %v7317_v58 }
 0x240   : > { %3844 = vmatmul.mubr.bf16.gmra.mrb[60].mxu0 %v5075_v46  ;;  %2271 = vmatprep.mubr.bf16.mxu1 %v7942_v56 }
 0x241   : > { %4062 = vmatprep.mubr.bf16.mxu0 %v7942_v56 }
 0x247   : > { %2272 = vmatmul.mubr.bf16.gmra.mrb[32].mxu1 %v7035_v25 }
 0x248   : > { %4063 = vmatmul.mubr.bf16.vlgmr.msra.gmra.mrb[0].mxu0 %v6842_v10  ;;  %2281 = vmatprep.mubr.bf16.mxu1 %v7942_v56  ;;  %v5092_v10 = vrot.slane %v7422_v38, 9 }
 0x249   : > { %4072 = vmatprep.mubr.bf16.mxu0 %v7942_v56 }
 0x24a   : > { %v3922_v25 = vsel %vm6772_vm5, %v5092_v10, %v3921_v15 }
 0x24f   : > { %2282 = vmatmul.mubr.bf16.gmra.mrb[36].mxu1 %v7039_v12 }
 0x250   : > { %4073 = vmatmul.mubr.bf16.gmra.mrb[4].mxu0 %v6865_v50  ;;  %2291 = vmatprep.mubr.bf16.mxu1 %v7942_v56  ;;  %v3923_v50 = vrot.slane %v3921_v15, 4 }
 0x251   : > { %4082 = vmatprep.mubr.bf16.mxu0 %v7942_v56 }
 0x257   : > { %2292 = vmatmul.mubr.bf16.gmra.mrb[40].mxu1 %v7048_v18 }
 0x258   : > { %4083 = vmatmul.mubr.bf16.gmra.mrb[8].mxu0 %v7043_v51  ;;  %2301 = vmatprep.mubr.bf16.mxu1 %v7942_v56 }
 0x259   : > { %4092 = vmatprep.mubr.bf16.mxu0 %v7942_v56 }
 0x25f   : > { %2302 = vmatmul.mubr.bf16.gmra.mrb[44].mxu1 %v7073_v5 }
 0x260   : > { %4093 = vmatmul.mubr.bf16.gmra.mrb[12].mxu0 %v7947_v33  ;;  %2311 = vmatprep.mubr.bf16.mxu1 %v7942_v56 }
 0x261   : > { %4102 = vmatprep.mubr.bf16.mxu0 %v7942_v56 }
 0x267   : > { %2312 = vmatmul.mubr.bf16.gmra.mrb[48].mxu1 %v7113_v53 }
 0x268   : > { %4103 = vmatmul.mubr.bf16.gmra.mrb[16].mxu0 %v7117_v54  ;;  %2321 = vmatprep.mubr.bf16.mxu1 %v7942_v56 }
 0x269   : > { %4112 = vmatprep.mubr.bf16.mxu0 %v7942_v56 }
 0x26f   : > { %2322 = vmatmul.mubr.bf16.gmra.mrb[52].mxu1 %v7139_v59 }
 0x270   : > { %4113 = vmatmul.mubr.bf16.gmra.mrb[20].mxu0 %v7143_v32  ;;  %2331 = vmatprep.mubr.bf16.mxu1 %v7942_v56 }
 0x271   : > { %4122 = vmatprep.mubr.bf16.mxu0 %v7942_v56 }
 0x277   : > { %2332 = vmatmul.mubr.bf16.gmra.mrb[56].mxu1 %v7156_v34 }
 0x278   : > { %4123 = vmatmul.mubr.bf16.gmra.mrb[24].mxu0 %v6972_v29  ;;  %2341 = vmatprep.mubr.bf16.mxu1 %v7942_v56  ;;  %v3924_v29 = vrot.slane %v7524_v11, 5 }
 0x279   : > { %4132 = vmatprep.mubr.bf16.mxu0 %v7942_v56 }
 0x27a   : > { %v3925_v12 = vsel %vm6772_vm5, %v3923_v50, %v3924_v29 }
 0x27b   : > { %v5110_v51 = vcombine.low %v3922_v25, %v3925_v12 }
 0x27f   : > { %2342 = vmatmul.mubr.bf16.gmra.mrb[60].mxu1 %v7415_v49 }
 0x280   : > { %4133 = vmatmul.mubr.bf16.gmra.mrb[28].mxu0 %v7179_v14  ;;  %2656 = vmatprep.mubr.bf16.mxu1 %v7942_v56 }
 0x281   : > { %4142 = vmatprep.mubr.bf16.mxu0 %v7942_v56 }
 0x287   : > { %2657 = vmatmul.mubr.bf16.vlgmr.msra.gmra.mrb[32].mxu1 %v7955_v37 }
 0x288   : > { %4143 = vmatmul.mubr.bf16.gmra.mrb[32].mxu0 %v7195_v45  ;;  %2666 = vmatprep.mubr.bf16.mxu1 %v7942_v56 }
 0x289   : > { %4152 = vmatprep.mubr.bf16.mxu0 %v7942_v56 }
 0x28f   : > { %2667 = vmatmul.mubr.bf16.gmra.mrb[36].mxu1 %v7956_v41 }
 0x290   : > { %4153 = vmatmul.mubr.bf16.gmra.mrb[36].mxu0 %v7212_v47  ;;  %2676 = vmatprep.mubr.bf16.mxu1 %v7942_v56 }
 0x291   : > { %4162 = vmatprep.mubr.bf16.mxu0 %v7942_v56 }
 0x297   : > { %2677 = vmatmul.mubr.bf16.gmra.mrb[40].mxu1 %v7957_v43 }
 0x298   : > { %4163 = vmatmul.mubr.bf16.gmra.mrb[40].mxu0 %v7229_v16  ;;  %2686 = vmatprep.mubr.bf16.mxu1 %v7942_v56 }
 0x299   : > { %4172 = vmatprep.mubr.bf16.mxu0 %v7942_v56 }
 0x29f   : > { %2687 = vmatmul.mubr.bf16.gmra.mrb[44].mxu1 %v7958_v61 }
 0x2a0   : > { %4173 = vmatmul.mubr.bf16.gmra.mrb[44].mxu0 %v7250_v21  ;;  %2696 = vmatprep.mubr.bf16.mxu1 %v7942_v56 }
 0x2a1   : > { %4182 = vmatprep.mubr.bf16.mxu0 %v7942_v56 }
 0x2a7   : > { %2697 = vmatmul.mubr.bf16.gmra.mrb[48].mxu1 %v7115_v0 }
 0x2a8   : > { %4183 = vmatmul.mubr.bf16.gmra.mrb[48].mxu0 %v7267_v17  ;;  %2706 = vmatprep.mubr.bf16.mxu1 %v7942_v56 }
 0x2a9   : > { %4192 = vmatprep.mubr.bf16.mxu0 %v7942_v56 }
 0x2af   : > { %2707 = vmatmul.mubr.bf16.gmra.mrb[52].mxu1 %v7141_v1 }
 0x2b0   : > { %4193 = vmatmul.mubr.bf16.gmra.mrb[52].mxu0 %v7293_v19  ;;  %2716 = vmatprep.mubr.bf16.mxu1 %v7942_v56 }
 0x2b1   : > { %4202 = vmatprep.mubr.bf16.mxu0 %v7942_v56 }
 0x2b7   : > { %2717 = vmatmul.mubr.bf16.gmra.mrb[56].mxu1 %v7158_v22 }
 0x2b8   : > { %4203 = vmatmul.mubr.bf16.gmra.mrb[56].mxu0 %v7309_v27  ;;  %2726 = vmatprep.mubr.bf16.mxu1 %v7942_v56 }
 0x2b9   : > { %4212 = vmatprep.mubr.bf16.mxu0 %v7942_v56 }
 0x2bf   : > { %2727 = vmatmul.mubr.bf16.gmra.mrb[60].mxu1 %v7535_v30 }
 0x2c0   : > { %4213 = vmatmul.mubr.bf16.gmra.mrb[60].mxu0 %v5110_v51 }
 0x2da   : > { %v2193_v18 = vpop.f32.mrb[0].mxu1 }
 0x2db   : > { %v2195_v5 = vpop.f32.mrb[1].mxu1 }
 0x2dc   : > { %v2197_v53 = vpop.f32.mrb[2].mxu1 }
 0x2dd   : > { %v2199_v0 = vpop.f32.mrb[3].mxu1 }
 0x2e2   : > { %v2203_v54 = vpop.f32.mrb[4].mxu1 }
 0x2e3   : > { %v2205_v59 = vpop.f32.mrb[5].mxu1 }
 0x2e4   : > { %v2207_v1 = vpop.f32.mrb[6].mxu1 }
 0x2e5   : > { %v2209_v32 = vpop.f32.mrb[7].mxu1 }
 0x2ea   : > { %v2213_v34 = vpop.f32.mrb[8].mxu1 }
 0x2eb   : > { %v2215_v56 = vpop.f32.mrb[9].mxu1 }
 0x2ec   : > { %v2217_v22 = vpop.f32.mrb[10].mxu1 }
 0x2ed   : > { %v2219_v14 = vpop.f32.mrb[11].mxu1 }
 0x2f2   : > { %v7616_v45 = vpop.f32.mrb[12].mxu1 }
 0x2f3   : > { %v7618_v60 = vpop.f32.mrb[13].mxu1 }
 0x2f4   : > { %v7620_v47 = vpop.f32.mrb[14].mxu1 }
 0x2f5   : > { %v7622_v16 = vpop.f32.mrb[15].mxu1 }
 0x2fa   : > { %v7624_v21 = vpop.f32.mrb[16].mxu1 }
 0x2fb   : > { %v7626_v17 = vpop.f32.mrb[17].mxu1 }
 0x2fc   : > { %v7628_v19 = vpop.f32.mrb[18].mxu1 }
 0x2fd   : > { %v7630_v36 = vpop.f32.mrb[19].mxu1 }
 0x302   : > { %v7632_v27 = vpop.f32.mrb[20].mxu1 }
 0x303   : > { %v7634_v58 = vpop.f32.mrb[21].mxu1 }
 0x304   : > { %v7636_v33 = vpop.f32.mrb[22].mxu1 }
 0x305   : > { %v7638_v49 = vpop.f32.mrb[23].mxu1 }
 0x30a   : > { %v7640_v38 = vpop.f32.mrb[24].mxu1 }
 0x30b   : > { %v7642_v28 = vpop.f32.mrb[25].mxu1 }
 0x30c   : > { %v7644_v37 = vpop.f32.mrb[26].mxu1 }
 0x30d   : > { %v7646_v41 = vpop.f32.mrb[27].mxu1 }
 0x312   : > { %v7648_v43 = vpop.f32.mrb[28].mxu1 }
 0x313   : > { %v7650_v61 = vpop.f32.mrb[29].mxu1 }
 0x314   : > { %v7652_v24 = vpop.f32.mrb[30].mxu1 }
 0x315   : > { %v7654_v13 = vpop.f32.mrb[31].mxu1 }
 0x31b   : > { %v4064_v23 = vpop.f32.mrb[0].mxu0 }
 0x31c   : > { %v5182_v57 = vadd.f32 %v4064_v23, %v2193_v18  ;;  %v4066_v48 = vpop.f32.mrb[1].mxu0 }
 0x31d   : > { %v5183_v63 = vadd.f32 %v4066_v48, %v2195_v5  ;;  %v4068_v42 = vpop.f32.mrb[2].mxu0 }
 0x31e   : > { %v5184_v55 = vadd.f32 %v4068_v42, %v2197_v53  ;;  %v4070_v3 = vpop.f32.mrb[3].mxu0 }
 0x31f   : > { %v5127_v2 = vmul.f32 -1.442695, %v5183_v63  ;;  %v5185_v6 = vadd.f32 %v4070_v3, %v2199_v0  ;;  %v4479_v3 = vld [vmem:[%s6484_s9] sm:$0xff] }
 0x321   : > { %6018 = vpow2.f32 %v5127_v2  ;;  %v5128_v62 = vmul.f32 -1.442695, %v5185_v6 }
 0x323   : > { %6020 = vpow2.f32 %v5128_v62  ;;  %v4074_v39 = vpop.f32.mrb[4].mxu0  ;;  %v4480_v62 = vld [vmem:[%s6484_s9 + $0x8] sm:$0xff] }
 0x324   : > { %v7656_v40 = vadd.f32 %v4074_v39, %v2203_v54  ;;  %v4076_v11 = vpop.f32.mrb[5].mxu0 }
 0x325   : > { %v5187_v8 = vadd.f32 %v4076_v11, %v2205_v59  ;;  %v4078_v35 = vpop.f32.mrb[6].mxu0 }
 0x326   : > { %v7658_v44 = vadd.f32 %v4078_v35, %v2207_v1  ;;  %v4080_v9 = vpop.f32.mrb[7].mxu0 }
 0x327   : > { %v5129_v31 = vmul.f32 -1.442695, %v5187_v8  ;;  %v5189_v30 = vadd.f32 %v4080_v9, %v2209_v32 }
 0x329   : > { %6022 = vpow2.f32 %v5129_v31  ;;  %v5130_v7 = vmul.f32 -1.442695, %v5189_v30 }
 0x32b   : > { %v6019_v20 = vpop.eup %6018  ;;  %6024 = vpow2.f32 %v5130_v7  ;;  %v4084_v52 = vpop.f32.mrb[8].mxu0 }
 0x32c   : > { %v4383_v4 = vadd.f32 1.0, %v6019_v20  ;;  %v7660_v26 = vadd.f32 %v4084_v52, %v2213_v34  ;;  %v4086_v46 = vpop.f32.mrb[9].mxu0 }
 0x32d   : > { %v6021_v15 = vpop.eup %6020  ;;  %v5191_v10 = vadd.f32 %v4086_v46, %v2215_v56  ;;  %v4088_v50 = vpop.f32.mrb[10].mxu0  ;;  %v4481_v46 = vld [vmem:[%s6484_s9 + $0x10] sm:$0xff] }
 0x32e   : > { %6026 = vrcp.f32 %v4383_v4  ;;  %v4384_v29 = vadd.f32 1.0, %v6021_v15  ;;  %v7662_v25 = vadd.f32 %v4088_v50, %v2217_v22  ;;  %v4090_v12 = vpop.f32.mrb[11].mxu0  ;;  %v4482_v50 = vld [vmem:[%s6484_s9 + $0x18] sm:$0xff] }
 0x32f   : > { %v5131_v51 = vmul.f32 -1.442695, %v5191_v10  ;;  %v5193_v18 = vadd.f32 %v4090_v12, %v2219_v14 }
 0x330   : > { %6028 = vrcp.f32 %v4384_v29 }
 0x331   : > { %6030 = vpow2.f32 %v5131_v51  ;;  %v5132_v5 = vmul.f32 -1.442695, %v5193_v18 }
 0x333   : > { %v6023_v53 = vpop.eup %6022  ;;  %6032 = vpow2.f32 %v5132_v5  ;;  %v4094_v0 = vpop.f32.mrb[12].mxu0 }
 0x334   : > { %v4385_v54 = vadd.f32 1.0, %v6023_v53  ;;  %v7665_v59 = vadd.f32 %v4094_v0, %v7616_v45  ;;  %v4096_v1 = vpop.f32.mrb[13].mxu0 }
 0x335   : > { %v6025_v32 = vpop.eup %6024  ;;  %v5195_v34 = vadd.f32 %v4096_v1, %v7618_v60  ;;  %v4098_v56 = vpop.f32.mrb[14].mxu0 }
 0x336   : > { %6034 = vrcp.f32 %v4385_v54  ;;  %v4386_v22 = vadd.f32 1.0, %v6025_v32  ;;  %v7669_v14 = vadd.f32 %v4098_v56, %v7620_v47  ;;  %v4100_v23 = vpop.f32.mrb[15].mxu0 }
 0x337   : > { %v5133_v48 = vmul.f32 -1.442695, %v5195_v34  ;;  %v5197_v63 = vadd.f32 %v4100_v23, %v7622_v16 }
 0x338   : > { %v6027_v42 = vpop.eup %6026  ;;  %6036 = vrcp.f32 %v4386_v22  ;;  %v4483_v22 = vld [vmem:[%s6484_s9 + $0x20] sm:$0xff] }
 0x339   : > { %v4511_v45 = vmul.f32 %v6027_v42, %v5182_v57  ;;  %6038 = vpow2.f32 %v5133_v48  ;;  %v5134_v2 = vmul.f32 -1.442695, %v5197_v63  ;;  %v4484_v63 = vld [vmem:[%s6484_s9 + $0x28] sm:$0xff] }
 0x33a   : > { %v6029_v6 = vpop.eup %6028 }
 0x33b   : > { %v6031_v60 = vpop.eup %6030  ;;  %v4543_v39 = vadd.f32 %v4511_v45, %v4479_v3  ;;  %v4512_v11 = vmul.f32 %v6029_v6, %v5184_v55  ;;  %6040 = vpow2.f32 %v5134_v2  ;;  %v4104_v47 = vpop.f32.mrb[16].mxu0 }
 0x33c   : > { %v4387_v8 = vadd.f32 1.0, %v6031_v60  ;;  %v7675_v35 = vadd.f32 %v4104_v47, %v7624_v21  ;;  %v4106_v16 = vpop.f32.mrb[17].mxu0 }
 0x33d   : > { %v6033_v9 = vpop.eup %6032  ;;  %4575 = vst [vmem:[%s6484_s9] sm:$0xff] %v4543_v39  ;;  %v4544_v31 = vadd.f32 %v4512_v11, %v4480_v62  ;;  %v5199_v57 = vadd.f32 %v4106_v16, %v7626_v17  ;;  %v4108_v30 = vpop.f32.mrb[18].mxu0 }
 0x33e   : > { %6042 = vrcp.f32 %v4387_v8  ;;  %v4388_v7 = vadd.f32 1.0, %v6033_v9  ;;  %v7680_v20 = vadd.f32 %v4108_v30, %v7628_v19  ;;  %v4110_v55 = vpop.f32.mrb[19].mxu0  ;;  %v4485_v9 = vld [vmem:[%s6484_s9 + $0x30] sm:$0xff]  ;;  %v4486_v30 = vld [vmem:[%s6484_s9 + $0x38] sm:$0xff] }
 0x33f   : > { %4576 = vst [vmem:[%s6484_s9 + $0x8] sm:$0xff] %v4544_v31  ;;  %v5135_v52 = vmul.f32 -1.442695, %v5199_v57  ;;  %v5201_v4 = vadd.f32 %v4110_v55, %v7630_v36 }
 0x340   : > { %v6035_v21 = vpop.eup %6034  ;;  %6044 = vrcp.f32 %v4388_v7 }
 0x341   : > { %v4513_v15 = vmul.f32 %v6035_v21, %v7656_v40  ;;  %6046 = vpow2.f32 %v5135_v52  ;;  %v5136_v17 = vmul.f32 -1.442695, %v5201_v4 }
 0x342   : > { %v6037_v10 = vpop.eup %6036 }
 0x343   : > { %v6039_v29 = vpop.eup %6038  ;;  %v4545_v12 = vadd.f32 %v4513_v15, %v4481_v46  ;;  %v4514_v19 = vmul.f32 %v6037_v10, %v7658_v44  ;;  %6048 = vpow2.f32 %v5136_v17  ;;  %v4114_v51 = vpop.f32.mrb[20].mxu0 }
 0x344   : > { %v4389_v18 = vadd.f32 1.0, %v6039_v29  ;;  %v7689_v36 = vadd.f32 %v4114_v51, %v7632_v27  ;;  %v4116_v5 = vpop.f32.mrb[21].mxu0 }
 0x345   : > { %v6041_v53 = vpop.eup %6040  ;;  %4577 = vst [vmem:[%s6484_s9 + $0x10] sm:$0xff] %v4545_v12  ;;  %v4546_v40 = vadd.f32 %v4514_v19, %v4482_v50  ;;  %v5203_v0 = vadd.f32 %v4116_v5, %v7634_v58  ;;  %v4118_v54 = vpop.f32.mrb[22].mxu0  ;;  %v4487_v19 = vld [vmem:[%s6484_s9 + $0x40] sm:$0xff]  ;;  %v4488_v5 = vld [vmem:[%s6484_s9 + $0x48] sm:$0xff] }
 0x346   : > { %6050 = vrcp.f32 %v4389_v18  ;;  %v4390_v1 = vadd.f32 1.0, %v6041_v53  ;;  %v7694_v32 = vadd.f32 %v4118_v54, %v7636_v33  ;;  %v4120_v44 = vpop.f32.mrb[23].mxu0 }
 0x347   : > { %4578 = vst [vmem:[%s6484_s9 + $0x18] sm:$0xff] %v4546_v40  ;;  %v5137_v34 = vmul.f32 -1.442695, %v5203_v0  ;;  %v5205_v56 = vadd.f32 %v4120_v44, %v7638_v49 }
 0x348   : > { %v6043_v27 = vpop.eup %6042  ;;  %6052 = vrcp.f32 %v4390_v1 }
 0x349   : > { %v4515_v23 = vmul.f32 %v6043_v27, %v7660_v26  ;;  %6054 = vpow2.f32 %v5137_v34  ;;  %v5138_v58 = vmul.f32 -1.442695, %v5205_v56 }
 0x34a   : > { %v6045_v48 = vpop.eup %6044 }
 0x34b   : > { %v6047_v42 = vpop.eup %6046  ;;  %v4547_v3 = vadd.f32 %v4515_v23, %v4483_v22  ;;  %v4516_v33 = vmul.f32 %v6045_v48, %v7662_v25  ;;  %6056 = vpow2.f32 %v5138_v58  ;;  %v4124_v45 = vpop.f32.mrb[24].mxu0 }
 0x34c   : > { %v4391_v2 = vadd.f32 1.0, %v6047_v42  ;;  %v7703_v49 = vadd.f32 %v4124_v45, %v7640_v38  ;;  %v4126_v6 = vpop.f32.mrb[25].mxu0  ;;  %v4489_v45 = vld [vmem:[%s6484_s9 + $0x50] sm:$0xff] }
 0x34d   : > { %v6049_v62 = vpop.eup %6048  ;;  %4579 = vst [vmem:[%s6484_s9 + $0x20] sm:$0xff] %v4547_v3  ;;  %v4548_v26 = vadd.f32 %v4516_v33, %v4484_v63  ;;  %v5207_v60 = vadd.f32 %v4126_v6, %v7642_v28  ;;  %v4128_v39 = vpop.f32.mrb[26].mxu0 }
 0x34e   : > { %6058 = vrcp.f32 %v4391_v2  ;;  %v4392_v11 = vadd.f32 1.0, %v6049_v62  ;;  %v7708_v47 = vadd.f32 %v4128_v39, %v7644_v37  ;;  %v4130_v25 = vpop.f32.mrb[27].mxu0 }
 0x34f   : > { %4580 = vst [vmem:[%s6484_s9 + $0x28] sm:$0xff] %v4548_v26  ;;  %v5139_v8 = vmul.f32 -1.442695, %v5207_v60  ;;  %v5209_v16 = vadd.f32 %v4130_v25, %v7646_v41  ;;  %v4490_v26 = vld [vmem:[%s6484_s9 + $0x58] sm:$0xff] }
 0x350   : > { %v6051_v38 = vpop.eup %6050  ;;  %6060 = vrcp.f32 %v4392_v11 }
 0x351   : > { %v4517_v31 = vmul.f32 %v6051_v38, %v7665_v59  ;;  %6062 = vpow2.f32 %v5139_v8  ;;  %v5140_v28 = vmul.f32 -1.442695, %v5209_v16 }
 0x352   : > { %v6053_v57 = vpop.eup %6052 }
 0x353   : > { %v6055_v7 = vpop.eup %6054  ;;  %v4549_v55 = vadd.f32 %v4517_v31, %v4485_v9  ;;  %v4518_v37 = vmul.f32 %v6053_v57, %v7669_v14  ;;  %6064 = vpow2.f32 %v5140_v28  ;;  %v4134_v52 = vpop.f32.mrb[28].mxu0 }
 0x354   : > { %v4393_v4 = vadd.f32 1.0, %v6055_v7  ;;  %v7717_v41 = vadd.f32 %v4134_v52, %v7648_v43  ;;  %v4136_v21 = vpop.f32.mrb[29].mxu0 }
 0x355   : > { %v6057_v46 = vpop.eup %6056  ;;  %4581 = vst [vmem:[%s6484_s9 + $0x30] sm:$0xff] %v4549_v55  ;;  %v4550_v59 = vadd.f32 %v4518_v37, %v4486_v30  ;;  %v5211_v15 = vadd.f32 %v4136_v21, %v7650_v61  ;;  %v4138_v17 = vpop.f32.mrb[30].mxu0 }
 0x356   : > { %6066 = vrcp.f32 %v4393_v4  ;;  %v4394_v10 = vadd.f32 1.0, %v6057_v46  ;;  %v7722_v50 = vadd.f32 %v4138_v17, %v7652_v24  ;;  %v4140_v14 = vpop.f32.mrb[31].mxu0 }
 0x357   : > { %4582 = vst [vmem:[%s6484_s9 + $0x38] sm:$0xff] %v4550_v59  ;;  %v5141_v29 = vmul.f32 -1.442695, %v5211_v15  ;;  %v5213_v12 = vadd.f32 %v4140_v14, %v7654_v13  ;;  %v4491_v59 = vld [vmem:[%s6484_s9 + $0x60] sm:$0xff]  ;;  %v4492_v14 = vld [vmem:[%s6484_s9 + $0x68] sm:$0xff] }
 0x358   : > { %v6059_v43 = vpop.eup %6058  ;;  %6068 = vrcp.f32 %v4394_v10 }
 0x359   : > { %v4519_v51 = vmul.f32 %v6059_v43, %v7675_v35  ;;  %6070 = vpow2.f32 %v5141_v29  ;;  %v5142_v61 = vmul.f32 -1.442695, %v5213_v12 }
 0x35a   : > { %v6061_v18 = vpop.eup %6060  ;;  %v2658_v0 = vpop.f32.mrb[32].mxu1 }
 0x35b   : > { %v6063_v53 = vpop.eup %6062  ;;  %v4551_v40 = vadd.f32 %v4519_v51, %v4487_v19  ;;  %v4520_v24 = vmul.f32 %v6061_v18, %v7680_v20  ;;  %6072 = vpow2.f32 %v5142_v61  ;;  %v4144_v54 = vpop.f32.mrb[32].mxu0 }
 0x35c   : > { %v4395_v1 = vadd.f32 1.0, %v6063_v53  ;;  %v7730_v13 = vadd.f32 %v4144_v54, %v2658_v0  ;;  %v2660_v44 = vpop.f32.mrb[33].mxu1  ;;  %v4146_v34 = vpop.f32.mrb[33].mxu0 }
 0x35d   : > { %v6065_v35 = vpop.eup %6064  ;;  %4583 = vst [vmem:[%s6484_s9 + $0x40] sm:$0xff] %v4551_v40  ;;  %v4552_v56 = vadd.f32 %v4520_v24, %v4488_v5  ;;  %v5215_v27 = vadd.f32 %v4146_v34, %v2660_v44  ;;  %v2662_v22 = vpop.f32.mrb[34].mxu1 }
 0x35e   : > { %v4148_v23 = vpop.f32.mrb[34].mxu0  ;;  %6074 = vrcp.f32 %v4395_v1  ;;  %v4396_v58 = vadd.f32 1.0, %v6065_v35  ;;  %v2664_v48 = vpop.f32.mrb[35].mxu1 }
 0x35f   : > { %v7733_v20 = vadd.f32 %v4148_v23, %v2662_v22  ;;  %v4150_v63 = vpop.f32.mrb[35].mxu0  ;;  %4584 = vst [vmem:[%s6484_s9 + $0x48] sm:$0xff] %v4552_v56  ;;  %v5143_v42 = vmul.f32 -1.442695, %v5215_v27  ;;  %v4493_v22 = vld [vmem:[%s6484_s9 + $0x70] sm:$0xff] }
 0x360   : > { %v5217_v3 = vadd.f32 %v4150_v63, %v2664_v48  ;;  %v6067_v33 = vpop.eup %6066  ;;  %6076 = vrcp.f32 %v4396_v58  ;;  %v4494_v63 = vld [vmem:[%s6484_s9 + $0x78] sm:$0xff] }
 0x361   : > { %v4521_v2 = vmul.f32 %v6067_v33, %v7689_v36  ;;  %6078 = vpow2.f32 %v5143_v42 }
 0x362   : > { %v5144_v6 = vmul.f32 -1.442695, %v5217_v3  ;;  %v6069_v62 = vpop.eup %6068  ;;  %v2668_v25 = vpop.f32.mrb[36].mxu1 }
 0x363   : > { %v6071_v60 = vpop.eup %6070  ;;  %v4553_v39 = vadd.f32 %v4521_v2, %v4489_v45  ;;  %v4522_v11 = vmul.f32 %v6069_v62, %v7694_v32  ;;  %v4154_v8 = vpop.f32.mrb[36].mxu0 }
 0x364   : > { %6080 = vpow2.f32 %v5144_v6  ;;  %v4397_v16 = vadd.f32 1.0, %v6071_v60  ;;  %v7740_v38 = vadd.f32 %v4154_v8, %v2668_v25  ;;  %v2670_v9 = vpop.f32.mrb[37].mxu1  ;;  %v4156_v31 = vpop.f32.mrb[37].mxu0 }
 0x365   : > { %v6073_v36 = vpop.eup %6072  ;;  %4585 = vst [vmem:[%s6484_s9 + $0x50] sm:$0xff] %v4553_v39  ;;  %v4554_v28 = vadd.f32 %v4522_v11, %v4490_v26  ;;  %v5219_v57 = vadd.f32 %v4156_v31, %v2670_v9  ;;  %v2672_v30 = vpop.f32.mrb[38].mxu1 }
 0x366   : > { %v4158_v7 = vpop.f32.mrb[38].mxu0  ;;  %6082 = vrcp.f32 %v4397_v16  ;;  %v4398_v55 = vadd.f32 1.0, %v6073_v36  ;;  %v2674_v37 = vpop.f32.mrb[39].mxu1 }
 0x367   : > { %v7743_v32 = vadd.f32 %v4158_v7, %v2672_v30  ;;  %v4160_v52 = vpop.f32.mrb[39].mxu0  ;;  %4586 = vst [vmem:[%s6484_s9 + $0x58] sm:$0xff] %v4554_v28  ;;  %v5145_v4 = vmul.f32 -1.442695, %v5219_v57  ;;  %v4495_v30 = vld [vmem:[%s6484_s9 + $0x80] sm:$0xff] }
 0x368   : > { %v5221_v21 = vadd.f32 %v4160_v52, %v2674_v37  ;;  %v6075_v46 = vpop.eup %6074  ;;  %6084 = vrcp.f32 %v4398_v55  ;;  %v4496_v52 = vld [vmem:[%s6484_s9 + $0x88] sm:$0xff] }
 0x369   : > { %v4523_v15 = vmul.f32 %v6075_v46, %v7703_v49  ;;  %6086 = vpow2.f32 %v5145_v4 }
 0x36a   : > { %v5146_v17 = vmul.f32 -1.442695, %v5221_v21  ;;  %v6077_v10 = vpop.eup %6076  ;;  %v2678_v19 = vpop.f32.mrb[40].mxu1 }
 0x36b   : > { %v6079_v29 = vpop.eup %6078  ;;  %v4555_v12 = vadd.f32 %v4523_v15, %v4491_v59  ;;  %v4524_v43 = vmul.f32 %v6077_v10, %v7708_v47  ;;  %v4164_v51 = vpop.f32.mrb[40].mxu0 }
 0x36c   : > { %6088 = vpow2.f32 %v5146_v17  ;;  %v4399_v61 = vadd.f32 1.0, %v6079_v29  ;;  %v7750_v18 = vadd.f32 %v4164_v51, %v2678_v19  ;;  %v2680_v5 = vpop.f32.mrb[41].mxu1  ;;  %v4166_v53 = vpop.f32.mrb[41].mxu0 }
 0x36d   : > { %4587 = vst [vmem:[%s6484_s9 + $0x60] sm:$0xff] %v4555_v12  ;;  %v4556_v40 = vadd.f32 %v4524_v43, %v4492_v14  ;;  %v5223_v24 = vadd.f32 %v4166_v53, %v2680_v5  ;;  %v2682_v0 = vpop.f32.mrb[42].mxu1  ;;  %v4168_v54 = vpop.f32.mrb[42].mxu0 }
 0x36e   : > { %v6081_v49 = vpop.eup %6080  ;;  %6090 = vrcp.f32 %v4399_v61  ;;  %v7753_v47 = vadd.f32 %v4168_v54, %v2682_v0  ;;  %v2684_v44 = vpop.f32.mrb[43].mxu1  ;;  %v4497_v0 = vld [vmem:[%s6484_s9 + $0x90] sm:$0xff] }
 0x36f   : > { %v4400_v1 = vadd.f32 1.0, %v6081_v49  ;;  %v4170_v34 = vpop.f32.mrb[43].mxu0  ;;  %4588 = vst [vmem:[%s6484_s9 + $0x68] sm:$0xff] %v4556_v40  ;;  %v5147_v35 = vmul.f32 -1.442695, %v5223_v24 }
 0x370   : > { %v5225_v56 = vadd.f32 %v4170_v34, %v2684_v44  ;;  %v6083_v27 = vpop.eup %6082  ;;  %v4498_v34 = vld [vmem:[%s6484_s9 + $0x98] sm:$0xff] }
 0x371   : > { %6092 = vrcp.f32 %v4400_v1  ;;  %v4525_v23 = vmul.f32 %v6083_v27, %v7717_v41 }
 0x372   : > { %6094 = vpow2.f32 %v5147_v35  ;;  %v5148_v58 = vmul.f32 -1.442695, %v5225_v56  ;;  %v6085_v48 = vpop.eup %6084  ;;  %v2688_v45 = vpop.f32.mrb[44].mxu1 }
 0x373   : > { %v6087_v42 = vpop.eup %6086  ;;  %v4557_v3 = vadd.f32 %v4525_v23, %v4493_v22  ;;  %v4526_v33 = vmul.f32 %v6085_v48, %v7722_v50  ;;  %v4174_v2 = vpop.f32.mrb[44].mxu0 }
 0x374   : > { %6096 = vpow2.f32 %v5148_v58  ;;  %v4401_v6 = vadd.f32 1.0, %v6087_v42  ;;  %v7760_v62 = vadd.f32 %v4174_v2, %v2688_v45  ;;  %v2690_v26 = vpop.f32.mrb[45].mxu1  ;;  %v4176_v60 = vpop.f32.mrb[45].mxu0 }
 0x375   : > { %4589 = vst [vmem:[%s6484_s9 + $0x70] sm:$0xff] %v4557_v3  ;;  %v4558_v39 = vadd.f32 %v4526_v33, %v4494_v63  ;;  %v5227_v11 = vadd.f32 %v4176_v60, %v2690_v26  ;;  %v2692_v25 = vpop.f32.mrb[46].mxu1  ;;  %v4178_v8 = vpop.f32.mrb[46].mxu0 }
 0x376   : > { %v6089_v41 = vpop.eup %6088  ;;  %6098 = vrcp.f32 %v4401_v6  ;;  %v7763_v50 = vadd.f32 %v4178_v8, %v2692_v25  ;;  %v2694_v9 = vpop.f32.mrb[47].mxu1  ;;  %v4499_v25 = vld [vmem:[%s6484_s9 + $0xa0] sm:$0xff] }
 0x377   : > { %v4402_v16 = vadd.f32 1.0, %v6089_v41  ;;  %v4180_v31 = vpop.f32.mrb[47].mxu0  ;;  %4590 = vst [vmem:[%s6484_s9 + $0x78] sm:$0xff] %v4558_v39  ;;  %v5149_v36 = vmul.f32 -1.442695, %v5227_v11 }
 0x378   : > { %v5229_v28 = vadd.f32 %v4180_v31, %v2694_v9  ;;  %v6091_v57 = vpop.eup %6090  ;;  %v4500_v31 = vld [vmem:[%s6484_s9 + $0xa8] sm:$0xff] }
 0x379   : > { %6100 = vrcp.f32 %v4402_v16  ;;  %v4527_v7 = vmul.f32 %v6091_v57, %v7730_v13 }
 0x37a   : > { %6102 = vpow2.f32 %v5149_v36  ;;  %v5150_v55 = vmul.f32 -1.442695, %v5229_v28  ;;  %v2698_v59 = vpop.f32.mrb[48].mxu1 }
 0x37b   : > { %v6093_v37 = vpop.eup %6092  ;;  %v4559_v21 = vadd.f32 %v4527_v7, %v4495_v30  ;;  %v4184_v15 = vpop.f32.mrb[48].mxu0 }
 0x37c   : > { %v6095_v4 = vpop.eup %6094  ;;  %v4528_v46 = vmul.f32 %v6093_v37, %v7733_v20  ;;  %6104 = vpow2.f32 %v5150_v55  ;;  %v7770_v10 = vadd.f32 %v4184_v15, %v2698_v59  ;;  %v2700_v14 = vpop.f32.mrb[49].mxu1 }
 0x37d   : > { %v4403_v17 = vadd.f32 1.0, %v6095_v4  ;;  %v4186_v29 = vpop.f32.mrb[49].mxu0  ;;  %4591 = vst [vmem:[%s6484_s9 + $0x80] sm:$0xff] %v4559_v21  ;;  %v2702_v19 = vpop.f32.mrb[50].mxu1 }
 0x37e   : > { %v6097_v13 = vpop.eup %6096  ;;  %v4560_v12 = vadd.f32 %v4528_v46, %v4496_v52  ;;  %v5231_v43 = vadd.f32 %v4186_v29, %v2700_v14  ;;  %v4188_v51 = vpop.f32.mrb[50].mxu0 }
 0x37f   : > { %6106 = vrcp.f32 %v4403_v17  ;;  %v4404_v61 = vadd.f32 1.0, %v6097_v13  ;;  %v7773_v20 = vadd.f32 %v4188_v51, %v2702_v19  ;;  %v2704_v5 = vpop.f32.mrb[51].mxu1  ;;  %v4190_v53 = vpop.f32.mrb[51].mxu0  ;;  %v4501_v19 = vld [vmem:[%s6484_s9 + $0xb0] sm:$0xff] }
 0x380   : > { %4592 = vst [vmem:[%s6484_s9 + $0x88] sm:$0xff] %v4560_v12  ;;  %v5151_v49 = vmul.f32 -1.442695, %v5231_v43  ;;  %v5233_v40 = vadd.f32 %v4190_v53, %v2704_v5  ;;  %v6099_v24 = vpop.eup %6098  ;;  %v4502_v53 = vld [vmem:[%s6484_s9 + $0xb8] sm:$0xff] }
 0x381   : > { %6108 = vrcp.f32 %v4404_v61  ;;  %v4529_v54 = vmul.f32 %v6099_v24, %v7740_v38 }
 0x382   : > { %6110 = vpow2.f32 %v5151_v49  ;;  %v5152_v1 = vmul.f32 -1.442695, %v5233_v40  ;;  %v2708_v22 = vpop.f32.mrb[52].mxu1 }
 0x383   : > { %v6101_v44 = vpop.eup %6100  ;;  %v4561_v56 = vadd.f32 %v4529_v54, %v4497_v0  ;;  %v4194_v23 = vpop.f32.mrb[52].mxu0 }
 0x384   : > { %v6103_v35 = vpop.eup %6102  ;;  %v4530_v27 = vmul.f32 %v6101_v44, %v7743_v32  ;;  %6112 = vpow2.f32 %v5152_v1  ;;  %v7780_v48 = vadd.f32 %v4194_v23, %v2708_v22  ;;  %v2710_v63 = vpop.f32.mrb[53].mxu1 }
 0x385   : > { %v4405_v58 = vadd.f32 1.0, %v6103_v35  ;;  %v4196_v42 = vpop.f32.mrb[53].mxu0  ;;  %4593 = vst [vmem:[%s6484_s9 + $0x90] sm:$0xff] %v4561_v56  ;;  %v2712_v45 = vpop.f32.mrb[54].mxu1 }
 0x386   : > { %v6105_v38 = vpop.eup %6104  ;;  %v4562_v3 = vadd.f32 %v4530_v27, %v4498_v34  ;;  %v5235_v33 = vadd.f32 %v4196_v42, %v2710_v63  ;;  %v4198_v2 = vpop.f32.mrb[54].mxu0 }
 0x387   : > { %6114 = vrcp.f32 %v4405_v58  ;;  %v4406_v6 = vadd.f32 1.0, %v6105_v38  ;;  %v7783_v32 = vadd.f32 %v4198_v2, %v2712_v45  ;;  %v2714_v26 = vpop.f32.mrb[55].mxu1  ;;  %v4200_v60 = vpop.f32.mrb[55].mxu0  ;;  %v4503_v45 = vld [vmem:[%s6484_s9 + $0xc0] sm:$0xff] }
 0x388   : > { %4594 = vst [vmem:[%s6484_s9 + $0x98] sm:$0xff] %v4562_v3  ;;  %v5153_v41 = vmul.f32 -1.442695, %v5235_v33  ;;  %v5237_v39 = vadd.f32 %v4200_v60, %v2714_v26  ;;  %v4504_v60 = vld [vmem:[%s6484_s9 + $0xc8] sm:$0xff] }
 0x389   : > { %v6107_v11 = vpop.eup %6106  ;;  %6116 = vrcp.f32 %v4406_v6 }
 0x38a   : > { %v4531_v8 = vmul.f32 %v6107_v11, %v7750_v18  ;;  %6118 = vpow2.f32 %v5153_v41  ;;  %v5154_v16 = vmul.f32 -1.442695, %v5237_v39  ;;  %v2718_v30 = vpop.f32.mrb[56].mxu1 }
 0x38b   : > { %v6109_v9 = vpop.eup %6108  ;;  %v4204_v7 = vpop.f32.mrb[56].mxu0 }
 0x38c   : > { %v6111_v36 = vpop.eup %6110  ;;  %v4563_v28 = vadd.f32 %v4531_v8, %v4499_v25  ;;  %v4532_v57 = vmul.f32 %v6109_v9, %v7753_v47  ;;  %6120 = vpow2.f32 %v5154_v16  ;;  %v7790_v37 = vadd.f32 %v4204_v7, %v2718_v30  ;;  %v2720_v52 = vpop.f32.mrb[57].mxu1 }
 0x38d   : > { %v4407_v55 = vadd.f32 1.0, %v6111_v36  ;;  %v4206_v4 = vpop.f32.mrb[57].mxu0  ;;  %v2722_v59 = vpop.f32.mrb[58].mxu1 }
 0x38e   : > { %v6113_v18 = vpop.eup %6112  ;;  %4595 = vst [vmem:[%s6484_s9 + $0xa0] sm:$0xff] %v4563_v28  ;;  %v4564_v21 = vadd.f32 %v4532_v57, %v4500_v31  ;;  %v5239_v46 = vadd.f32 %v4206_v4, %v2720_v52  ;;  %v4208_v15 = vpop.f32.mrb[58].mxu0  ;;  %v4505_v31 = vld [vmem:[%s6484_s9 + $0xd0] sm:$0xff]  ;;  %v4506_v57 = vld [vmem:[%s6484_s9 + $0xd8] sm:$0xff] }
 0x38f   : > { %6122 = vrcp.f32 %v4407_v55  ;;  %v4408_v17 = vadd.f32 1.0, %v6113_v18  ;;  %v7793_v47 = vadd.f32 %v4208_v15, %v2722_v59  ;;  %v2724_v14 = vpop.f32.mrb[59].mxu1  ;;  %v4210_v29 = vpop.f32.mrb[59].mxu0 }
 0x390   : > { %4596 = vst [vmem:[%s6484_s9 + $0xa8] sm:$0xff] %v4564_v21  ;;  %v5155_v13 = vmul.f32 -1.442695, %v5239_v46  ;;  %v5241_v12 = vadd.f32 %v4210_v29, %v2724_v14  ;;  %v4507_v21 = vld [vmem:[%s6484_s9 + $0xe0] sm:$0xff] }
 0x391   : > { %v6115_v43 = vpop.eup %6114  ;;  %6124 = vrcp.f32 %v4408_v17 }
 0x392   : > { %v4533_v51 = vmul.f32 %v6115_v43, %v7760_v62  ;;  %6126 = vpow2.f32 %v5155_v13  ;;  %v5156_v61 = vmul.f32 -1.442695, %v5241_v12  ;;  %v2728_v0 = vpop.f32.mrb[60].mxu1  ;;  %v4509_v13 = vld [vmem:[%s6484_s9 + $0xf0] sm:$0xff] }
 0x393   : > { %v6117_v5 = vpop.eup %6116  ;;  %v4214_v54 = vpop.f32.mrb[60].mxu0 }
 0x394   : > { %v6119_v49 = vpop.eup %6118  ;;  %v4565_v40 = vadd.f32 %v4533_v51, %v4501_v19  ;;  %v4534_v24 = vmul.f32 %v6117_v5, %v7763_v50  ;;  %6128 = vpow2.f32 %v5156_v61  ;;  %v7800_v44 = vadd.f32 %v4214_v54, %v2728_v0  ;;  %v2730_v34 = vpop.f32.mrb[61].mxu1 }
 0x395   : > { %v4409_v1 = vadd.f32 1.0, %v6119_v49  ;;  %v4216_v35 = vpop.f32.mrb[61].mxu0  ;;  %v2732_v22 = vpop.f32.mrb[62].mxu1 }
 0x396   : > { %v6121_v62 = vpop.eup %6120  ;;  %4597 = vst [vmem:[%s6484_s9 + $0xb0] sm:$0xff] %v4565_v40  ;;  %v4566_v56 = vadd.f32 %v4534_v24, %v4502_v53  ;;  %v5243_v27 = vadd.f32 %v4216_v35, %v2730_v34  ;;  %v4218_v23 = vpop.f32.mrb[62].mxu0 }
 0x397   : > { %6130 = vrcp.f32 %v4409_v1  ;;  %v4410_v58 = vadd.f32 1.0, %v6121_v62  ;;  %v5244_v50 = vadd.f32 %v4218_v23, %v2732_v22  ;;  %v2734_v63 = vpop.f32.mrb[63].mxu1  ;;  %v4220_v42 = vpop.f32.mrb[63].mxu0 }
 0x398   : > { %4598 = vst [vmem:[%s6484_s9 + $0xb8] sm:$0xff] %v4566_v56  ;;  %v5157_v38 = vmul.f32 -1.442695, %v5243_v27  ;;  %v5245_v3 = vadd.f32 %v4220_v42, %v2734_v63 }
 0x399   : > { %v6123_v33 = vpop.eup %6122  ;;  %6132 = vrcp.f32 %v4410_v58 }
 0x39a   : > { %v4535_v2 = vmul.f32 %v6123_v33, %v7770_v10  ;;  %6134 = vpow2.f32 %v5157_v38  ;;  %v5158_v6 = vmul.f32 -1.442695, %v5245_v3 }
 0x39b   : > { %v6125_v26 = vpop.eup %6124 }
 0x39c   : > { %v6127_v41 = vpop.eup %6126  ;;  %v4567_v39 = vadd.f32 %v4535_v2, %v4503_v45  ;;  %v4536_v11 = vmul.f32 %v6125_v26, %v7773_v20  ;;  %6136 = vpow2.f32 %v5158_v6 }
 0x39d   : > { %v4411_v25 = vadd.f32 1.0, %v6127_v41 }
 0x39e   : > { %v6129_v8 = vpop.eup %6128  ;;  %4599 = vst [vmem:[%s6484_s9 + $0xc0] sm:$0xff] %v4567_v39  ;;  %v4568_v16 = vadd.f32 %v4536_v11, %v4504_v60 }
 0x39f   : > { %6138 = vrcp.f32 %v4411_v25  ;;  %v4412_v9 = vadd.f32 1.0, %v6129_v8 }
 0x3a0   : > { %4600 = vst [vmem:[%s6484_s9 + $0xc8] sm:$0xff] %v4568_v16 }
 0x3a1   : > { %v6131_v10 = vpop.eup %6130  ;;  %6140 = vrcp.f32 %v4412_v9 }
 0x3a2   : > { %v4537_v36 = vmul.f32 %v6131_v10, %v7780_v48 }
 0x3a3   : > { %v6133_v28 = vpop.eup %6132 }
 0x3a4   : > { %v6135_v20 = vpop.eup %6134  ;;  %v4569_v30 = vadd.f32 %v4537_v36, %v4505_v31  ;;  %v4538_v7 = vmul.f32 %v6133_v28, %v7783_v32  ;;  %v4508_v32 = vld [vmem:[%s6484_s9 + $0xe8] sm:$0xff] }
 0x3a5   : > { %v4413_v55 = vadd.f32 1.0, %v6135_v20 }
 0x3a6   : > { %v6137_v52 = vpop.eup %6136  ;;  %4601 = vst [vmem:[%s6484_s9 + $0xd0] sm:$0xff] %v4569_v30  ;;  %v4570_v4 = vadd.f32 %v4538_v7, %v4506_v57 }
 0x3a7   : > { %6142 = vrcp.f32 %v4413_v55  ;;  %v4414_v18 = vadd.f32 1.0, %v6137_v52 }
 0x3a8   : > { %4602 = vst [vmem:[%s6484_s9 + $0xd8] sm:$0xff] %v4570_v4 }
 0x3a9   : > { %v6139_v48 = vpop.eup %6138  ;;  %6144 = vrcp.f32 %v4414_v18 }
 0x3aa   : > { %v4539_v46 = vmul.f32 %v6139_v48, %v7790_v37  ;;  %v4510_v37 = vld [vmem:[%s6484_s9 + $0xf8] sm:$0xff] }
 0x3ab   : > { %v6141_v59 = vpop.eup %6140 }
 0x3ac   : > { %v4571_v15 = vadd.f32 %v4539_v46, %v4507_v21  ;;  %v4540_v17 = vmul.f32 %v6141_v59, %v7793_v47 }
 0x3ae   : > { %4603 = vst [vmem:[%s6484_s9 + $0xe0] sm:$0xff] %v4571_v15  ;;  %v4572_v14 = vadd.f32 %v4540_v17, %v4508_v32 }
 0x3b0   : > { %4604 = vst [vmem:[%s6484_s9 + $0xe8] sm:$0xff] %v4572_v14 }
 0x3b1   : > { %v6143_v29 = vpop.eup %6142 }
 0x3b2   : > { %v4541_v12 = vmul.f32 %v6143_v29, %v7800_v44 }
 0x3b3   : > { %v6145_v43 = vpop.eup %6144 }
 0x3b4   : > { %v4573_v19 = vadd.f32 %v4541_v12, %v4509_v13  ;;  %v4542_v51 = vmul.f32 %v6145_v43, %v5244_v50 }
 0x3b6   : > { %4605 = vst [vmem:[%s6484_s9 + $0xf0] sm:$0xff] %v4573_v19  ;;  %v4574_v47 = vadd.f32 %v4542_v51, %v4510_v37 }
 0x3b8   : > { %4606 = vst [vmem:[%s6484_s9 + $0xf8] sm:$0xff] %v4574_v47 }
 0x3b9   : > { %6226 = shalt.err (!%p6223_p1)
}
 0x3ba   : > { %s6227_s9 = scalar_lea.hbm %s7830_s13, 4096  ;;  %s6231_s20 = scalar_lea.hbm %s7894_s4, 8192 }
 0x3bb   : > { %p6228_p4 = scmp.ne.s32.totalorder %s7830_s13, %s6227_s9  ;;  %p6232_p12 = scmp.lt.u32.totalorder %s7830_s13, %s7894_s4 }
 0x3bc   : > { %p6233_p13 = scmp.lt.u32.totalorder %s6231_s20, %s6227_s9  ;;  %p6235_p3 = scmp.lt.u32.totalorder %s6227_s9, %s7830_s13 }
 0x3bd   : > { %p6229_p7 = pnand %p6228_p4, %p7960_p5 }
 0x3be   : > { %p6234_p2 = por %p6233_p13, %p6232_p12 }
 0x3bf   : > { %p6230_p6 = pneg %p6229_p7 }
 0x3c0   : > { %p6236_p8 = por %p6235_p3, %p6234_p2 }
 0x3c2   : > { %p6237_p9 = pnand %p6236_p8, %p6230_p6 }
 0x3c4   : > { %6240 = shalt.err (!%p6237_p9)
}
 0x3c5   : > { %s6321_s22 = smov 128   ;;  %s6322_s28 = smov 8  }
 0x3c6   : > { %5700 = dma.vmem_to_hbm [thread:$0]  (%p7960_p5), %s7832_s19, 4096, %s7830_s13, %s7838_s29, %s6321_s22, %s6321_s22, %s6322_s28  }
 0x3c7 PF: > { %p5712_p10 = scmp.ge.s32.totalorder %s6313_s0, 2  ;;  %s4636_s18 = sand.u32 1, %s6285_s25  }
 0x3c8   : > { %p7961_p11 = scmp.ne.s32.totalorder %s7923_s12, 0  ;;  %s4637_s23 = scalar_lea.sflag [#allocation6], %s4636_s18 }
 0x3ca   : > { %p5707_p0 = pnand %p5712_p10, %p7961_p11 }
 0x3cc   : > { %6280 = dma.done.wait (!%p5707_p0), %s4637_s23, 4096  }
 0x3cd   : > { %6282 = vsyncadd (!%p5707_p0), %s4637_s23, 4294963200  ;;  %s22_s0 = sadd.s32 1, %s6313_s0   ;;  %s7962_s11 = sld [smem:[#allocation11_spill]] }
 0x3ce   : > { %p19_p1 = scmp.ge.s32.totalorder %s22_s0, 6   ;;  %s7963_s25 = smov %s6289_s26 }
 0x3cf   : > { %s7964_s26 = smov %s6293_s27  ;;  %s7965_s27 = smov %s6437_s16 }
 0x3d0   : > { %s7966_s28 = smov %s6305_s30  ;;  %s7967_s29 = smov %s6309_s5 }
 0x3d1   : > { %s7968_s30 = smov %s7971_s8  ;;  %21 = sbr.rel (!%p19_p1) target bundleno = 18 (0x12), region = 88 }
 0x3d3   : > { %s7969_s5 = smov %s7962_s11 }
 0x3d8   :  { %4642 = vsyncpa [#allocation5], 1 }
 0x3d9   :  { %4644 = vsyncpa [#allocation5 + $0x1], 1 }
 0x3da   :  { %4645 = vsyncpa [#allocation6], 1 }
 0x3db   :  { %4647 = vsyncpa [#allocation6 + $0x1], 1 }

</bundles_post_ra>
